<compile_context>
chip_gen: v7x
topology: tpu7x:2x2x1
jax: 0.10.0
libtpu: 0.0.40
codegen_flags: <defaults>
</compile_context>

<pallas_src>
import jax
import jax.numpy as jnp
from jax import lax
from jax.experimental import pallas as pl
from jax.experimental.pallas import tpu as pltpu

# hidden_dim == embedding_dim so the GNN layer-2 residual `x_new + x` in the reference
# code is shape-consistent; embedding_dim % 4 == 0 for the 4 GAT heads.
HIDDEN_DIM = 32
EMBED_DIM = 32
HEADS = 4
HEAD_DIM = EMBED_DIM // HEADS
LN_EPS = 1e-5
NEG_SLOPE = 0.2          # GATv2Conv default negative_slope


# ----------------------------------------------------------------------------- helpers
def _round_up(v, m):
    return ((v + m - 1) // m) * m


def _leaky_relu(v):
    return jnp.where(v >= 0.0, v, NEG_SLOPE * v)


def _sigmoid(v):
    return 1.0 / (1.0 + jnp.exp(-v))


def _layer_norm(h):
    # PyTorch nn.LayerNorm at default init (gamma=1, beta=0), eps=1e-5
    mu = jnp.mean(h, axis=-1, keepdims=True)
    d = h - mu
    var = jnp.mean(d * d, axis=-1, keepdims=True)
    return d * lax.rsqrt(var + LN_EPS)


def _masked_layer_norm(h, width, mask):
    # LayerNorm over the first `width` lanes of a zero-padded 32-lane tile.
    inv_w = 1.0 / float(width)
    mu = jnp.sum(h * mask, axis=-1, keepdims=True) * inv_w
    d = (h - mu) * mask
    var = jnp.sum(d * d, axis=-1, keepdims=True) * inv_w
    return d * lax.rsqrt(var + LN_EPS)


# ----------------------------------------------------------------------------- kernel
def fused_forward_kernel(occ_ref, idx_ref, mseg_ref, w64_ref, w32_ref, out_ref):
    C = EMBED_DIM
    n = mseg_ref.shape[0]          # m_seg is [N, N*N]
    b = occ_ref.shape[0]
    occ_pad = occ_ref.shape[1]

    m_seg = mseg_ref[...]          # m_seg[i, i*N+j] = adj[i, j]
    w64 = w64_ref[...]             # [wl0|wr0] (64 rows) ; [wl1|wr1] (32) ; skill_x (n)
    w32 = w32_ref[...]             # everything 32-wide (weights + biases)

    # ---- wide slab (lane-fused GAT weights + node features) ----
    wlr0 = w64[0:64]                               # [64, 64]  = [wl0 | wr0], zero-padded rows
    wlr1 = w64[64:64 + C]                          # [32, 64]  = [wl1 | wr1]
    x = w64[64 + C:64 + C + n]                     # [N, 64]   node features, zero-padded cols

    # ---- narrow slab slices (8-row-aligned static offsets) ----
    r = 0
    hm0 = w32[r:r + C]; r += C                     # diag(att0) @ block-diag head mix
    hm1 = w32[r:r + C]; r += C                     # att1 broadcast (single head)
    ow1 = w32[r:r + occ_pad]; r += occ_pad
    ow2 = w32[r:r + C]; r += C
    wat = w32[r:r + C]; r += C                     # folded cross-attention wv @ wo
    fw1 = w32[r:r + 3 * C]; r += 3 * C
    fw2 = w32[r:r + C]; r += C
    mw1 = w32[r:r + 2 * C]; r += 2 * C
    mw2 = w32[r:r + C]; r += C
    mw3 = w32[r:r + C]; r += C
    mw4 = w32[r:r + C]; r += C
    bblk = w32[r:r + 16]
    b_xr0 = bblk[0:1]; b_out0 = bblk[1:2]; b_xr1 = bblk[2:3]; b_out1 = bblk[3:4]
    ob1 = bblk[4:5]; ob2 = bblk[5:6]; b_attn = bblk[6:7]; fb1 = bblk[7:8]
    fb2 = bblk[8:9]; mb1 = bblk[9:10]; mb2 = bblk[10:11]; mb3 = bblk[11:12]; mb4 = bblk[12:13]

    def dot(a, w):
        return jnp.dot(a, w, preferred_element_type=jnp.float32)

    relu = lambda v: jnp.maximum(v, 0.0)

    def gatv2(h_in, wlr, b_xr, hm_att, b_out):
        # Dense GATv2Conv, heads kept replicated along the 32 channels:
        #   e_h(i,j) = att_h . leaky_relu(lin_r(x_i) + lin_l(x_j))   (att folded into hm_att)
        #   alpha_h  = softmax over sources j restricted to edges j->i (mask folded into m_seg)
        #   out_i    = concat_h sum_j alpha_h(i,j) * W_l x_j + (bias + b_l)   (value bias folded)
        xlr = dot(h_in, wlr)                                            # [N, 64] = [xl | xr]
        xl = xlr[:, :C]                                                 # source / value term (no bias)
        xr = xlr[:, C:] + b_xr                                          # target term, bias = bl + br
        s = (xr[:, None, :] + xl[None, :, :]).reshape(n * n, C)         # [(i,j), C]
        e = dot(_leaky_relu(s), hm_att)                                 # head-summed, channel-replicated
        e = jnp.clip(e, -30.0, 30.0)    # overflow guard (shift-free softmax; no-op at init scale)
        p = jnp.exp(e)                                                  # [(i,j), C]
        xl_t = jnp.broadcast_to(xl[None, :, :], (n, n, C)).reshape(n * n, C)
        pd = jnp.concatenate([p, p * xl_t], axis=-1)                    # [(i,j), 64] = [p | p*xl_j]
        agg = dot(m_seg, pd)                                            # [N, 64] = [denom | num]
        denom = jnp.maximum(agg[:, :C], 1e-30)  # unreachable with self-loops; never NaN
        return agg[:, C:] * pl.reciprocal(denom, approx=True) + b_out   # [N, C]

    # ---- SkillPathEncoder: 2 GATv2 layers, ReLU, layer-2 residual (dropout = id in eval) ----
    h1 = relu(gatv2(x, wlr0, b_xr0, hm0, b_out0))
    h2 = relu(gatv2(h1, wlr1, b_xr1, hm1, b_out1) + h1)
    # TODO(synk): outer residual `x + original_x` only applies when skill_in_dim == embedding_dim;
    # skipped here (dims differ), matching the size check in the PyTorch code.
    skill_emb = h2                                                      # [N, C]

    # ---- per-batch gather fused in-kernel: one-hot(skill_idx) @ skill_embeddings ----
    idx = idx_ref[...]                                                  # [B, 1] int32
    onehot = (lax.broadcasted_iota(jnp.int32, (b, n), 1) == idx).astype(jnp.float32)
    skl = dot(onehot, skill_emb)                                        # [B, C]

    # OccupationEncoder (2 layers): Linear -> ReLU -> Dropout(id) -> Linear
    occ = dot(relu(dot(occ_ref[...], ow1) + ob1), ow2) + ob2            # [B, C]

    # Cross-attention with a length-1 key/value sequence: softmax over one key == 1, so
    # attn == out_proj(v_proj(occupation_embeddings)); both linears folded host-side.
    attn = dot(occ, wat) + b_attn                                       # [B, C]

    # Feature enhancement: single [B,96] @ [96,32] dot on the lane-concatenated features.
    feat = jnp.concatenate([skl, attn, skl * attn], axis=-1)            # [B, 96]
    f = dot(feat, fw1) + fb1
    enh = _layer_norm(dot(relu(_layer_norm(f)), fw2) + fb2)             # [B, C]

    # Matching predictor: single [B,64] @ [64,32] dot; narrow H/2, H/4 layers run
    # zero-padded to 32 lanes with width-masked LayerNorms.
    lane = lax.broadcasted_iota(jnp.int32, (1, C), 1)
    mask16 = (lane < HIDDEN_DIM // 2).astype(jnp.float32)
    mask8 = (lane < HIDDEN_DIM // 4).astype(jnp.float32)

    comb = jnp.concatenate([occ, enh], axis=-1)                         # [B, 64]
    h = relu(_layer_norm(dot(comb, mw1) + mb1))                         # [B, 32]
    h = relu(_masked_layer_norm(dot(h, mw2) + mb2, HIDDEN_DIM // 2, mask16))
    h = relu(_masked_layer_norm(dot(h, mw3) + mb3, HIDDEN_DIM // 4, mask8))
    logit = dot(h, mw4) + mb4                                           # [B, 32]; col 0 = real logit
    out_ref[...] = _sigmoid(logit)                                      # lane-dense store


# ----------------------------------------------------------------------------- packing
def pack_params(params, skill_x, adj, occ_in):
    """Fold + pack all model constants (weights, biases, skill node features, m_seg)
    into 3 contiguous arrays so the kernel takes only 5 inputs."""
    C = EMBED_DIM
    n, skill_in = skill_x.shape
    assert skill_in <= 64  # TODO(synk): tile the first-layer K dim if skill_input_dim > 64
    n_pad = _round_up(n, 8)
    occ_pad = _round_up(occ_in, 8)

    (wl0, bl0, wr0, br0, att0, bo0,
     wl1, bl1, wr1, br1, att1, bo1) = params["gnn"]

    def pad2(w, rows, cols):
        return jnp.pad(w, ((0, rows - w.shape[0]), (0, cols - w.shape[1])))

    # ---- GATv2 folds (all exact) ----
    head_id = jnp.arange(C) // HEAD_DIM
    headmix0 = (head_id[:, None] == head_id[None, :]).astype(jnp.float32)
    hm_att0 = att0.reshape(-1)[:, None] * headmix0              # diag(att0) @ block-diag head sum
    hm_att1 = jnp.broadcast_to(att1.reshape(C, 1), (C, C))      # single-head: e[:,c'] = lrelu(s) . att1

    b_xr0 = bl0 + br0                                           # attention-logit bias -> xr only
    b_out0 = bo0 + bl0                                          # value bias: sum_j alpha == 1
    b_xr1 = bl1 + br1
    b_out1 = bo1 + bl1

    wlr0 = pad2(jnp.concatenate([wl0, wr0], axis=1), 64, 2 * C)      # [64, 64]
    wlr1 = jnp.concatenate([wl1, wr1], axis=1)                       # [32, 64]
    x64 = pad2(skill_x.astype(jnp.float32), n_pad, 2 * C)            # [n_pad, 64]
    w64 = jnp.concatenate([wlr0, wlr1, x64], axis=0)

    # ---- head folds ----
    (ow1, ob1, ow2, ob2, wv, bv, wo, bo,
     fw1, fb1, fw2, fb2,
     mw1, mb1, mw2, mb2, mw3, mb3, mw4, mb4) = params["head"]

    w_attn = wv @ wo                      # length-1 KV softmax == 1 -> out_proj(v_proj(.))
    b_attn = bv @ wo + bo

    def padb(bb):
        return jnp.pad(bb, ((0, 0), (0, C - bb.shape[1])))

    w32 = jnp.concatenate([
        hm_att0, hm_att1,
        pad2(ow1, occ_pad, C), ow2, w_attn,
        fw1, fw2, mw1,
        pad2(mw2, C, C), pad2(mw3, C, C), pad2(mw4, C, C),
        # bias block (16 rows, 8-aligned tail)
        b_xr0, b_out0, b_xr1, b_out1,
        ob1, ob2, b_attn, fb1, fb2, mb1,
        padb(mb2), padb(mb3), padb(mb4),
        jnp.zeros((3, C), jnp.float32),
    ], axis=0)

    # masked-softmax segment matrix: m_seg[i, i*N+j] = adj[i, j]  (adj[i,j]=1 iff edge j->i),
    # built once here instead of per forward call.
    m_seg = (jnp.eye(n, dtype=jnp.float32)[:, :, None] * adj[:, None, :]).reshape(n, n * n)

    return {"w64": w64, "w32": w32, "m_seg": m_seg, "occ_pad": occ_pad}


# ----------------------------------------------------------------------------- wrapper
def skill_matching_forward(occupation_features, skill_idx, packed):
    """Equivalent of SkillMatchingModel.forward(occupation_features, skill_idx) in eval mode
    (skill_paths=None, match=None).  Returns (match_prob [B], total_loss=None)."""
    occ_pad = packed["occ_pad"]
    occ_p = jnp.pad(occupation_features,
                    ((0, 0), (0, occ_pad - occupation_features.shape[1])))
    idx2 = skill_idx.astype(jnp.int32).reshape(-1, 1)
    b = occ_p.shape[0]

    vspec = pl.BlockSpec(memory_space=pltpu.MemorySpace.VMEM)
    out = pl.pallas_call(
        fused_forward_kernel,
        out_shape=jax.ShapeDtypeStruct((b, EMBED_DIM), jnp.float32),
        in_specs=[vspec] * 5,
        out_specs=vspec,
    )(occ_p, idx2, packed["m_seg"], packed["w64"], packed["w32"])
    # TODO(synk): importance_head / level_head and Focal/MSE/CE losses are only exercised when
    # labels are given; with match=None total_loss is None, so they are not computed here.
    # TODO(synk): the bidirectional-LSTM skill-path branch (pack_padded_sequence) and the
    # ordered-message-passing edge weights (numerically dead for the edge-feature-less GATv2
    # branch) are not translated.
    return out[:, 0], None


# ----------------------------------------------------------------------------- init
def init_params(key, skill_in_dim, occ_in_dim):
    keys = jax.random.split(key, 64)
    it = iter(keys)

    def lin(fan_in, fan_out):
        bound = float(fan_in) ** -0.5
        w = jax.random.uniform(next(it), (fan_in, fan_out), jnp.float32, -bound, bound)
        bb = jax.random.uniform(next(it), (1, fan_out), jnp.float32, -bound, bound)
        return w, bb

    def att_param(heads, ch):
        bound = float(ch) ** -0.5
        return jax.random.uniform(next(it), (heads, ch), jnp.float32, -bound, bound)

    # ---- SkillPathEncoder (2 GATv2 layers) ----
    wl0, bl0 = lin(skill_in_dim, HEADS * HEAD_DIM)     # lin_l
    wr0, br0 = lin(skill_in_dim, HEADS * HEAD_DIM)     # lin_r
    att0 = att_param(HEADS, HEAD_DIM)
    bo0 = jnp.zeros((1, HEADS * HEAD_DIM), jnp.float32)
    wl1, bl1 = lin(HEADS * HEAD_DIM, EMBED_DIM)
    wr1, br1 = lin(HEADS * HEAD_DIM, EMBED_DIM)
    att1 = att_param(1, EMBED_DIM)
    bo1 = jnp.zeros((1, EMBED_DIM), jnp.float32)
    gnn = (wl0, bl0, wr0, br0, att0, bo0, wl1, bl1, wr1, br1, att1, bo1)

    # ---- OccupationEncoder ----
    ow1, ob1 = lin(occ_in_dim, HIDDEN_DIM)
    ow2, ob2 = lin(HIDDEN_DIM, EMBED_DIM)
    # ---- cross_attention (only v-proj + out-proj matter numerically for seq len 1) ----
    wv, bv = lin(EMBED_DIM, EMBED_DIM)
    wo, bo = lin(EMBED_DIM, EMBED_DIM)
    # ---- feature_enhancement ----
    fw1, fb1 = lin(3 * EMBED_DIM, HIDDEN_DIM)
    fw2, fb2 = lin(HIDDEN_DIM, EMBED_DIM)
    # ---- matching_predictor ----
    mw1, mb1 = lin(2 * EMBED_DIM, HIDDEN_DIM)
    mw2, mb2 = lin(HIDDEN_DIM, HIDDEN_DIM // 2)
    mw3, mb3 = lin(HIDDEN_DIM // 2, HIDDEN_DIM // 4)
    mw4, mb4 = lin(HIDDEN_DIM // 4, 1)
    head = (ow1, ob1, ow2, ob2, wv, bv, wo, bo,
            fw1, fb1, fw2, fb2,
            mw1, mb1, mw2, mb2, mw3, mb3, mw4, mb4)

    return {"gnn": gnn, "head": head}


# ----------------------------------------------------------------------------- main
if __name__ == "__main__":
    N_SKILLS = 16     # nodes of the skill graph
    BATCH = 4
    SKILL_IN = 16     # skill_input_dim (!= EMBED_DIM -> outer residual skipped, as in torch)
    OCC_IN = 12       # occupation_input_dim
    N_EDGES = 32

    root = jax.random.PRNGKey(0)
    k_x, k_occ, k_src, k_dst, k_idx, k_par = jax.random.split(root, 6)

    skill_x = jax.random.normal(k_x, (N_SKILLS, SKILL_IN), jnp.float32)
    occupation_features = jax.random.normal(k_occ, (BATCH, OCC_IN), jnp.float32)
    src = jax.random.randint(k_src, (N_EDGES,), 0, N_SKILLS)
    dst = jax.random.randint(k_dst, (N_EDGES,), 0, N_SKILLS)
    skill_idx = jax.random.randint(k_idx, (BATCH,), 0, N_SKILLS)

    # dense adjacency with self-loops: adj[i, j] = 1 iff edge j -> i
    adj = jnp.zeros((N_SKILLS, N_SKILLS), jnp.float32)
    adj = adj.at[dst, src].set(1.0)
    adj = adj.at[jnp.arange(N_SKILLS), jnp.arange(N_SKILLS)].set(1.0)

    params = init_params(k_par, SKILL_IN, OCC_IN)
    packed = pack_params(params, skill_x, adj, OCC_IN)

    match_prob, total_loss = skill_matching_forward(occupation_features, skill_idx, packed)
    match_prob = jax.block_until_ready(match_prob)

    assert match_prob.shape == (BATCH,)
    assert bool(jnp.all(jnp.isfinite(match_prob)))
    assert bool(jnp.all((match_prob >= 0.0) & (match_prob <= 1.0)))
    assert total_loss is None
    print("KERNEL_OK")
</pallas_src>

<mosaic_0001>
module attributes {stable_mosaic.version = 11 : i64} {
  func.func @fused_forward_kernel(%arg0: memref<4x16xf32, #tpu.memory_space<vmem>>, %arg1: memref<4x1xi32, #tpu.memory_space<vmem>>, %arg2: memref<16x256xf32, #tpu.memory_space<vmem>>, %arg3: memref<112x64xf32, #tpu.memory_space<vmem>>, %arg4: memref<448x32xf32, #tpu.memory_space<vmem>>, %arg5: memref<4x32xf32, #tpu.memory_space<vmem>>) attributes {dimension_semantics = [], scalar_prefetch = 0 : i64, scratch_operands = 0 : i64, tpu.core_type = #tpu.core_type<tc>} {
    %c0 = arith.constant 0 : index
    %c0_0 = arith.constant 0 : index
    %0 = vector.load %arg2[%c0, %c0_0] : memref<16x256xf32, #tpu.memory_space<vmem>>, vector<16x256xf32>
    %c0_1 = arith.constant 0 : index
    %c0_2 = arith.constant 0 : index
    %1 = vector.load %arg3[%c0_1, %c0_2] : memref<112x64xf32, #tpu.memory_space<vmem>>, vector<112x64xf32>
    %c0_3 = arith.constant 0 : index
    %c0_4 = arith.constant 0 : index
    %2 = vector.load %arg4[%c0_3, %c0_4] : memref<448x32xf32, #tpu.memory_space<vmem>>, vector<448x32xf32>
    %3 = vector.extract_strided_slice %1 {offsets = [0, 0], sizes = [64, 64], strides = [1, 1]} : vector<112x64xf32> to vector<64x64xf32>
    %4 = vector.extract_strided_slice %1 {offsets = [64, 0], sizes = [32, 64], strides = [1, 1]} : vector<112x64xf32> to vector<32x64xf32>
    %5 = vector.extract_strided_slice %1 {offsets = [96, 0], sizes = [16, 64], strides = [1, 1]} : vector<112x64xf32> to vector<16x64xf32>
    %6 = vector.extract_strided_slice %2 {offsets = [0, 0], sizes = [32, 32], strides = [1, 1]} : vector<448x32xf32> to vector<32x32xf32>
    %7 = vector.extract_strided_slice %2 {offsets = [32, 0], sizes = [32, 32], strides = [1, 1]} : vector<448x32xf32> to vector<32x32xf32>
    %8 = vector.extract_strided_slice %2 {offsets = [64, 0], sizes = [16, 32], strides = [1, 1]} : vector<448x32xf32> to vector<16x32xf32>
    %9 = vector.extract_strided_slice %2 {offsets = [80, 0], sizes = [32, 32], strides = [1, 1]} : vector<448x32xf32> to vector<32x32xf32>
    %10 = vector.extract_strided_slice %2 {offsets = [112, 0], sizes = [32, 32], strides = [1, 1]} : vector<448x32xf32> to vector<32x32xf32>
    %11 = vector.extract_strided_slice %2 {offsets = [144, 0], sizes = [96, 32], strides = [1, 1]} : vector<448x32xf32> to vector<96x32xf32>
    %12 = vector.extract_strided_slice %2 {offsets = [240, 0], sizes = [32, 32], strides = [1, 1]} : vector<448x32xf32> to vector<32x32xf32>
    %13 = vector.extract_strided_slice %2 {offsets = [272, 0], sizes = [64, 32], strides = [1, 1]} : vector<448x32xf32> to vector<64x32xf32>
    %14 = vector.extract_strided_slice %2 {offsets = [336, 0], sizes = [32, 32], strides = [1, 1]} : vector<448x32xf32> to vector<32x32xf32>
    %15 = vector.extract_strided_slice %2 {offsets = [368, 0], sizes = [32, 32], strides = [1, 1]} : vector<448x32xf32> to vector<32x32xf32>
    %16 = vector.extract_strided_slice %2 {offsets = [400, 0], sizes = [32, 32], strides = [1, 1]} : vector<448x32xf32> to vector<32x32xf32>
    %17 = vector.extract_strided_slice %2 {offsets = [432, 0], sizes = [16, 32], strides = [1, 1]} : vector<448x32xf32> to vector<16x32xf32>
    %18 = vector.extract_strided_slice %17 {offsets = [0, 0], sizes = [1, 32], strides = [1, 1]} : vector<16x32xf32> to vector<1x32xf32>
    %19 = vector.extract_strided_slice %17 {offsets = [1, 0], sizes = [1, 32], strides = [1, 1]} : vector<16x32xf32> to vector<1x32xf32>
    %20 = vector.extract_strided_slice %17 {offsets = [2, 0], sizes = [1, 32], strides = [1, 1]} : vector<16x32xf32> to vector<1x32xf32>
    %21 = vector.extract_strided_slice %17 {offsets = [3, 0], sizes = [1, 32], strides = [1, 1]} : vector<16x32xf32> to vector<1x32xf32>
    %22 = vector.extract_strided_slice %17 {offsets = [4, 0], sizes = [1, 32], strides = [1, 1]} : vector<16x32xf32> to vector<1x32xf32>
    %23 = vector.extract_strided_slice %17 {offsets = [5, 0], sizes = [1, 32], strides = [1, 1]} : vector<16x32xf32> to vector<1x32xf32>
    %24 = vector.extract_strided_slice %17 {offsets = [6, 0], sizes = [1, 32], strides = [1, 1]} : vector<16x32xf32> to vector<1x32xf32>
    %25 = vector.extract_strided_slice %17 {offsets = [7, 0], sizes = [1, 32], strides = [1, 1]} : vector<16x32xf32> to vector<1x32xf32>
    %26 = vector.extract_strided_slice %17 {offsets = [8, 0], sizes = [1, 32], strides = [1, 1]} : vector<16x32xf32> to vector<1x32xf32>
    %27 = vector.extract_strided_slice %17 {offsets = [9, 0], sizes = [1, 32], strides = [1, 1]} : vector<16x32xf32> to vector<1x32xf32>
    %28 = vector.extract_strided_slice %17 {offsets = [10, 0], sizes = [1, 32], strides = [1, 1]} : vector<16x32xf32> to vector<1x32xf32>
    %29 = vector.extract_strided_slice %17 {offsets = [11, 0], sizes = [1, 32], strides = [1, 1]} : vector<16x32xf32> to vector<1x32xf32>
    %30 = vector.extract_strided_slice %17 {offsets = [12, 0], sizes = [1, 32], strides = [1, 1]} : vector<16x32xf32> to vector<1x32xf32>
    %cst = arith.constant dense<0.000000e+00> : vector<16x64xf32>
    %31 = tpu.matmul %5, %3, %cst {dimension_numbers = #tpu.dot_dimension_numbers<[1], [0], [0], [1], [0, 0, 1, 1], [], []>} : vector<16x64xf32>, vector<64x64xf32>, vector<16x64xf32> -> vector<16x64xf32>
    %32 = vector.extract_strided_slice %31 {offsets = [0, 0], sizes = [16, 32], strides = [1, 1]} : vector<16x64xf32> to vector<16x32xf32>
    %33 = vector.extract_strided_slice %31 {offsets = [0, 32], sizes = [16, 32], strides = [1, 1]} : vector<16x64xf32> to vector<16x32xf32>
    %34 = vector.broadcast %18 : vector<1x32xf32> to vector<16x32xf32>
    %35 = arith.addf %33, %34 : vector<16x32xf32>
    %36 = vector.shape_cast %35 : vector<16x32xf32> to vector<16x1x32xf32>
    %37 = vector.shape_cast %32 : vector<16x32xf32> to vector<1x16x32xf32>
    %38 = vector.broadcast %36 : vector<16x1x32xf32> to vector<16x16x32xf32>
    %39 = vector.broadcast %37 : vector<1x16x32xf32> to vector<16x16x32xf32>
    %40 = arith.addf %38, %39 : vector<16x16x32xf32>
    %41 = vector.shape_cast %40 : vector<16x16x32xf32> to vector<256x32xf32>
    %cst_5 = arith.constant 0.000000e+00 : f32
    %42 = vector.broadcast %cst_5 : f32 to vector<256x32xf32>
    %43 = arith.cmpf oge, %41, %42 : vector<256x32xf32>
    %cst_6 = arith.constant 2.000000e-01 : f32
    %44 = vector.broadcast %cst_6 : f32 to vector<256x32xf32>
    %45 = arith.mulf %44, %41 : vector<256x32xf32>
    %46 = arith.select %43, %41, %45 : vector<256x32xi1>, vector<256x32xf32>
    %cst_7 = arith.constant dense<0.000000e+00> : vector<256x32xf32>
    %47 = tpu.matmul %46, %6, %cst_7 {dimension_numbers = #tpu.dot_dimension_numbers<[1], [0], [0], [1], [0, 0, 1, 1], [], []>} : vector<256x32xf32>, vector<32x32xf32>, vector<256x32xf32> -> vector<256x32xf32>
    %cst_8 = arith.constant -3.000000e+01 : f32
    %cst_9 = arith.constant 3.000000e+01 : f32
    %48 = vector.broadcast %cst_8 : f32 to vector<256x32xf32>
    %49 = arith.maximumf %48, %47 : vector<256x32xf32>
    %50 = vector.broadcast %cst_9 : f32 to vector<256x32xf32>
    %51 = arith.minimumf %50, %49 : vector<256x32xf32>
    %52 = math.exp %51 : vector<256x32xf32>
    %53 = vector.shape_cast %32 : vector<16x32xf32> to vector<1x16x32xf32>
    %54 = vector.shape_cast %53 : vector<1x16x32xf32> to vector<1x16x32xf32>
    %55 = vector.broadcast %54 : vector<1x16x32xf32> to vector<16x16x32xf32>
    %56 = vector.shape_cast %55 : vector<16x16x32xf32> to vector<256x32xf32>
    %57 = arith.mulf %52, %56 : vector<256x32xf32>
    %58 = tpu.concatenate %52, %57 in 1 : vector<256x32xf32>, vector<256x32xf32> -> vector<256x64xf32>
    %cst_10 = arith.constant dense<0.000000e+00> : vector<16x64xf32>
    %59 = tpu.matmul %0, %58, %cst_10 {dimension_numbers = #tpu.dot_dimension_numbers<[1], [0], [0], [1], [0, 0, 1, 1], [], []>} : vector<16x256xf32>, vector<256x64xf32>, vector<16x64xf32> -> vector<16x64xf32>
    %60 = vector.extract_strided_slice %59 {offsets = [0, 0], sizes = [16, 32], strides = [1, 1]} : vector<16x64xf32> to vector<16x32xf32>
    %cst_11 = arith.constant 1.000000e-30 : f32
    %61 = vector.broadcast %cst_11 : f32 to vector<16x32xf32>
    %62 = arith.maximumf %60, %61 : vector<16x32xf32>
    %63 = vector.extract_strided_slice %59 {offsets = [0, 32], sizes = [16, 32], strides = [1, 1]} : vector<16x64xf32> to vector<16x32xf32>
    %64 = tpu.reciprocal %62 {approx = true} : vector<16x32xf32> -> vector<16x32xf32>
    %65 = arith.mulf %63, %64 : vector<16x32xf32>
    %66 = vector.broadcast %19 : vector<1x32xf32> to vector<16x32xf32>
    %67 = arith.addf %65, %66 : vector<16x32xf32>
    %cst_12 = arith.constant 0.000000e+00 : f32
    %68 = vector.broadcast %cst_12 : f32 to vector<16x32xf32>
    %69 = arith.maximumf %67, %68 : vector<16x32xf32>
    %cst_13 = arith.constant dense<0.000000e+00> : vector<16x64xf32>
    %70 = tpu.matmul %69, %4, %cst_13 {dimension_numbers = #tpu.dot_dimension_numbers<[1], [0], [0], [1], [0, 0, 1, 1], [], []>} : vector<16x32xf32>, vector<32x64xf32>, vector<16x64xf32> -> vector<16x64xf32>
    %71 = vector.extract_strided_slice %70 {offsets = [0, 0], sizes = [16, 32], strides = [1, 1]} : vector<16x64xf32> to vector<16x32xf32>
    %72 = vector.extract_strided_slice %70 {offsets = [0, 32], sizes = [16, 32], strides = [1, 1]} : vector<16x64xf32> to vector<16x32xf32>
    %73 = vector.broadcast %20 : vector<1x32xf32> to vector<16x32xf32>
    %74 = arith.addf %72, %73 : vector<16x32xf32>
    %75 = vector.shape_cast %74 : vector<16x32xf32> to vector<16x1x32xf32>
    %76 = vector.shape_cast %71 : vector<16x32xf32> to vector<1x16x32xf32>
    %77 = vector.broadcast %75 : vector<16x1x32xf32> to vector<16x16x32xf32>
    %78 = vector.broadcast %76 : vector<1x16x32xf32> to vector<16x16x32xf32>
    %79 = arith.addf %77, %78 : vector<16x16x32xf32>
    %80 = vector.shape_cast %79 : vector<16x16x32xf32> to vector<256x32xf32>
    %cst_14 = arith.constant 0.000000e+00 : f32
    %81 = vector.broadcast %cst_14 : f32 to vector<256x32xf32>
    %82 = arith.cmpf oge, %80, %81 : vector<256x32xf32>
    %cst_15 = arith.constant 2.000000e-01 : f32
    %83 = vector.broadcast %cst_15 : f32 to vector<256x32xf32>
    %84 = arith.mulf %83, %80 : vector<256x32xf32>
    %85 = arith.select %82, %80, %84 : vector<256x32xi1>, vector<256x32xf32>
    %cst_16 = arith.constant dense<0.000000e+00> : vector<256x32xf32>
    %86 = tpu.matmul %85, %7, %cst_16 {dimension_numbers = #tpu.dot_dimension_numbers<[1], [0], [0], [1], [0, 0, 1, 1], [], []>} : vector<256x32xf32>, vector<32x32xf32>, vector<256x32xf32> -> vector<256x32xf32>
    %cst_17 = arith.constant -3.000000e+01 : f32
    %cst_18 = arith.constant 3.000000e+01 : f32
    %87 = vector.broadcast %cst_17 : f32 to vector<256x32xf32>
    %88 = arith.maximumf %87, %86 : vector<256x32xf32>
    %89 = vector.broadcast %cst_18 : f32 to vector<256x32xf32>
    %90 = arith.minimumf %89, %88 : vector<256x32xf32>
    %91 = math.exp %90 : vector<256x32xf32>
    %92 = vector.shape_cast %71 : vector<16x32xf32> to vector<1x16x32xf32>
    %93 = vector.shape_cast %92 : vector<1x16x32xf32> to vector<1x16x32xf32>
    %94 = vector.broadcast %93 : vector<1x16x32xf32> to vector<16x16x32xf32>
    %95 = vector.shape_cast %94 : vector<16x16x32xf32> to vector<256x32xf32>
    %96 = arith.mulf %91, %95 : vector<256x32xf32>
    %97 = tpu.concatenate %91, %96 in 1 : vector<256x32xf32>, vector<256x32xf32> -> vector<256x64xf32>
    %cst_19 = arith.constant dense<0.000000e+00> : vector<16x64xf32>
    %98 = tpu.matmul %0, %97, %cst_19 {dimension_numbers = #tpu.dot_dimension_numbers<[1], [0], [0], [1], [0, 0, 1, 1], [], []>} : vector<16x256xf32>, vector<256x64xf32>, vector<16x64xf32> -> vector<16x64xf32>
    %99 = vector.extract_strided_slice %98 {offsets = [0, 0], sizes = [16, 32], strides = [1, 1]} : vector<16x64xf32> to vector<16x32xf32>
    %cst_20 = arith.constant 1.000000e-30 : f32
    %100 = vector.broadcast %cst_20 : f32 to vector<16x32xf32>
    %101 = arith.maximumf %99, %100 : vector<16x32xf32>
    %102 = vector.extract_strided_slice %98 {offsets = [0, 32], sizes = [16, 32], strides = [1, 1]} : vector<16x64xf32> to vector<16x32xf32>
    %103 = tpu.reciprocal %101 {approx = true} : vector<16x32xf32> -> vector<16x32xf32>
    %104 = arith.mulf %102, %103 : vector<16x32xf32>
    %105 = vector.broadcast %21 : vector<1x32xf32> to vector<16x32xf32>
    %106 = arith.addf %104, %105 : vector<16x32xf32>
    %107 = arith.addf %106, %69 : vector<16x32xf32>
    %cst_21 = arith.constant 0.000000e+00 : f32
    %108 = vector.broadcast %cst_21 : f32 to vector<16x32xf32>
    %109 = arith.maximumf %107, %108 : vector<16x32xf32>
    %c0_22 = arith.constant 0 : index
    %c0_23 = arith.constant 0 : index
    %110 = vector.load %arg1[%c0_22, %c0_23] : memref<4x1xi32, #tpu.memory_space<vmem>>, vector<4x1xi32>
    %111 = tpu.iota {dimensions = array<i32: 1>} : vector<4x16xi32>
    %112 = vector.broadcast %110 : vector<4x1xi32> to vector<4x16xi32>
    %113 = arith.cmpi eq, %111, %112 : vector<4x16xi32>
    %114 = arith.extui %113 : vector<4x16xi1> to vector<4x16xi32>
    %115 = arith.sitofp %114 : vector<4x16xi32> to vector<4x16xf32>
    %cst_24 = arith.constant dense<0.000000e+00> : vector<4x32xf32>
    %116 = tpu.matmul %115, %109, %cst_24 {dimension_numbers = #tpu.dot_dimension_numbers<[1], [0], [0], [1], [0, 0, 1, 1], [], []>} : vector<4x16xf32>, vector<16x32xf32>, vector<4x32xf32> -> vector<4x32xf32>
    %c0_25 = arith.constant 0 : index
    %c0_26 = arith.constant 0 : index
    %117 = vector.load %arg0[%c0_25, %c0_26] : memref<4x16xf32, #tpu.memory_space<vmem>>, vector<4x16xf32>
    %cst_27 = arith.constant dense<0.000000e+00> : vector<4x32xf32>
    %118 = tpu.matmul %117, %8, %cst_27 {dimension_numbers = #tpu.dot_dimension_numbers<[1], [0], [0], [1], [0, 0, 1, 1], [], []>} : vector<4x16xf32>, vector<16x32xf32>, vector<4x32xf32> -> vector<4x32xf32>
    %119 = vector.broadcast %22 : vector<1x32xf32> to vector<4x32xf32>
    %120 = arith.addf %118, %119 : vector<4x32xf32>
    %cst_28 = arith.constant 0.000000e+00 : f32
    %121 = vector.broadcast %cst_28 : f32 to vector<4x32xf32>
    %122 = arith.maximumf %120, %121 : vector<4x32xf32>
    %cst_29 = arith.constant dense<0.000000e+00> : vector<4x32xf32>
    %123 = tpu.matmul %122, %9, %cst_29 {dimension_numbers = #tpu.dot_dimension_numbers<[1], [0], [0], [1], [0, 0, 1, 1], [], []>} : vector<4x32xf32>, vector<32x32xf32>, vector<4x32xf32> -> vector<4x32xf32>
    %124 = vector.broadcast %23 : vector<1x32xf32> to vector<4x32xf32>
    %125 = arith.addf %123, %124 : vector<4x32xf32>
    %cst_30 = arith.constant dense<0.000000e+00> : vector<4x32xf32>
    %126 = tpu.matmul %125, %10, %cst_30 {dimension_numbers = #tpu.dot_dimension_numbers<[1], [0], [0], [1], [0, 0, 1, 1], [], []>} : vector<4x32xf32>, vector<32x32xf32>, vector<4x32xf32> -> vector<4x32xf32>
    %127 = vector.broadcast %24 : vector<1x32xf32> to vector<4x32xf32>
    %128 = arith.addf %126, %127 : vector<4x32xf32>
    %129 = arith.mulf %116, %128 : vector<4x32xf32>
    %130 = tpu.concatenate %116, %128, %129 in 1 : vector<4x32xf32>, vector<4x32xf32>, vector<4x32xf32> -> vector<4x96xf32>
    %cst_31 = arith.constant dense<0.000000e+00> : vector<4x32xf32>
    %131 = tpu.matmul %130, %11, %cst_31 {dimension_numbers = #tpu.dot_dimension_numbers<[1], [0], [0], [1], [0, 0, 1, 1], [], []>} : vector<4x96xf32>, vector<96x32xf32>, vector<4x32xf32> -> vector<4x32xf32>
    %132 = vector.broadcast %25 : vector<1x32xf32> to vector<4x32xf32>
    %133 = arith.addf %131, %132 : vector<4x32xf32>
    %cst_32 = arith.constant dense<0.000000e+00> : vector<4xf32>
    %134 = vector.multi_reduction <add>, %133, %cst_32 [1] : vector<4x32xf32> to vector<4xf32>
    %135 = vector.shape_cast %134 : vector<4xf32> to vector<4x1xf32>
    %cst_33 = arith.constant 3.200000e+01 : f32
    %136 = vector.broadcast %cst_33 : f32 to vector<4x1xf32>
    %137 = arith.divf %135, %136 : vector<4x1xf32>
    %138 = vector.broadcast %137 : vector<4x1xf32> to vector<4x32xf32>
    %139 = arith.subf %133, %138 : vector<4x32xf32>
    %140 = arith.mulf %139, %139 : vector<4x32xf32>
    %cst_34 = arith.constant dense<0.000000e+00> : vector<4xf32>
    %141 = vector.multi_reduction <add>, %140, %cst_34 [1] : vector<4x32xf32> to vector<4xf32>
    %142 = vector.shape_cast %141 : vector<4xf32> to vector<4x1xf32>
    %cst_35 = arith.constant 3.200000e+01 : f32
    %143 = vector.broadcast %cst_35 : f32 to vector<4x1xf32>
    %144 = arith.divf %142, %143 : vector<4x1xf32>
    %cst_36 = arith.constant 9.99999974E-6 : f32
    %145 = vector.broadcast %cst_36 : f32 to vector<4x1xf32>
    %146 = arith.addf %144, %145 : vector<4x1xf32>
    %147 = math.rsqrt %146 : vector<4x1xf32>
    %148 = vector.broadcast %147 : vector<4x1xf32> to vector<4x32xf32>
    %149 = arith.mulf %139, %148 : vector<4x32xf32>
    %cst_37 = arith.constant 0.000000e+00 : f32
    %150 = vector.broadcast %cst_37 : f32 to vector<4x32xf32>
    %151 = arith.maximumf %149, %150 : vector<4x32xf32>
    %cst_38 = arith.constant dense<0.000000e+00> : vector<4x32xf32>
    %152 = tpu.matmul %151, %12, %cst_38 {dimension_numbers = #tpu.dot_dimension_numbers<[1], [0], [0], [1], [0, 0, 1, 1], [], []>} : vector<4x32xf32>, vector<32x32xf32>, vector<4x32xf32> -> vector<4x32xf32>
    %153 = vector.broadcast %26 : vector<1x32xf32> to vector<4x32xf32>
    %154 = arith.addf %152, %153 : vector<4x32xf32>
    %cst_39 = arith.constant dense<0.000000e+00> : vector<4xf32>
    %155 = vector.multi_reduction <add>, %154, %cst_39 [1] : vector<4x32xf32> to vector<4xf32>
    %156 = vector.shape_cast %155 : vector<4xf32> to vector<4x1xf32>
    %cst_40 = arith.constant 3.200000e+01 : f32
    %157 = vector.broadcast %cst_40 : f32 to vector<4x1xf32>
    %158 = arith.divf %156, %157 : vector<4x1xf32>
    %159 = vector.broadcast %158 : vector<4x1xf32> to vector<4x32xf32>
    %160 = arith.subf %154, %159 : vector<4x32xf32>
    %161 = arith.mulf %160, %160 : vector<4x32xf32>
    %cst_41 = arith.constant dense<0.000000e+00> : vector<4xf32>
    %162 = vector.multi_reduction <add>, %161, %cst_41 [1] : vector<4x32xf32> to vector<4xf32>
    %163 = vector.shape_cast %162 : vector<4xf32> to vector<4x1xf32>
    %cst_42 = arith.constant 3.200000e+01 : f32
    %164 = vector.broadcast %cst_42 : f32 to vector<4x1xf32>
    %165 = arith.divf %163, %164 : vector<4x1xf32>
    %cst_43 = arith.constant 9.99999974E-6 : f32
    %166 = vector.broadcast %cst_43 : f32 to vector<4x1xf32>
    %167 = arith.addf %165, %166 : vector<4x1xf32>
    %168 = math.rsqrt %167 : vector<4x1xf32>
    %169 = vector.broadcast %168 : vector<4x1xf32> to vector<4x32xf32>
    %170 = arith.mulf %160, %169 : vector<4x32xf32>
    %171 = tpu.iota {dimensions = array<i32: 1>} : vector<1x32xi32>
    %c16_i32 = arith.constant 16 : i32
    %172 = vector.broadcast %c16_i32 : i32 to vector<1x32xi32>
    %173 = arith.cmpi slt, %171, %172 : vector<1x32xi32>
    %174 = arith.extui %173 : vector<1x32xi1> to vector<1x32xi32>
    %175 = arith.sitofp %174 : vector<1x32xi32> to vector<1x32xf32>
    %c8_i32 = arith.constant 8 : i32
    %176 = vector.broadcast %c8_i32 : i32 to vector<1x32xi32>
    %177 = arith.cmpi slt, %171, %176 : vector<1x32xi32>
    %178 = arith.extui %177 : vector<1x32xi1> to vector<1x32xi32>
    %179 = arith.sitofp %178 : vector<1x32xi32> to vector<1x32xf32>
    %180 = tpu.concatenate %125, %170 in 1 : vector<4x32xf32>, vector<4x32xf32> -> vector<4x64xf32>
    %cst_44 = arith.constant dense<0.000000e+00> : vector<4x32xf32>
    %181 = tpu.matmul %180, %13, %cst_44 {dimension_numbers = #tpu.dot_dimension_numbers<[1], [0], [0], [1], [0, 0, 1, 1], [], []>} : vector<4x64xf32>, vector<64x32xf32>, vector<4x32xf32> -> vector<4x32xf32>
    %182 = vector.broadcast %27 : vector<1x32xf32> to vector<4x32xf32>
    %183 = arith.addf %181, %182 : vector<4x32xf32>
    %cst_45 = arith.constant dense<0.000000e+00> : vector<4xf32>
    %184 = vector.multi_reduction <add>, %183, %cst_45 [1] : vector<4x32xf32> to vector<4xf32>
    %185 = vector.shape_cast %184 : vector<4xf32> to vector<4x1xf32>
    %cst_46 = arith.constant 3.200000e+01 : f32
    %186 = vector.broadcast %cst_46 : f32 to vector<4x1xf32>
    %187 = arith.divf %185, %186 : vector<4x1xf32>
    %188 = vector.broadcast %187 : vector<4x1xf32> to vector<4x32xf32>
    %189 = arith.subf %183, %188 : vector<4x32xf32>
    %190 = arith.mulf %189, %189 : vector<4x32xf32>
    %cst_47 = arith.constant dense<0.000000e+00> : vector<4xf32>
    %191 = vector.multi_reduction <add>, %190, %cst_47 [1] : vector<4x32xf32> to vector<4xf32>
    %192 = vector.shape_cast %191 : vector<4xf32> to vector<4x1xf32>
    %cst_48 = arith.constant 3.200000e+01 : f32
    %193 = vector.broadcast %cst_48 : f32 to vector<4x1xf32>
    %194 = arith.divf %192, %193 : vector<4x1xf32>
    %cst_49 = arith.constant 9.99999974E-6 : f32
    %195 = vector.broadcast %cst_49 : f32 to vector<4x1xf32>
    %196 = arith.addf %194, %195 : vector<4x1xf32>
    %197 = math.rsqrt %196 : vector<4x1xf32>
    %198 = vector.broadcast %197 : vector<4x1xf32> to vector<4x32xf32>
    %199 = arith.mulf %189, %198 : vector<4x32xf32>
    %cst_50 = arith.constant 0.000000e+00 : f32
    %200 = vector.broadcast %cst_50 : f32 to vector<4x32xf32>
    %201 = arith.maximumf %199, %200 : vector<4x32xf32>
    %cst_51 = arith.constant dense<0.000000e+00> : vector<4x32xf32>
    %202 = tpu.matmul %201, %14, %cst_51 {dimension_numbers = #tpu.dot_dimension_numbers<[1], [0], [0], [1], [0, 0, 1, 1], [], []>} : vector<4x32xf32>, vector<32x32xf32>, vector<4x32xf32> -> vector<4x32xf32>
    %203 = vector.broadcast %28 : vector<1x32xf32> to vector<4x32xf32>
    %204 = arith.addf %202, %203 : vector<4x32xf32>
    %205 = vector.broadcast %175 : vector<1x32xf32> to vector<4x32xf32>
    %206 = arith.mulf %204, %205 : vector<4x32xf32>
    %cst_52 = arith.constant dense<0.000000e+00> : vector<4xf32>
    %207 = vector.multi_reduction <add>, %206, %cst_52 [1] : vector<4x32xf32> to vector<4xf32>
    %208 = vector.shape_cast %207 : vector<4xf32> to vector<4x1xf32>
    %cst_53 = arith.constant 6.250000e-02 : f32
    %209 = vector.broadcast %cst_53 : f32 to vector<4x1xf32>
    %210 = arith.mulf %208, %209 : vector<4x1xf32>
    %211 = vector.broadcast %210 : vector<4x1xf32> to vector<4x32xf32>
    %212 = arith.subf %204, %211 : vector<4x32xf32>
    %213 = vector.broadcast %175 : vector<1x32xf32> to vector<4x32xf32>
    %214 = arith.mulf %212, %213 : vector<4x32xf32>
    %215 = arith.mulf %214, %214 : vector<4x32xf32>
    %cst_54 = arith.constant dense<0.000000e+00> : vector<4xf32>
    %216 = vector.multi_reduction <add>, %215, %cst_54 [1] : vector<4x32xf32> to vector<4xf32>
    %217 = vector.shape_cast %216 : vector<4xf32> to vector<4x1xf32>
    %cst_55 = arith.constant 6.250000e-02 : f32
    %218 = vector.broadcast %cst_55 : f32 to vector<4x1xf32>
    %219 = arith.mulf %217, %218 : vector<4x1xf32>
    %cst_56 = arith.constant 9.99999974E-6 : f32
    %220 = vector.broadcast %cst_56 : f32 to vector<4x1xf32>
    %221 = arith.addf %219, %220 : vector<4x1xf32>
    %222 = math.rsqrt %221 : vector<4x1xf32>
    %223 = vector.broadcast %222 : vector<4x1xf32> to vector<4x32xf32>
    %224 = arith.mulf %214, %223 : vector<4x32xf32>
    %cst_57 = arith.constant 0.000000e+00 : f32
    %225 = vector.broadcast %cst_57 : f32 to vector<4x32xf32>
    %226 = arith.maximumf %224, %225 : vector<4x32xf32>
    %cst_58 = arith.constant dense<0.000000e+00> : vector<4x32xf32>
    %227 = tpu.matmul %226, %15, %cst_58 {dimension_numbers = #tpu.dot_dimension_numbers<[1], [0], [0], [1], [0, 0, 1, 1], [], []>} : vector<4x32xf32>, vector<32x32xf32>, vector<4x32xf32> -> vector<4x32xf32>
    %228 = vector.broadcast %29 : vector<1x32xf32> to vector<4x32xf32>
    %229 = arith.addf %227, %228 : vector<4x32xf32>
    %230 = vector.broadcast %179 : vector<1x32xf32> to vector<4x32xf32>
    %231 = arith.mulf %229, %230 : vector<4x32xf32>
    %cst_59 = arith.constant dense<0.000000e+00> : vector<4xf32>
    %232 = vector.multi_reduction <add>, %231, %cst_59 [1] : vector<4x32xf32> to vector<4xf32>
    %233 = vector.shape_cast %232 : vector<4xf32> to vector<4x1xf32>
    %cst_60 = arith.constant 1.250000e-01 : f32
    %234 = vector.broadcast %cst_60 : f32 to vector<4x1xf32>
    %235 = arith.mulf %233, %234 : vector<4x1xf32>
    %236 = vector.broadcast %235 : vector<4x1xf32> to vector<4x32xf32>
    %237 = arith.subf %229, %236 : vector<4x32xf32>
    %238 = vector.broadcast %179 : vector<1x32xf32> to vector<4x32xf32>
    %239 = arith.mulf %237, %238 : vector<4x32xf32>
    %240 = arith.mulf %239, %239 : vector<4x32xf32>
    %cst_61 = arith.constant dense<0.000000e+00> : vector<4xf32>
    %241 = vector.multi_reduction <add>, %240, %cst_61 [1] : vector<4x32xf32> to vector<4xf32>
    %242 = vector.shape_cast %241 : vector<4xf32> to vector<4x1xf32>
    %cst_62 = arith.constant 1.250000e-01 : f32
    %243 = vector.broadcast %cst_62 : f32 to vector<4x1xf32>
    %244 = arith.mulf %242, %243 : vector<4x1xf32>
    %cst_63 = arith.constant 9.99999974E-6 : f32
    %245 = vector.broadcast %cst_63 : f32 to vector<4x1xf32>
    %246 = arith.addf %244, %245 : vector<4x1xf32>
    %247 = math.rsqrt %246 : vector<4x1xf32>
    %248 = vector.broadcast %247 : vector<4x1xf32> to vector<4x32xf32>
    %249 = arith.mulf %239, %248 : vector<4x32xf32>
    %cst_64 = arith.constant 0.000000e+00 : f32
    %250 = vector.broadcast %cst_64 : f32 to vector<4x32xf32>
    %251 = arith.maximumf %249, %250 : vector<4x32xf32>
    %cst_65 = arith.constant dense<0.000000e+00> : vector<4x32xf32>
    %252 = tpu.matmul %251, %16, %cst_65 {dimension_numbers = #tpu.dot_dimension_numbers<[1], [0], [0], [1], [0, 0, 1, 1], [], []>} : vector<4x32xf32>, vector<32x32xf32>, vector<4x32xf32> -> vector<4x32xf32>
    %253 = vector.broadcast %30 : vector<1x32xf32> to vector<4x32xf32>
    %254 = arith.addf %252, %253 : vector<4x32xf32>
    %cst_66 = arith.constant 0.000000e+00 : f32
    %255 = vector.broadcast %cst_66 : f32 to vector<4x32xf32>
    %256 = arith.subf %255, %254 : vector<4x32xf32>
    %257 = math.exp %256 : vector<4x32xf32>
    %cst_67 = arith.constant 1.000000e+00 : f32
    %258 = vector.broadcast %cst_67 : f32 to vector<4x32xf32>
    %259 = arith.addf %258, %257 : vector<4x32xf32>
    %cst_68 = arith.constant 1.000000e+00 : f32
    %260 = vector.broadcast %cst_68 : f32 to vector<4x32xf32>
    %261 = arith.divf %260, %259 : vector<4x32xf32>
    %c0_69 = arith.constant 0 : index
    %c0_70 = arith.constant 0 : index
    %262 = vector.load %arg5[%c0_69, %c0_70] : memref<4x32xf32, #tpu.memory_space<vmem>>, vector<4x32xf32>
    tpu.vector_store %arg5[%c0_69, %c0_70], %261 {strides = array<i32>} : memref<4x32xf32, #tpu.memory_space<vmem>>, vector<4x32xf32>,
    return
  }
}

</mosaic_0001>

<bundles_post_ra>
// kernel: tpu_custom_call.1
= control target key start
LH: loop header
LB: loop body
LE: loop exit
PB: predicated region body
PF: predicated region fallthrough
CT: control target
= control target key end

     0   :  { %vm95_vm0 = vcmask 523264   ;;  %v177_v3 = vlaneseq  ;;  %s5756_s0 = inlined_call_operand.vmem [shape: f32[4,16], index: 0, kind: input, shape index: {}]   ;;  %s5757_s1 = inlined_call_operand.vmem [shape: s32[4,1], index: 1, kind: input, shape index: {}]   ;;  %s5758_s2 = inlined_call_operand.vmem [shape: f32[16,256], index: 2, kind: input, shape index: {}]   ;;  %s5759_s3 = inlined_call_operand.vmem [shape: f32[112,64], index: 3, kind: input, shape index: {}]   ;;  %s5760_s4 = inlined_call_operand.vmem [shape: f32[448,32], index: 4, kind: input, shape index: {}]   ;;  %s5761_s5 = inlined_call_operand.hbm [shape: f32[4,32], index: 5, kind: output, shape index: {}]  }
   0x1   :  { %v25_v0 = vld [vmem:[%s5759_s3] sm:$0xff]  ;;  %v26_v1 = vld [vmem:[%s5759_s3 + $0x8] sm:$0xff]  ;;  %v27_v2 = vld [vmem:[%s5759_s3 + $0x10] sm:$0xff] }
   0x2   :  { %v4069_v4 = vpack.c.bf16 %v26_v1, %v25_v0  ;;  %v28_v5 = vld [vmem:[%s5759_s3 + $0x18] sm:$0xff]  ;;  %v29_v7 = vld [vmem:[%s5759_s3 + $0x20] sm:$0xff]  ;;  %v30_v8 = vld [vmem:[%s5759_s3 + $0x28] sm:$0xff]  ;;  %v4660_v10 = vshrl.u32 %v177_v3, 7 }
   0x3   :  { %v4073_v6 = vpack.c.bf16 %v28_v5, %v27_v2  ;;  %v37_v9 = vld [vmem:[%s5759_s3 + $0x60] sm:$0xff]  ;;  %v93_v11 = vld [vmem:[%s5760_s4 + $0x1b0] sm:$0xff] }
   0x4   :  { %4070 = vmatprep.subr.bf16.mxu0 %v4069_v4  ;;  %3817 = vmatprep.mubr.msk.f32.mxu0 %vm95_vm0, %v37_v9 }
   0x5   :  { %10 = vsyncpa [#allocation3], 0  ;;  %4072 = vmatpush3.bf16.msra.mxu0 %v4069_v4  ;;  %v4667_v12 = vsub.s32 0, %v4660_v10  ;;  %v4077_v13 = vpack.c.bf16 %v30_v8, %v29_v7  ;;  %v31_v14 = vld [vmem:[%s5759_s3 + $0x30] sm:$0xff]  ;;  %v32_v15 = vld [vmem:[%s5759_s3 + $0x38] sm:$0xff]  ;;  %s4599_s13 = smov 32  }
   0x6   :  { %4074 = vmatprep.subr.bf16.mxu0 %v4073_v6  ;;  %v4081_v17 = vpack.c.bf16 %v32_v15, %v31_v14  ;;  %v38_v18 = vld [vmem:[%s5759_s3 + $0x68] sm:$0xff]  ;;  %v39_v21 = vld [vmem:[%s5760_s4] sm:$0xff]  ;;  %v41_v23 = vld [vmem:[%s5760_s4 + $0x10] sm:$0xff]  ;;  %v4600_v27 = vmov 1966171168   ;;  %s4601_s24 = smov 96  }
   0x7   :  { %v180_v16 = vrot.slane %v93_v11, %v4667_v12  ;;  %v40_v22 = vld [vmem:[%s5760_s4 + $0x8] sm:$0xff]  ;;  %v42_v25 = vld [vmem:[%s5760_s4 + $0x18] sm:$0xff]  ;;  %v191_v28 = vunpack.c.l.s4 %v4600_v27  ;;  %s4606_s27 = smov 64  }
   0x8   :  { %v4085_v24 = vpack.c.bf16 %v40_v22, %v39_v21  ;;  %v4089_v26 = vpack.c.bf16 %v42_v25, %v41_v23 }
   0x9   :  { %4076 = vmatpush3.bf16.msra.mxu0 %v4073_v6  ;;  %182 = vrot.lane.b32.xlu0 %v180_v16, %s4599_s13  ;;  %v192_v29 = vunpack.c.0.s8 %v191_v28 }
   0xa   :  { %4078 = vmatprep.subr.bf16.mxu0 %v4077_v13  ;;  %4086 = vmatprep.subr.bf16.mxu1 %v4085_v24 }
   0xb   :  { %4088 = vmatpush3.bf16.msra.mxu1 %v4085_v24  ;;  %v4703_v32 = vsub.s32 %v192_v29, %v4660_v10 }
   0xc   :  { %4090 = vmatprep.subr.bf16.mxu1 %v4089_v26 }
   0xd   :  { %4080 = vmatpush3.bf16.msra.mxu0 %v4077_v13 }
   0xe   :  { %4082 = vmatprep.subr.bf16.mxu0 %v4081_v17 }
   0xf   :  { %4092 = vmatpush3.bf16.msra.mxu1 %v4089_v26 }
  0x11   :  { %4084 = vmatpush3.bf16.msra.mxu0 %v4081_v17 }
  0x14   :  { %3818 = vmatmul.mubr.msk.f32.vlgmr.msra.gmra.mrb[0].mxu0 %vm95_vm0, %v38_v18 }
  0x7b   :  { %v183_v30 = vpop.permute.xlu0 %182 }
  0xe7   :  { %v4681_v19 = vpop.f32.mrb[0].mxu0 }
  0xe8   :  { %371 = vrot.lane.b32.xlu1 %v4681_v19, %s4599_s13  ;;  %v4685_v20 = vpop.f32.mrb[1].mxu0  ;;  %v4738_v16 = vadd.f32 %v4681_v19, %v183_v30 }
  0xe9   :  { %369 = vrot.lane.b32.xlu0 %v4685_v20, %s4599_s13  ;;  %v185_v31 = vadd.f32 %v183_v30, %v4685_v20 }
  0xea   :  { %v245_v27 = vrot.slane %v4738_v16, %v4703_v32 }
  0xeb   :  { %v196_v33 = vrot.slane %v185_v31, %v4703_v32  ;;  %v189_v37 = vcombine.high %v185_v31, %v185_v31 }
  0xed   :  { %v204_v34 = vcombine.high %v196_v33, %v196_v33  ;;  %v212_v35 = vrot.slane %v196_v33, %v4703_v32  ;;  %v203_v47 = vrot.slane %v189_v37, %v4703_v32  ;;  %v253_v37 = vcombine.high %v245_v27, %v245_v27 }
  0xef   :  { %v226_v36 = vrot.slane %v204_v34, %v4703_v32  ;;  %v290_v38 = vrot.slane %v212_v35, %v4667_v12  ;;  %v234_v40 = vcombine.high %v212_v35, %v212_v35  ;;  %v219_v59 = vrot.slane %v203_v47, %v4703_v32 }
  0xf0   :  { %v205_v60 = vcombine.high %v203_v47, %v203_v47  ;;  %v275_v47 = vrot.slane %v253_v37, %v4703_v32 }
  0xf1   :  { %v294_v39 = vrot.slane %v226_v36, %v4667_v12  ;;  %v298_v49 = vrot.slane %v234_v40, %v4667_v12  ;;  %v236_v50 = vcombine.high %v226_v36, %v226_v36  ;;  %v306_v4 = vrot.slane %v219_v59, %v4667_v12 }
  0xf2   :  { %v233_v5 = vrot.slane %v205_v60, %v4703_v32  ;;  %v235_v15 = vcombine.high %v219_v59, %v219_v59  ;;  %v261_v36 = vrot.slane %v245_v27, %v4703_v32 }
  0xf3   :  { %v302_v58 = vrot.slane %v236_v50, %v4667_v12 }
  0xf4   :  { %v310_v14 = vrot.slane %v233_v5, %v4667_v12  ;;  %v314_v25 = vrot.slane %v235_v15, %v4667_v12  ;;  %v237_v26 = vcombine.high %v233_v5, %v233_v5 }
  0xf6   :  { %v318_v35 = vrot.slane %v237_v26, %v4667_v12 }
 0x15a   :  { %v4710_v41 = vpop.permute.xlu1 %371 }
 0x15b   :  { %v4712_v42 = vpop.permute.xlu0 %369  ;;  %v376_v43 = vadd.f32 %v4710_v41, %v290_v38  ;;  %v378_v44 = vadd.f32 %v4710_v41, %v294_v39  ;;  %v380_v54 = vadd.f32 %v4710_v41, %v298_v49  ;;  %v382_v63 = vadd.f32 %v4710_v41, %v302_v58 }
 0x15c   :  { %v375_v45 = vadd.f32 %v4712_v42, %v290_v38  ;;  %v377_v46 = vadd.f32 %v4712_v42, %v294_v39  ;;  %v379_v57 = vadd.f32 %v4712_v42, %v298_v49  ;;  %v381_v2 = vadd.f32 %v4712_v42, %v302_v58 }
 0x15d   :  { %vm408_vm1 = vcmp.ge.f32.partialorder %v376_v43, 0.0  ;;  %v440_v48 = vmul.f32 0.2, %v376_v43  ;;  %v442_v53 = vmul.f32 0.2, %v378_v44  ;;  %vm410_vm3 = vcmp.ge.f32.partialorder %v378_v44, 0.0 }
 0x15e   :  { %vm407_vm2 = vcmp.ge.f32.partialorder %v375_v45, 0.0  ;;  %v439_v51 = vmul.f32 0.2, %v375_v45  ;;  %v441_v56 = vmul.f32 0.2, %v377_v46  ;;  %vm409_vm4 = vcmp.ge.f32.partialorder %v377_v46, 0.0 }
 0x15f   :  { %v472_v52 = vsel %vm408_vm1, %v376_v43, %v440_v48  ;;  %v474_v61 = vsel %vm410_vm3, %v378_v44, %v442_v53  ;;  %v444_v62 = vmul.f32 0.2, %v380_v54  ;;  %vm412_vm5 = vcmp.ge.f32.partialorder %v380_v54, 0.0 }
 0x160   :  { %537 = vrot.lane.b32.xlu0 %v472_v52, %s4601_s24  ;;  %v471_v55 = vsel %vm407_vm2, %v375_v45, %v439_v51  ;;  %v473_v0 = vsel %vm409_vm4, %v377_v46, %v441_v56  ;;  %v443_v1 = vmul.f32 0.2, %v379_v57  ;;  %vm411_vm6 = vcmp.ge.f32.partialorder %v379_v57, 0.0 }
 0x161   :  { %535 = vrot.lane.b32.xlu1 %v471_v55, %s4601_s24  ;;  %v476_v6 = vsel %vm412_vm5, %v380_v54, %v444_v62  ;;  %v446_v7 = vmul.f32 0.2, %v382_v63  ;;  %v384_v8 = vadd.f32 %v4710_v41, %v306_v4  ;;  %vm414_vm7 = vcmp.ge.f32.partialorder %v382_v63, 0.0 }
 0x162   :  { %v475_v9 = vsel %vm411_vm6, %v379_v57, %v443_v1  ;;  %v445_v11 = vmul.f32 0.2, %v381_v2  ;;  %v383_v13 = vadd.f32 %v4712_v42, %v306_v4  ;;  %vm413_vm8 = vcmp.ge.f32.partialorder %v381_v2, 0.0 }
 0x163   :  { %v478_v17 = vsel %vm414_vm7, %v382_v63, %v446_v7  ;;  %v448_v18 = vmul.f32 0.2, %v384_v8  ;;  %v386_v21 = vadd.f32 %v4710_v41, %v310_v14  ;;  %vm416_vm9 = vcmp.ge.f32.partialorder %v384_v8, 0.0 }
 0x164   :  { %541 = vrot.lane.b32.xlu0 %v474_v61, %s4601_s24  ;;  %v477_v22 = vsel %vm413_vm8, %v381_v2, %v445_v11  ;;  %v447_v23 = vmul.f32 0.2, %v383_v13  ;;  %v385_v24 = vadd.f32 %v4712_v42, %v310_v14  ;;  %vm415_vm10 = vcmp.ge.f32.partialorder %v383_v13, 0.0 }
 0x165   :  { %539 = vrot.lane.b32.xlu1 %v473_v0, %s4601_s24  ;;  %v480_v28 = vsel %vm416_vm9, %v384_v8, %v448_v18  ;;  %v450_v29 = vmul.f32 0.2, %v386_v21  ;;  %v388_v30 = vadd.f32 %v4710_v41, %v314_v25  ;;  %vm418_vm11 = vcmp.ge.f32.partialorder %v386_v21, 0.0 }
 0x166   :  { %v479_v31 = vsel %vm415_vm10, %v383_v13, %v447_v23  ;;  %v449_v33 = vmul.f32 0.2, %v385_v24  ;;  %v387_v34 = vadd.f32 %v4712_v42, %v314_v25  ;;  %vm417_vm12 = vcmp.ge.f32.partialorder %v385_v24, 0.0 }
 0x167   :  { %v482_v38 = vsel %vm418_vm11, %v386_v21, %v450_v29  ;;  %v452_v39 = vmul.f32 0.2, %v388_v30  ;;  %v390_v40 = vadd.f32 %v4710_v41, %v318_v35  ;;  %vm420_vm13 = vcmp.ge.f32.partialorder %v388_v30, 0.0 }
 0x168   :  { %545 = vrot.lane.b32.xlu0 %v476_v6, %s4601_s24  ;;  %v481_v43 = vsel %vm417_vm12, %v385_v24, %v449_v33  ;;  %v451_v44 = vmul.f32 0.2, %v387_v34  ;;  %v389_v45 = vadd.f32 %v4712_v42, %v318_v35  ;;  %vm419_vm14 = vcmp.ge.f32.partialorder %v387_v34, 0.0 }
 0x169   :  { %543 = vrot.lane.b32.xlu1 %v475_v9, %s4601_s24  ;;  %v322_v46 = vrot.slane %v261_v36, %v4667_v12  ;;  %v484_v48 = vsel %vm420_vm13, %v388_v30, %v452_v39  ;;  %v454_v49 = vmul.f32 0.2, %v390_v40  ;;  %vm422_vm15 = vcmp.ge.f32.partialorder %v390_v40, 0.0 }
 0x16a   :  { %v483_v51 = vsel %vm419_vm14, %v387_v34, %v451_v44  ;;  %v453_v52 = vmul.f32 0.2, %v389_v45  ;;  %vm421_vm1 = vcmp.ge.f32.partialorder %v389_v45, 0.0  ;;  %v326_v54 = vrot.slane %v275_v47, %v4667_v12 }
 0x16b   :  { %v392_v50 = vadd.f32 %v4710_v41, %v322_v46  ;;  %v391_v53 = vadd.f32 %v4712_v42, %v322_v46  ;;  %v283_v55 = vcombine.high %v261_v36, %v261_v36  ;;  %v238_v56 = vcombine.high %v4738_v16, %v4738_v16 }
 0x16c   :  { %549 = vrot.lane.b32.xlu0 %v478_v17, %s4601_s24  ;;  %v486_v57 = vsel %vm422_vm15, %v390_v40, %v454_v49  ;;  %v394_v59 = vadd.f32 %v4710_v41, %v326_v54  ;;  %v485_v60 = vsel %vm421_vm1, %v389_v45, %v453_v52  ;;  %v393_v62 = vadd.f32 %v4712_v42, %v326_v54 }
 0x16d   :  { %547 = vrot.lane.b32.xlu1 %v477_v22, %s4601_s24  ;;  %v456_v58 = vmul.f32 0.2, %v392_v50  ;;  %vm424_vm2 = vcmp.ge.f32.partialorder %v392_v50, 0.0  ;;  %v455_v61 = vmul.f32 0.2, %v391_v53  ;;  %vm423_vm3 = vcmp.ge.f32.partialorder %v391_v53, 0.0 }
 0x16e   :  { %v330_v63 = vrot.slane %v283_v55, %v4667_v12  ;;  %v285_v0 = vcombine.high %v275_v47, %v275_v47  ;;  %v252_v1 = vrot.slane %v238_v56, %v4703_v32  ;;  %v458_v4 = vmul.f32 0.2, %v394_v59 }
 0x16f   :  { %v488_v2 = vsel %vm424_vm2, %v392_v50, %v456_v58  ;;  %v487_v6 = vsel %vm423_vm3, %v391_v53, %v455_v61  ;;  %vm426_vm4 = vcmp.ge.f32.partialorder %v394_v59, 0.0  ;;  %v457_v7 = vmul.f32 0.2, %v393_v62 }
 0x170   :  { %553 = vrot.lane.b32.xlu0 %v480_v28, %s4601_s24  ;;  %v396_v5 = vadd.f32 %v4710_v41, %v330_v63  ;;  %v395_v8 = vadd.f32 %v4712_v42, %v330_v63  ;;  %vm425_vm5 = vcmp.ge.f32.partialorder %v393_v62, 0.0  ;;  %v334_v9 = vrot.slane %v285_v0, %v4667_v12 }
 0x171   :  { %551 = vrot.lane.b32.xlu1 %v479_v31, %s4601_s24  ;;  %v268_v11 = vrot.slane %v252_v1, %v4703_v32  ;;  %v254_v13 = vcombine.high %v252_v1, %v252_v1  ;;  %v490_v14 = vsel %vm426_vm4, %v394_v59, %v458_v4  ;;  %v489_v17 = vsel %vm425_vm5, %v393_v62, %v457_v7 }
 0x172   :  { %v460_v15 = vmul.f32 0.2, %v396_v5  ;;  %v398_v16 = vadd.f32 %v4710_v41, %v334_v9  ;;  %vm428_vm6 = vcmp.ge.f32.partialorder %v396_v5, 0.0  ;;  %v459_v18 = vmul.f32 0.2, %v395_v8 }
 0x173   :  { %v397_v21 = vadd.f32 %v4712_v42, %v334_v9  ;;  %vm427_vm7 = vcmp.ge.f32.partialorder %v395_v8, 0.0  ;;  %v338_v22 = vrot.slane %v268_v11, %v4667_v12  ;;  %v282_v23 = vrot.slane %v254_v13, %v4703_v32 }
 0x174   :  { %557 = vrot.lane.b32.xlu0 %v482_v38, %s4601_s24  ;;  %v492_v24 = vsel %vm428_vm6, %v396_v5, %v460_v15  ;;  %v462_v25 = vmul.f32 0.2, %v398_v16  ;;  %v491_v27 = vsel %vm427_vm7, %v395_v8, %v459_v18  ;;  %vm430_vm8 = vcmp.ge.f32.partialorder %v398_v16, 0.0 }
 0x175   :  { %555 = vrot.lane.b32.xlu1 %v481_v43, %s4601_s24  ;;  %v400_v26 = vadd.f32 %v4710_v41, %v338_v22  ;;  %v461_v28 = vmul.f32 0.2, %v397_v21  ;;  %v399_v29 = vadd.f32 %v4712_v42, %v338_v22  ;;  %vm429_vm9 = vcmp.ge.f32.partialorder %v397_v21, 0.0 }
 0x176   :  { %v342_v30 = vrot.slane %v282_v23, %v4667_v12  ;;  %v284_v31 = vcombine.high %v268_v11, %v268_v11  ;;  %v494_v33 = vsel %vm430_vm8, %v398_v16, %v462_v25  ;;  %v286_v40 = vcombine.high %v282_v23, %v282_v23 }
 0x177   :  { %v464_v34 = vmul.f32 0.2, %v400_v26  ;;  %v493_v36 = vsel %vm429_vm9, %v397_v21, %v461_v28  ;;  %vm432_vm10 = vcmp.ge.f32.partialorder %v400_v26, 0.0  ;;  %v463_v37 = vmul.f32 0.2, %v399_v29 }
 0x178   :  { %561 = vrot.lane.b32.xlu0 %v484_v48, %s4601_s24  ;;  %v402_v35 = vadd.f32 %v4710_v41, %v342_v30  ;;  %v401_v38 = vadd.f32 %v4712_v42, %v342_v30  ;;  %vm431_vm11 = vcmp.ge.f32.partialorder %v399_v29, 0.0  ;;  %v346_v39 = vrot.slane %v284_v31, %v4667_v12 }
 0x179   :  { %559 = vrot.lane.b32.xlu1 %v483_v51, %s4601_s24  ;;  %v496_v43 = vsel %vm432_vm10, %v400_v26, %v464_v34  ;;  %v495_v46 = vsel %vm431_vm11, %v399_v29, %v463_v37  ;;  %v350_v49 = vrot.slane %v286_v40, %v4667_v12  ;;  %vm599_vm3 = vcmask 261120  }
 0x17a   :  { %v466_v44 = vmul.f32 0.2, %v402_v35  ;;  %v404_v45 = vadd.f32 %v4710_v41, %v346_v39  ;;  %vm434_vm12 = vcmp.ge.f32.partialorder %v402_v35, 0.0  ;;  %v465_v47 = vmul.f32 0.2, %v401_v38 }
 0x17b   :  { %v403_v48 = vadd.f32 %v4712_v42, %v346_v39  ;;  %vm433_vm13 = vcmp.ge.f32.partialorder %v401_v38, 0.0  ;;  %v406_v52 = vadd.f32 %v4710_v41, %v350_v49  ;;  %v405_v55 = vadd.f32 %v4712_v42, %v350_v49 }
 0x17c   :  { %565 = vrot.lane.b32.xlu0 %v486_v57, %s4601_s24  ;;  %v498_v50 = vsel %vm434_vm12, %v402_v35, %v466_v44  ;;  %v468_v51 = vmul.f32 0.2, %v404_v45  ;;  %v497_v53 = vsel %vm433_vm13, %v401_v38, %v465_v47  ;;  %vm436_vm14 = vcmp.ge.f32.partialorder %v404_v45, 0.0 }
 0x17d   :  { %563 = vrot.lane.b32.xlu1 %v485_v60, %s4601_s24  ;;  %v467_v54 = vmul.f32 0.2, %v403_v48  ;;  %vm435_vm15 = vcmp.ge.f32.partialorder %v403_v48, 0.0  ;;  %v470_v57 = vmul.f32 0.2, %v406_v52  ;;  %vm438_vm1 = vcmp.ge.f32.partialorder %v406_v52, 0.0 }
 0x17e   :  { %v500_v56 = vsel %vm436_vm14, %v404_v45, %v468_v51  ;;  %v469_v59 = vmul.f32 0.2, %v405_v55  ;;  %vm437_vm2 = vcmp.ge.f32.partialorder %v405_v55, 0.0 }
 0x17f   :  { %v499_v58 = vsel %vm435_vm15, %v403_v48, %v467_v54  ;;  %v502_v41 = vsel %vm438_vm1, %v406_v52, %v470_v57 }
 0x180   :  { %569 = vrot.lane.b32.xlu0 %v488_v2, %s4601_s24  ;;  %v501_v60 = vsel %vm437_vm2, %v405_v55, %v469_v59 }
 0x181   :  { %567 = vrot.lane.b32.xlu1 %v487_v6, %s4601_s24 }
 0x184   :  { %573 = vrot.lane.b32.xlu0 %v490_v14, %s4601_s24 }
 0x185   :  { %571 = vrot.lane.b32.xlu1 %v489_v17, %s4601_s24 }
 0x188   :  { %577 = vrot.lane.b32.xlu0 %v492_v24, %s4601_s24 }
 0x189   :  { %575 = vrot.lane.b32.xlu1 %v491_v27, %s4601_s24 }
 0x18c   :  { %581 = vrot.lane.b32.xlu0 %v494_v33, %s4601_s24 }
 0x18d   :  { %579 = vrot.lane.b32.xlu1 %v493_v36, %s4601_s24 }
 0x190   :  { %585 = vrot.lane.b32.xlu0 %v496_v43, %s4601_s24 }
 0x191   :  { %583 = vrot.lane.b32.xlu1 %v495_v46, %s4601_s24 }
 0x194   :  { %589 = vrot.lane.b32.xlu0 %v498_v50, %s4601_s24 }
 0x195   :  { %587 = vrot.lane.b32.xlu1 %v497_v53, %s4601_s24 }
 0x198   :  { %593 = vrot.lane.b32.xlu0 %v500_v56, %s4601_s24 }
 0x199   :  { %591 = vrot.lane.b32.xlu1 %v499_v58, %s4601_s24 }
 0x19c   :  { %597 = vrot.lane.b32.xlu0 %v502_v41, %s4601_s24 }
 0x19d   :  { %595 = vrot.lane.b32.xlu1 %v501_v60, %s4601_s24 }
 0x1d2   :  { %v538_v42 = vpop.permute.xlu0 %537 }
 0x1d3   :  { %v536_v61 = vpop.permute.xlu1 %535 }
 0x1d4   :  { %3828 = vmatprep.mubr.msk.f32.mxu1 %vm599_vm3, %v536_v61 }
 0x1d5   :  { %3829 = vmatmul.mubr.msk.f32.vlgmr.msra.gmra.mrb[0].mxu1 %vm599_vm3, %v538_v42 }
 0x1d6   :  { %v542_v62 = vpop.permute.xlu0 %541 }
 0x1d7   :  { %v540_v63 = vpop.permute.xlu1 %539 }
 0x1d8   :  { %3831 = vmatprep.mubr.msk.f32.mxu1 %vm599_vm3, %v540_v63 }
 0x1d9   :  { %3832 = vmatmul.mubr.msk.f32.gmra.mrb[2].mxu1 %vm599_vm3, %v542_v62 }
 0x1da   :  { %v546_v0 = vpop.permute.xlu0 %545 }
 0x1db   :  { %v544_v1 = vpop.permute.xlu1 %543 }
 0x1dc   :  { %3834 = vmatprep.mubr.msk.f32.mxu1 %vm599_vm3, %v544_v1 }
 0x1dd   :  { %3835 = vmatmul.mubr.msk.f32.gmra.mrb[4].mxu1 %vm599_vm3, %v546_v0 }
 0x1de   :  { %v550_v2 = vpop.permute.xlu0 %549 }
 0x1df   :  { %v548_v4 = vpop.permute.xlu1 %547 }
 0x1e0   :  { %3837 = vmatprep.mubr.msk.f32.mxu1 %vm599_vm3, %v548_v4 }
 0x1e1   :  { %3838 = vmatmul.mubr.msk.f32.gmra.mrb[6].mxu1 %vm599_vm3, %v550_v2 }
 0x1e2   :  { %v554_v5 = vpop.permute.xlu0 %553 }
 0x1e3   :  { %v552_v6 = vpop.permute.xlu1 %551 }
 0x1e4   :  { %3840 = vmatprep.mubr.msk.f32.mxu1 %vm599_vm3, %v552_v6 }
 0x1e5   :  { %3841 = vmatmul.mubr.msk.f32.gmra.mrb[8].mxu1 %vm599_vm3, %v554_v5 }
 0x1e6   :  { %v558_v7 = vpop.permute.xlu0 %557 }
 0x1e7   :  { %v556_v8 = vpop.permute.xlu1 %555 }
 0x1e8   :  { %3843 = vmatprep.mubr.msk.f32.mxu1 %vm599_vm3, %v556_v8 }
 0x1e9   :  { %3844 = vmatmul.mubr.msk.f32.gmra.mrb[10].mxu1 %vm599_vm3, %v558_v7 }
 0x1ea   :  { %v562_v9 = vpop.permute.xlu0 %561 }
 0x1eb   :  { %v560_v11 = vpop.permute.xlu1 %559 }
 0x1ec   :  { %3846 = vmatprep.mubr.msk.f32.mxu1 %vm599_vm3, %v560_v11 }
 0x1ed   :  { %3847 = vmatmul.mubr.msk.f32.gmra.mrb[12].mxu1 %vm599_vm3, %v562_v9 }
 0x1ee   :  { %v566_v13 = vpop.permute.xlu0 %565 }
 0x1ef   :  { %v564_v14 = vpop.permute.xlu1 %563 }
 0x1f0   :  { %3849 = vmatprep.mubr.msk.f32.mxu1 %vm599_vm3, %v564_v14 }
 0x1f1   :  { %3850 = vmatmul.mubr.msk.f32.gmra.mrb[14].mxu1 %vm599_vm3, %v566_v13 }
 0x1f2   :  { %v570_v15 = vpop.permute.xlu0 %569 }
 0x1f3   :  { %v568_v16 = vpop.permute.xlu1 %567 }
 0x1f4   :  { %3852 = vmatprep.mubr.msk.f32.mxu1 %vm599_vm3, %v568_v16 }
 0x1f5   :  { %3853 = vmatmul.mubr.msk.f32.gmra.mrb[16].mxu1 %vm599_vm3, %v570_v15 }
 0x1f6   :  { %v574_v17 = vpop.permute.xlu0 %573 }
 0x1f7   :  { %v572_v18 = vpop.permute.xlu1 %571 }
 0x1f8   :  { %3855 = vmatprep.mubr.msk.f32.mxu1 %vm599_vm3, %v572_v18 }
 0x1f9   :  { %3856 = vmatmul.mubr.msk.f32.gmra.mrb[18].mxu1 %vm599_vm3, %v574_v17 }
 0x1fa   :  { %v578_v21 = vpop.permute.xlu0 %577 }
 0x1fb   :  { %v576_v22 = vpop.permute.xlu1 %575 }
 0x1fc   :  { %3858 = vmatprep.mubr.msk.f32.mxu1 %vm599_vm3, %v576_v22 }
 0x1fd   :  { %3859 = vmatmul.mubr.msk.f32.gmra.mrb[20].mxu1 %vm599_vm3, %v578_v21 }
 0x1fe   :  { %v582_v23 = vpop.permute.xlu0 %581 }
 0x1ff   :  { %v580_v24 = vpop.permute.xlu1 %579 }
 0x200   :  { %3861 = vmatprep.mubr.msk.f32.mxu1 %vm599_vm3, %v580_v24 }
 0x201   :  { %3862 = vmatmul.mubr.msk.f32.gmra.mrb[22].mxu1 %vm599_vm3, %v582_v23 }
 0x202   :  { %v586_v25 = vpop.permute.xlu0 %585 }
 0x203   :  { %v584_v26 = vpop.permute.xlu1 %583 }
 0x204   :  { %3864 = vmatprep.mubr.msk.f32.mxu1 %vm599_vm3, %v584_v26 }
 0x205   :  { %3865 = vmatmul.mubr.msk.f32.gmra.mrb[24].mxu1 %vm599_vm3, %v586_v25 }
 0x206   :  { %v590_v27 = vpop.permute.xlu0 %589 }
 0x207   :  { %v588_v28 = vpop.permute.xlu1 %587 }
 0x208   :  { %3867 = vmatprep.mubr.msk.f32.mxu1 %vm599_vm3, %v588_v28 }
 0x209   :  { %3868 = vmatmul.mubr.msk.f32.gmra.mrb[26].mxu1 %vm599_vm3, %v590_v27 }
 0x20a   :  { %v594_v29 = vpop.permute.xlu0 %593 }
 0x20b   :  { %v592_v30 = vpop.permute.xlu1 %591 }
 0x20c   :  { %3870 = vmatprep.mubr.msk.f32.mxu1 %vm599_vm3, %v592_v30 }
 0x20d   :  { %3871 = vmatmul.mubr.msk.f32.gmra.mrb[28].mxu1 %vm599_vm3, %v594_v29 }
 0x20e   :  { %v598_v33 = vpop.permute.xlu0 %597 }
 0x20f   :  { %v596_v31 = vpop.permute.xlu1 %595 }
 0x210   :  { %3873 = vmatprep.mubr.msk.f32.mxu1 %vm599_vm3, %v596_v31 }
 0x211   :  { %3874 = vmatmul.mubr.msk.f32.gmra.mrb[30].mxu1 %vm599_vm3, %v598_v33 }
 0x2a8   :  { %v3830_v34 = vpop.f32.mrb[0].mxu1 }
 0x2a9   :  { %v3469_v35 = vclamps-f32 %v3830_v34, 30.0  ;;  %v730_v36 = vpop.f32.mrb[1].mxu1 }
 0x2aa   :  { %v3468_v37 = vclamps-f32 %v730_v36, 30.0 }
 0x2ab   :  { %v955_v38 = vmul.f32 1.442695, %v3469_v35 }
 0x2ac   :  { %v953_v39 = vmul.f32 1.442695, %v3468_v37  ;;  %v3833_v40 = vpop.f32.mrb[2].mxu1 }
 0x2ad   :  { %4420 = vpow2.f32 %v955_v38  ;;  %v3471_v43 = vclamps-f32 %v3833_v40, 30.0  ;;  %v740_v44 = vpop.f32.mrb[3].mxu1 }
 0x2ae   :  { %4422 = vpow2.f32 %v953_v39  ;;  %v3470_v45 = vclamps-f32 %v740_v44, 30.0 }
 0x2af   :  { %v959_v46 = vmul.f32 1.442695, %v3471_v43 }
 0x2b0   :  { %v957_v47 = vmul.f32 1.442695, %v3470_v45  ;;  %v3836_v48 = vpop.f32.mrb[4].mxu1 }
 0x2b1   :  { %4424 = vpow2.f32 %v959_v46  ;;  %v3473_v49 = vclamps-f32 %v3836_v48, 30.0  ;;  %v750_v50 = vpop.f32.mrb[5].mxu1 }
 0x2b2   :  { %4426 = vpow2.f32 %v957_v47  ;;  %v3472_v51 = vclamps-f32 %v750_v50, 30.0 }
 0x2b3   :  { %v963_v52 = vmul.f32 1.442695, %v3473_v49 }
 0x2b4   :  { %v961_v53 = vmul.f32 1.442695, %v3472_v51  ;;  %v3839_v54 = vpop.f32.mrb[6].mxu1 }
 0x2b5   :  { %4428 = vpow2.f32 %v963_v52  ;;  %v3475_v55 = vclamps-f32 %v3839_v54, 30.0  ;;  %v760_v56 = vpop.f32.mrb[7].mxu1 }
 0x2b6   :  { %4430 = vpow2.f32 %v961_v53  ;;  %v3474_v57 = vclamps-f32 %v760_v56, 30.0 }
 0x2b7   :  { %v4839_v58 = vpop.eup %4420  ;;  %v967_v59 = vmul.f32 1.442695, %v3475_v55 }
 0x2b8   :  { %v4841_v41 = vpop.eup %4422  ;;  %v965_v60 = vmul.f32 1.442695, %v3474_v57  ;;  %v3842_v42 = vpop.f32.mrb[8].mxu1  ;;  %v1018_v61 = vmul.f32 %v4839_v58, %v4681_v19 }
 0x2b9   :  { %4432 = vpow2.f32 %v967_v59  ;;  %v3477_v62 = vclamps-f32 %v3842_v42, 30.0  ;;  %v770_v63 = vpop.f32.mrb[9].mxu1  ;;  %v1017_v0 = vmul.f32 %v4841_v41, %v4685_v20 }
 0x2ba   :  { %4434 = vpow2.f32 %v965_v60  ;;  %v3476_v1 = vclamps-f32 %v770_v63, 30.0 }
 0x2bb   :  { %v4847_v2 = vpop.eup %4424  ;;  %v971_v4 = vmul.f32 1.442695, %v3477_v62  ;;  %v4254_v5 = vpack.i.bf16 %v1018_v61, %v1017_v0 }
 0x2bc   :  { %v4849_v6 = vpop.eup %4426  ;;  %v969_v7 = vmul.f32 1.442695, %v3476_v1  ;;  %v3845_v8 = vpop.f32.mrb[10].mxu1  ;;  %v1020_v9 = vmul.f32 %v4847_v2, %v4681_v19 }
 0x2bd   :  { %4436 = vpow2.f32 %v971_v4  ;;  %v3479_v11 = vclamps-f32 %v3845_v8, 30.0  ;;  %v780_v13 = vpop.f32.mrb[11].mxu1  ;;  %4255 = vrot.lane.b32.xlu0 %v4254_v5, %s4599_s13  ;;  %v1019_v14 = vmul.f32 %v4849_v6, %v4685_v20 }
 0x2be   :  { %4438 = vpow2.f32 %v969_v7  ;;  %v3478_v15 = vclamps-f32 %v780_v13, 30.0 }
 0x2bf   :  { %v4856_v16 = vpop.eup %4428  ;;  %v975_v17 = vmul.f32 1.442695, %v3479_v11  ;;  %v4259_v18 = vpack.i.bf16 %v1020_v9, %v1019_v14 }
 0x2c0   :  { %v4858_v21 = vpop.eup %4430  ;;  %v973_v22 = vmul.f32 1.442695, %v3478_v15  ;;  %v3848_v23 = vpop.f32.mrb[12].mxu1  ;;  %v1022_v24 = vmul.f32 %v4856_v16, %v4681_v19 }
 0x2c1   :  { %4440 = vpow2.f32 %v975_v17  ;;  %v3481_v25 = vclamps-f32 %v3848_v23, 30.0  ;;  %v790_v26 = vpop.f32.mrb[13].mxu1  ;;  %4260 = vrot.lane.b32.xlu0 %v4259_v18, %s4599_s13  ;;  %v1021_v27 = vmul.f32 %v4858_v21, %v4685_v20 }
 0x2c2   :  { %4442 = vpow2.f32 %v973_v22  ;;  %v3480_v28 = vclamps-f32 %v790_v26, 30.0 }
 0x2c3   :  { %v4865_v29 = vpop.eup %4432  ;;  %v979_v30 = vmul.f32 1.442695, %v3481_v25  ;;  %v4264_v31 = vpack.i.bf16 %v1022_v24, %v1021_v27 }
 0x2c4   :  { %v4867_v33 = vpop.eup %4434  ;;  %v977_v34 = vmul.f32 1.442695, %v3480_v28  ;;  %v3851_v35 = vpop.f32.mrb[14].mxu1  ;;  %v1024_v36 = vmul.f32 %v4865_v29, %v4681_v19 }
 0x2c5   :  { %4444 = vpow2.f32 %v979_v30  ;;  %v3483_v37 = vclamps-f32 %v3851_v35, 30.0  ;;  %4265 = vrot.lane.b32.xlu0 %v4264_v31, %s4599_s13  ;;  %v800_v38 = vpop.f32.mrb[15].mxu1  ;;  %v1023_v39 = vmul.f32 %v4867_v33, %v4685_v20 }
 0x2c6   :  { %4446 = vpow2.f32 %v977_v34  ;;  %v3482_v40 = vclamps-f32 %v800_v38, 30.0 }
 0x2c7   :  { %v4874_v43 = vpop.eup %4436  ;;  %v983_v44 = vmul.f32 1.442695, %v3483_v37  ;;  %v4269_v45 = vpack.i.bf16 %v1024_v36, %v1023_v39 }
 0x2c8   :  { %v4876_v46 = vpop.eup %4438  ;;  %v981_v47 = vmul.f32 1.442695, %v3482_v40  ;;  %v3854_v48 = vpop.f32.mrb[16].mxu1  ;;  %v1026_v49 = vmul.f32 %v4874_v43, %v4681_v19 }
 0x2c9   :  { %4448 = vpow2.f32 %v983_v44  ;;  %v3485_v50 = vclamps-f32 %v3854_v48, 30.0  ;;  %4270 = vrot.lane.b32.xlu0 %v4269_v45, %s4599_s13  ;;  %v810_v51 = vpop.f32.mrb[17].mxu1  ;;  %v1025_v52 = vmul.f32 %v4876_v46, %v4685_v20 }
 0x2ca   :  { %4450 = vpow2.f32 %v981_v47  ;;  %v3484_v53 = vclamps-f32 %v810_v51, 30.0 }
 0x2cb   :  { %v4883_v54 = vpop.eup %4440  ;;  %v987_v55 = vmul.f32 1.442695, %v3485_v50  ;;  %v4274_v56 = vpack.i.bf16 %v1026_v49, %v1025_v52 }
 0x2cc   :  { %v4885_v57 = vpop.eup %4442  ;;  %v985_v59 = vmul.f32 1.442695, %v3484_v53  ;;  %v3857_v60 = vpop.f32.mrb[18].mxu1  ;;  %v1028_v42 = vmul.f32 %v4883_v54, %v4681_v19 }
 0x2cd   :  { %4452 = vpow2.f32 %v987_v55  ;;  %v3487_v61 = vclamps-f32 %v3857_v60, 30.0  ;;  %4275 = vrot.lane.b32.xlu0 %v4274_v56, %s4599_s13  ;;  %v820_v62 = vpop.f32.mrb[19].mxu1  ;;  %v1027_v63 = vmul.f32 %v4885_v57, %v4685_v20 }
 0x2ce   :  { %4454 = vpow2.f32 %v985_v59  ;;  %v3486_v0 = vclamps-f32 %v820_v62, 30.0 }
 0x2cf   :  { %v4892_v1 = vpop.eup %4444  ;;  %v991_v4 = vmul.f32 1.442695, %v3487_v61  ;;  %v4279_v5 = vpack.i.bf16 %v1028_v42, %v1027_v63 }
 0x2d0   :  { %v4894_v7 = vpop.eup %4446  ;;  %v989_v8 = vmul.f32 1.442695, %v3486_v0  ;;  %v3860_v9 = vpop.f32.mrb[20].mxu1  ;;  %v1030_v11 = vmul.f32 %v4892_v1, %v4681_v19 }
 0x2d1   :  { %4456 = vpow2.f32 %v991_v4  ;;  %v3489_v13 = vclamps-f32 %v3860_v9, 30.0  ;;  %4280 = vrot.lane.b32.xlu0 %v4279_v5, %s4599_s13  ;;  %v830_v14 = vpop.f32.mrb[21].mxu1  ;;  %v1029_v15 = vmul.f32 %v4894_v7, %v4685_v20 }
 0x2d2   :  { %4458 = vpow2.f32 %v989_v8  ;;  %v3488_v17 = vclamps-f32 %v830_v14, 30.0 }
 0x2d3   :  { %v4901_v18 = vpop.eup %4448  ;;  %v995_v22 = vmul.f32 1.442695, %v3489_v13  ;;  %v4284_v23 = vpack.i.bf16 %v1030_v11, %v1029_v15 }
 0x2d4   :  { %v4903_v24 = vpop.eup %4450  ;;  %v993_v25 = vmul.f32 1.442695, %v3488_v17  ;;  %v3863_v26 = vpop.f32.mrb[22].mxu1  ;;  %v1032_v27 = vmul.f32 %v4901_v18, %v4681_v19 }
 0x2d5   :  { %4460 = vpow2.f32 %v995_v22  ;;  %v3491_v28 = vclamps-f32 %v3863_v26, 30.0  ;;  %4285 = vrot.lane.b32.xlu0 %v4284_v23, %s4599_s13  ;;  %v840_v30 = vpop.f32.mrb[23].mxu1  ;;  %v1031_v31 = vmul.f32 %v4903_v24, %v4685_v20 }
 0x2d6   :  { %4462 = vpow2.f32 %v993_v25  ;;  %v3490_v34 = vclamps-f32 %v840_v30, 30.0 }
 0x2d7   :  { %v4910_v35 = vpop.eup %4452  ;;  %v999_v36 = vmul.f32 1.442695, %v3491_v28  ;;  %v4329_v37 = vpack.i.bf16 %v1032_v27, %v1031_v31 }
 0x2d8   :  { %v4912_v38 = vpop.eup %4454  ;;  %v997_v39 = vmul.f32 1.442695, %v3490_v34  ;;  %v3866_v40 = vpop.f32.mrb[24].mxu1  ;;  %v1034_v44 = vmul.f32 %v4910_v35, %v4681_v19 }
 0x2d9   :  { %4464 = vpow2.f32 %v999_v36  ;;  %v3493_v45 = vclamps-f32 %v3866_v40, 30.0  ;;  %4330 = vrot.lane.b32.xlu0 %v4329_v37, %s4599_s13  ;;  %v850_v47 = vpop.f32.mrb[25].mxu1  ;;  %v1033_v48 = vmul.f32 %v4912_v38, %v4685_v20 }
 0x2da   :  { %4466 = vpow2.f32 %v997_v39  ;;  %v3492_v49 = vclamps-f32 %v850_v47, 30.0 }
 0x2db   :  { %v4919_v50 = vpop.eup %4456  ;;  %v1003_v51 = vmul.f32 1.442695, %v3493_v45  ;;  %v4289_v52 = vpack.i.bf16 %v1034_v44, %v1033_v48 }
 0x2dc   :  { %v4921_v53 = vpop.eup %4458  ;;  %v1001_v55 = vmul.f32 1.442695, %v3492_v49  ;;  %v3869_v56 = vpop.f32.mrb[26].mxu1  ;;  %v1036_v59 = vmul.f32 %v4919_v50, %v4681_v19 }
 0x2dd   :  { %4468 = vpow2.f32 %v1003_v51  ;;  %v3495_v60 = vclamps-f32 %v3869_v56, 30.0  ;;  %4290 = vrot.lane.b32.xlu1 %v4289_v52, %s4599_s13  ;;  %v860_v42 = vpop.f32.mrb[27].mxu1  ;;  %v1035_v61 = vmul.f32 %v4921_v53, %v4685_v20 }
 0x2de   :  { %4470 = vpow2.f32 %v1001_v55  ;;  %v3494_v62 = vclamps-f32 %v860_v42, 30.0 }
 0x2df   :  { %v4928_v63 = vpop.eup %4460  ;;  %v1007_v0 = vmul.f32 1.442695, %v3495_v60  ;;  %v4294_v4 = vpack.i.bf16 %v1036_v59, %v1035_v61 }
 0x2e0   :  { %v4930_v5 = vpop.eup %4462  ;;  %v1005_v8 = vmul.f32 1.442695, %v3494_v62  ;;  %v3872_v9 = vpop.f32.mrb[28].mxu1  ;;  %v1038_v11 = vmul.f32 %v4928_v63, %v4681_v19 }
 0x2e1   :  { %4472 = vpow2.f32 %v1007_v0  ;;  %v3497_v13 = vclamps-f32 %v3872_v9, 30.0  ;;  %4295 = vrot.lane.b32.xlu1 %v4294_v4, %s4599_s13  ;;  %v870_v14 = vpop.f32.mrb[29].mxu1  ;;  %v1037_v15 = vmul.f32 %v4930_v5, %v4685_v20  ;;  %v22_v4 = vld [vmem:[%s5758_s2 + $0x8] sm:$0xff] }
 0x2e2   :  { %4474 = vpow2.f32 %v1005_v8  ;;  %v3496_v17 = vclamps-f32 %v870_v14, 30.0  ;;  %1273 = vmatprep.mubr.f32.mxu0 %v22_v4  ;;  %2490 = vmatprep.mubr.f32.mxu1 %v22_v4 }
 0x2e3   :  { %v4937_v22 = vpop.eup %4464  ;;  %v1011_v23 = vmul.f32 1.442695, %v3497_v13  ;;  %v4299_v25 = vpack.i.bf16 %v1038_v11, %v1037_v15 }
 0x2e4   :  { %v4939_v26 = vpop.eup %4466  ;;  %v1009_v27 = vmul.f32 1.442695, %v3496_v17  ;;  %v3875_v28 = vpop.f32.mrb[30].mxu1  ;;  %v1040_v30 = vmul.f32 %v4937_v22, %v4681_v19 }
 0x2e5   :  { %4476 = vpow2.f32 %v1011_v23  ;;  %v3499_v31 = vclamps-f32 %v3875_v28, 30.0  ;;  %4300 = vrot.lane.b32.xlu1 %v4299_v25, %s4599_s13  ;;  %v880_v34 = vpop.f32.mrb[31].mxu1  ;;  %v1039_v36 = vmul.f32 %v4939_v26, %v4685_v20 }
 0x2e6   :  { %4478 = vpow2.f32 %v1009_v27  ;;  %v3498_v37 = vclamps-f32 %v880_v34, 30.0 }
 0x2e7   :  { %v4946_v39 = vpop.eup %4468  ;;  %v1015_v40 = vmul.f32 1.442695, %v3499_v31  ;;  %v4304_v44 = vpack.i.bf16 %v1040_v30, %v1039_v36 }
 0x2e8   :  { %v4948_v45 = vpop.eup %4470  ;;  %v1013_v47 = vmul.f32 1.442695, %v3498_v37  ;;  %v1042_v48 = vmul.f32 %v4946_v39, %v4681_v19 }
 0x2e9   :  { %4480 = vpow2.f32 %v1015_v40  ;;  %4305 = vrot.lane.b32.xlu1 %v4304_v44, %s4599_s13  ;;  %v1041_v49 = vmul.f32 %v4948_v45, %v4685_v20 }
 0x2ea   :  { %4482 = vpow2.f32 %v1013_v47 }
 0x2eb   :  { %v4955_v51 = vpop.eup %4472  ;;  %v4309_v52 = vpack.i.bf16 %v1042_v48, %v1041_v49 }
 0x2ec   :  { %v4957_v55 = vpop.eup %4474  ;;  %v1044_v56 = vmul.f32 %v4955_v51, %v4681_v19 }
 0x2ed   :  { %4310 = vrot.lane.b32.xlu1 %v4309_v52, %s4599_s13  ;;  %v1043_v59 = vmul.f32 %v4957_v55, %v4685_v20 }
 0x2ef   :  { %v4964_v60 = vpop.eup %4476  ;;  %v4314_v42 = vpack.i.bf16 %v1044_v56, %v1043_v59 }
 0x2f0   :  { %v4966_v61 = vpop.eup %4478  ;;  %v1046_v62 = vmul.f32 %v4964_v60, %v4681_v19 }
 0x2f1   :  { %4315 = vrot.lane.b32.xlu1 %v4314_v42, %s4599_s13  ;;  %v1045_v0 = vmul.f32 %v4966_v61, %v4685_v20 }
 0x2f3   :  { %v4976_v8 = vpop.eup %4480  ;;  %v4319_v9 = vpack.i.bf16 %v1046_v62, %v1045_v0 }
 0x2f4   :  { %v4978_v11 = vpop.eup %4482  ;;  %v1048_v13 = vmul.f32 %v4976_v8, %v4681_v19 }
 0x2f5   :  { %4320 = vrot.lane.b32.xlu1 %v4319_v9, %s4599_s13  ;;  %v1047_v14 = vmul.f32 %v4978_v11, %v4685_v20 }
 0x2f7   :  { %v4324_v15 = vpack.i.bf16 %v1048_v13, %v1047_v14 }
 0x2f9   :  { %4325 = vrot.lane.b32.xlu1 %v4324_v15, %s4599_s13 }
 0x32f   :  { %v4256_v17 = vpop.permute.xlu0 %4255 }
 0x330   :  { %v4258_v27 = vunpack.i.h.bf16 %v4256_v17  ;;  %v4257_v28 = vunpack.i.l.bf16 %v4256_v17 }
 0x332   :  { %v1178_v19 = vsel %vm599_vm3, %v4839_v58, %v4258_v27  ;;  %v1177_v37 = vsel %vm599_vm3, %v4841_v41, %v4257_v28 }
 0x333   :  { %v4261_v23 = vpop.permute.xlu0 %4260  ;;  %v4095_v52 = vpack.c.bf16 %v1178_v19, %v1177_v37 }
 0x334   :  { %v4263_v40 = vunpack.i.h.bf16 %v4261_v23  ;;  %v4262_v20 = vunpack.i.l.bf16 %v4261_v23 }
 0x336   :  { %v1180_v58 = vsel %vm599_vm3, %v4847_v2, %v4263_v40  ;;  %v1179_v41 = vsel %vm599_vm3, %v4849_v6, %v4262_v20 }
 0x337   :  { %v4266_v25 = vpop.permute.xlu0 %4265  ;;  %v4099_v13 = vpack.c.bf16 %v1180_v58, %v1179_v41 }
 0x338   :  { %v4268_v62 = vunpack.i.h.bf16 %v4266_v25  ;;  %v4267_v0 = vunpack.i.l.bf16 %v4266_v25 }
 0x33a   :  { %v1182_v2 = vsel %vm599_vm3, %v4856_v16, %v4268_v62  ;;  %v1181_v6 = vsel %vm599_vm3, %v4858_v21, %v4267_v0 }
 0x33b   :  { %v4271_v30 = vpop.permute.xlu0 %4270 }
 0x33c   :  { %v4273_v17 = vunpack.i.h.bf16 %v4271_v30  ;;  %v4272_v23 = vunpack.i.l.bf16 %v4271_v30 }
 0x33e   :  { %v1184_v16 = vsel %vm599_vm3, %v4865_v29, %v4273_v17  ;;  %v1183_v21 = vsel %vm599_vm3, %v4867_v33, %v4272_v23 }
 0x33f   :  { %v4276_v56 = vpop.permute.xlu0 %4275  ;;  %v4107_v20 = vpack.c.bf16 %v1184_v16, %v1183_v21 }
 0x340   :  { %v4278_v30 = vunpack.i.h.bf16 %v4276_v56  ;;  %v4277_v19 = vunpack.i.l.bf16 %v4276_v56 }
 0x342   :  { %v1186_v29 = vsel %vm599_vm3, %v4874_v43, %v4278_v30  ;;  %v1185_v33 = vsel %vm599_vm3, %v4876_v46, %v4277_v19  ;;  %v1300_v19 = vsub.s32 1, %v4660_v10 }
 0x343   :  { %v4281_v25 = vpop.permute.xlu0 %4280 }
 0x34f   :  { %v4291_v31 = vpop.permute.xlu1 %4290 }
 0x350   :  { %v4293_v34 = vunpack.i.h.bf16 %v4291_v31  ;;  %v4292_v36 = vunpack.i.l.bf16 %v4291_v31  ;;  %v4103_v31 = vpack.c.bf16 %v1182_v2, %v1181_v6 }
 0x352   :  { %v1193_v44 = vsel %vm599_vm3, %v4912_v38, %v4292_v36  ;;  %v1194_v47 = vsel %vm599_vm3, %v4910_v35, %v4293_v34 }
 0x353   :  { %v4296_v48 = vpop.permute.xlu1 %4295  ;;  %v4093_v49 = vpack.c.bf16 %v1194_v47, %v1193_v44  ;;  %v4286_v44 = vpop.permute.xlu0 %4285 }
 0x354   :  { %v4298_v59 = vunpack.i.h.bf16 %v4296_v48  ;;  %v4297_v42 = vunpack.i.l.bf16 %v4296_v48  ;;  %v4288_v62 = vunpack.i.h.bf16 %v4286_v44  ;;  %v4287_v0 = vunpack.i.l.bf16 %v4286_v44 }
 0x355   :  { %4094 = vmatprep.subr.bf16.mxu0 %v4093_v49  ;;  %v4283_v49 = vunpack.i.h.bf16 %v4281_v25 }
 0x356   :  { %4096 = vmatpush3.bf16.msra.mxu0 %v4095_v52  ;;  %v1195_v38 = vsel %vm599_vm3, %v4921_v53, %v4297_v42  ;;  %v1196_v35 = vsel %vm599_vm3, %v4919_v50, %v4298_v59  ;;  %v4282_v52 = vunpack.i.l.bf16 %v4281_v25  ;;  %v4111_v42 = vpack.c.bf16 %v1186_v29, %v1185_v33 }
 0x357   :  { %v4301_v4 = vpop.permute.xlu1 %4300  ;;  %v4097_v9 = vpack.c.bf16 %v1196_v35, %v1195_v38  ;;  %v1188_v43 = vsel %vm599_vm3, %v4883_v54, %v4283_v49  ;;  %v4331_v38 = vpop.permute.xlu0 %4330  ;;  %v1190_v54 = vsel %vm599_vm3, %v4892_v1, %v4288_v62 }
 0x358   :  { %v4303_v14 = vunpack.i.h.bf16 %v4301_v4  ;;  %v4302_v15 = vunpack.i.l.bf16 %v4301_v4  ;;  %v1187_v46 = vsel %vm599_vm3, %v4885_v57, %v4282_v52  ;;  %v1189_v57 = vsel %vm599_vm3, %v4894_v7, %v4287_v0 }
 0x359   :  { %4098 = vmatprep.subr.bf16.mxu0 %v4097_v9  ;;  %v4115_v9 = vpack.c.bf16 %v1188_v43, %v1187_v46  ;;  %v4332_v2 = vunpack.i.l.bf16 %v4331_v38  ;;  %v4119_v23 = vpack.c.bf16 %v1190_v54, %v1189_v57 }
 0x35a   :  { %4100 = vmatpush3.bf16.msra.mxu0 %v4099_v13  ;;  %v1197_v53 = vsel %vm599_vm3, %v4930_v5, %v4302_v15  ;;  %v1198_v50 = vsel %vm599_vm3, %v4928_v63, %v4303_v14  ;;  %v4333_v15 = vunpack.i.h.bf16 %v4331_v38 }
 0x35b   :  { %v4306_v27 = vpop.permute.xlu1 %4305  ;;  %v4101_v28 = vpack.c.bf16 %v1198_v50, %v1197_v53  ;;  %v1191_v7 = vsel %vm599_vm3, %v4903_v24, %v4332_v2  ;;  %v23_v24 = vld [vmem:[%s5758_s2 + $0x10] sm:$0xff] }
 0x35c   :  { %v4308_v34 = vunpack.i.h.bf16 %v4306_v27  ;;  %v4307_v36 = vunpack.i.l.bf16 %v4306_v27  ;;  %v1192_v1 = vsel %vm599_vm3, %v4901_v18, %v4333_v15  ;;  %v24_v18 = vld [vmem:[%s5758_s2 + $0x18] sm:$0xff] }
 0x35d   :  { %4102 = vmatprep.subr.bf16.mxu0 %v4101_v28  ;;  %v4123_v27 = vpack.c.bf16 %v1192_v1, %v1191_v7  ;;  %v21_v28 = vld [vmem:[%s5758_s2] sm:$0xff] }
 0x35e   :  { %4104 = vmatpush3.bf16.msra.mxu0 %v4103_v31  ;;  %v1199_v5 = vsel %vm599_vm3, %v4939_v26, %v4307_v36  ;;  %v1200_v63 = vsel %vm599_vm3, %v4937_v22, %v4308_v34 }
 0x35f   :  { %v4311_v37 = vpop.permute.xlu1 %4310  ;;  %v4105_v40 = vpack.c.bf16 %v1200_v63, %v1199_v5  ;;  %v33_v5 = vld [vmem:[%s5759_s3 + $0x40] sm:$0xff]  ;;  %v34_v63 = vld [vmem:[%s5759_s3 + $0x48] sm:$0xff] }
 0x360   :  { %v4313_v47 = vunpack.i.h.bf16 %v4311_v37  ;;  %v4312_v48 = vunpack.i.l.bf16 %v4311_v37  ;;  %v35_v37 = vld [vmem:[%s5759_s3 + $0x50] sm:$0xff] }
 0x361   :  { %4106 = vmatprep.subr.bf16.mxu0 %v4105_v40  ;;  %v4125_v40 = vpack.c.bf16 %v34_v63, %v33_v5 }
 0x362   :  { %4108 = vmatpush3.bf16.msra.mxu0 %v4107_v20  ;;  %v1201_v26 = vsel %vm599_vm3, %v4948_v45, %v4312_v48  ;;  %v1202_v22 = vsel %vm599_vm3, %v4946_v39, %v4313_v47  ;;  %v36_v20 = vld [vmem:[%s5759_s3 + $0x58] sm:$0xff]  ;;  %v4570_v48 = vld [vmem:[%s5760_s4 + $0x1b0] sm:$0xff] }
 0x363   :  { %v4316_v56 = vpop.permute.xlu1 %4315  ;;  %v4109_v59 = vpack.c.bf16 %v1202_v22, %v1201_v26  ;;  %v4129_v47 = vpack.c.bf16 %v36_v20, %v35_v37  ;;  %v1301_v29 = vrot.slane %v4570_v48, %v1300_v19 }
 0x364   :  { %v4318_v58 = vunpack.i.h.bf16 %v4316_v56  ;;  %v4317_v41 = vunpack.i.l.bf16 %v4316_v56 }
 0x365   :  { %4110 = vmatprep.subr.bf16.mxu0 %v4109_v59 }
 0x366   :  { %4112 = vmatpush3.bf16.msra.mxu0 %v4111_v42  ;;  %v1203_v45 = vsel %vm599_vm3, %v4957_v55, %v4317_v41  ;;  %v1204_v39 = vsel %vm599_vm3, %v4955_v51, %v4318_v58  ;;  %v1397_v42 = vsub.s32 2, %v4660_v10 }
 0x367   :  { %v4321_v35 = vpop.permute.xlu1 %4320  ;;  %v4113_v4 = vpack.c.bf16 %v1204_v39, %v1203_v45  ;;  %v43_v39 = vld [vmem:[%s5760_s4 + $0x20] sm:$0xff] }
 0x368   :  { %v4323_v13 = vunpack.i.h.bf16 %v4321_v35  ;;  %v4322_v14 = vunpack.i.l.bf16 %v4321_v35  ;;  %v1398_v46 = vrot.slane %v4570_v48, %v1397_v42  ;;  %v44_v35 = vld [vmem:[%s5760_s4 + $0x28] sm:$0xff] }
 0x369   :  { %4114 = vmatprep.subr.bf16.mxu0 %v4113_v4  ;;  %v45_v4 = vld [vmem:[%s5760_s4 + $0x30] sm:$0xff] }
 0x36a   :  { %4116 = vmatpush3.bf16.msra.mxu0 %v4115_v9  ;;  %v1205_v55 = vsel %vm599_vm3, %v4966_v61, %v4322_v14  ;;  %v1206_v51 = vsel %vm599_vm3, %v4964_v60, %v4323_v13  ;;  %v4133_v9 = vpack.c.bf16 %v44_v35, %v43_v39  ;;  %v46_v13 = vld [vmem:[%s5760_s4 + $0x38] sm:$0xff] }
 0x36b   :  { %v4326_v6 = vpop.permute.xlu1 %4325  ;;  %v4117_v17 = vpack.c.bf16 %v1206_v51, %v1205_v55  ;;  %v4137_v14 = vpack.c.bf16 %v46_v13, %v45_v4 }
 0x36c   :  { %v4328_v25 = vunpack.i.h.bf16 %v4326_v6  ;;  %v4327_v53 = vunpack.i.l.bf16 %v4326_v6 }
 0x36d   :  { %4118 = vmatprep.subr.bf16.mxu0 %v4117_v17 }
 0x36e   :  { %4120 = vmatpush3.bf16.msra.mxu0 %v4119_v23  ;;  %v1207_v50 = vsel %vm599_vm3, %v4978_v11, %v4327_v53  ;;  %v1208_v61 = vsel %vm599_vm3, %v4976_v8, %v4328_v25 }
 0x36f   :  { %v4121_v60 = vpack.c.bf16 %v1208_v61, %v1207_v50 }
 0x371   :  { %4122 = vmatprep.subr.bf16.mxu0 %v4121_v60 }
 0x372   :  { %4124 = vmatpush3.bf16.msra.mxu0 %v4123_v27 }
 0x373   :  { %4126 = vmatprep.subr.bf16.mxu0 %v4125_v40 }
 0x375   :  { %1274 = vmatmul.mubr.f32.vlgmr.msra.gmra.mrb[2].mxu0 %v21_v28 }
 0x376   :  { %1278 = vmatprep.mubr.f32.mxu0 %v24_v18  ;;  %4128 = vmatpush3.bf16.msra.mxu0 %v4125_v40 }
 0x377   :  { %4130 = vmatprep.subr.bf16.mxu0 %v4129_v47 }
 0x379   :  { %1279 = vmatmul.mubr.f32.gmra.mrb[4].mxu0 %v23_v24 }
 0x37a   :  { %4132 = vmatpush3.bf16.msra.mxu0 %v4129_v47 }
 0x37b   :  { %4134 = vmatprep.subr.bf16.mxu0 %v4133_v9 }
 0x448   :  { %v3657_v8 = vpop.f32.mrb[2].mxu0 }
 0x449   :  { %v3658_v11 = vpop.f32.mrb[3].mxu0 }
 0x44a   :  { %v3659_v31 = vadd.f32 %v3658_v11, %v3657_v8 }
 0x44c   :  { %v1284_v34 = vmax.f32 %v3659_v31, 1e-30  ;;  %v3660_v36 = vpop.f32.mrb[4].mxu0 }
 0x44d   :  { %v3661_v16 = vpop.f32.mrb[5].mxu0 }
 0x44e   :  { %4484 = vrcp.f32 %v1284_v34  ;;  %v3662_v21 = vadd.f32 %v3661_v16, %v3660_v36 }
 0x450   :  { %v1285_v30 = vmax.f32 %v3662_v21, 1e-30 }
 0x452   :  { %4486 = vrcp.f32 %v1285_v30 }
 0x458   :  { %v4485_v44 = vpop.eup %4484 }
 0x459   :  { %1290 = vrot.lane.b32.xlu1 %v4485_v44, %s4599_s13 }
 0x45c   :  { %v4487_v33 = vpop.eup %4486 }
 0x45d   :  { %1292 = vrot.lane.b32.xlu0 %v4487_v33, %s4599_s13  ;;  %1303 = vrot.lane.b32.xlu1 %v1301_v29, %s4599_s13 }
 0x4cb   :  { %v1291_v49 = vpop.permute.xlu1 %1290 }
 0x4cc   :  { %v1296_v52 = vmul.f32 %v3659_v31, %v1291_v49 }
 0x4cf   :  { %v1293_v26 = vpop.permute.xlu0 %1292  ;;  %v1304_v22 = vpop.permute.xlu1 %1303 }
 0x4d0   :  { %v1297_v56 = vmul.f32 %v3662_v21, %v1293_v26  ;;  %v5080_v59 = vadd.f32 %v1304_v22, %v1296_v52 }
 0x4d2   :  { %v5083_v58 = vadd.f32 %v1304_v22, %v1297_v56  ;;  %v1308_v41 = vmax.f32 %v5080_v59, 0.0 }
 0x4d4   :  { %v1309_v43 = vmax.f32 %v5083_v58, 0.0  ;;  %1312 = vrot.lane.b32.xlu0 %v1308_v41, %s4601_s24  ;;  %v48_v58 = vld [vmem:[%s5760_s4 + $0x48] sm:$0xff] }
 0x4d6   :  { %1314 = vrot.lane.b32.xlu1 %v1309_v43, %s4601_s24 }
 0x4d8   :  { %1400 = vrot.lane.b32.xlu0 %v1398_v46, %s4599_s13 }
 0x546   :  { %v1313_v62 = vpop.permute.xlu0 %1312 }
 0x547   :  { %3884 = vmatprep.mubr.msk.f32.mxu0 %vm599_vm3, %v1313_v62 }
 0x548   :  { %v1315_v0 = vpop.permute.xlu1 %1314 }
 0x549   :  { %3885 = vmatmul.mubr.msk.f32.vlgmr.msra.gmra.mrb[6].mxu0 %vm599_vm3, %v1315_v0 }
 0x54a   :  { %4136 = vmatpush3.bf16.msra.mxu0 %v4133_v9  ;;  %v1401_v54 = vpop.permute.xlu0 %1400 }
 0x54b   :  { %4138 = vmatprep.subr.bf16.mxu0 %v4137_v14 }
 0x54e   :  { %4140 = vmatpush3.bf16.msra.mxu0 %v4137_v14 }
 0x61c   :  { %v5098_v38 = vpop.f32.mrb[6].mxu0 }
 0x61d   :  { %1589 = vrot.lane.b32.xlu0 %v5098_v38, %s4599_s13  ;;  %v5102_v45 = vpop.f32.mrb[7].mxu0  ;;  %v5150_v62 = vadd.f32 %v5098_v38, %v1401_v54 }
 0x61e   :  { %1587 = vrot.lane.b32.xlu1 %v5102_v45, %s4599_s13  ;;  %v1403_v57 = vadd.f32 %v1401_v54, %v5102_v45 }
 0x61f   :  { %v1463_v54 = vrot.slane %v5150_v62, %v4703_v32 }
 0x620   :  { %v1414_v15 = vrot.slane %v1403_v57, %v4703_v32  ;;  %v1407_v6 = vcombine.high %v1403_v57, %v1403_v57 }
 0x622   :  { %v1422_v2 = vcombine.high %v1414_v15, %v1414_v15  ;;  %v1430_v55 = vrot.slane %v1414_v15, %v4703_v32  ;;  %v1421_v27 = vrot.slane %v1407_v6, %v4703_v32 }
 0x624   :  { %v1444_v51 = vrot.slane %v1422_v2, %v4703_v32  ;;  %v1508_v17 = vrot.slane %v1430_v55, %v4667_v12  ;;  %v1452_v25 = vcombine.high %v1430_v55, %v1430_v55  ;;  %v1437_v5 = vrot.slane %v1421_v27, %v4703_v32 }
 0x625   :  { %v1423_v63 = vcombine.high %v1421_v27, %v1421_v27 }
 0x626   :  { %v1512_v23 = vrot.slane %v1444_v51, %v4667_v12  ;;  %v1516_v18 = vrot.slane %v1452_v25, %v4667_v12  ;;  %v1454_v24 = vcombine.high %v1444_v51, %v1444_v51  ;;  %v1524_v29 = vrot.slane %v1437_v5, %v4667_v12 }
 0x627   :  { %v1451_v33 = vrot.slane %v1423_v63, %v4703_v32  ;;  %v1453_v39 = vcombine.high %v1437_v5, %v1437_v5  ;;  %v1456_v63 = vcombine.high %v5150_v62, %v5150_v62 }
 0x628   :  { %v1520_v30 = vrot.slane %v1454_v24, %v4667_v12 }
 0x629   :  { %v1528_v0 = vrot.slane %v1451_v33, %v4667_v12  ;;  %v1532_v15 = vrot.slane %v1453_v39, %v4667_v12  ;;  %v1455_v2 = vcombine.high %v1451_v33, %v1451_v33 }
 0x68f   :  { %v5124_v53 = vpop.permute.xlu0 %1589 }
 0x690   :  { %v5126_v1 = vpop.permute.xlu1 %1587  ;;  %v1594_v7 = vadd.f32 %v5124_v53, %v1508_v17  ;;  %v1596_v50 = vadd.f32 %v5124_v53, %v1512_v23  ;;  %v1598_v34 = vadd.f32 %v5124_v53, %v1516_v18  ;;  %v1600_v20 = vadd.f32 %v5124_v53, %v1520_v30 }
 0x691   :  { %v1593_v61 = vadd.f32 %v5126_v1, %v1508_v17  ;;  %v1595_v60 = vadd.f32 %v5126_v1, %v1512_v23  ;;  %v1597_v21 = vadd.f32 %v5126_v1, %v1516_v18  ;;  %v1599_v48 = vadd.f32 %v5126_v1, %v1520_v30 }
 0x692   :  { %vm1626_vm4 = vcmp.ge.f32.partialorder %v1594_v7, 0.0  ;;  %v1658_v28 = vmul.f32 0.2, %v1594_v7  ;;  %v1660_v31 = vmul.f32 0.2, %v1596_v50  ;;  %vm1628_vm6 = vcmp.ge.f32.partialorder %v1596_v50, 0.0 }
 0x693   :  { %vm1625_vm5 = vcmp.ge.f32.partialorder %v1593_v61, 0.0  ;;  %v1657_v8 = vmul.f32 0.2, %v1593_v61  ;;  %v1659_v16 = vmul.f32 0.2, %v1595_v60  ;;  %vm1627_vm7 = vcmp.ge.f32.partialorder %v1595_v60, 0.0 }
 0x694   :  { %v1690_v11 = vsel %vm1626_vm4, %v1594_v7, %v1658_v28  ;;  %v1692_v37 = vsel %vm1628_vm6, %v1596_v50, %v1660_v31  ;;  %v1662_v40 = vmul.f32 0.2, %v1598_v34  ;;  %vm1630_vm8 = vcmp.ge.f32.partialorder %v1598_v34, 0.0 }
 0x695   :  { %1755 = vrot.lane.b32.xlu0 %v1690_v11, %s4601_s24  ;;  %v1689_v36 = vsel %vm1625_vm5, %v1593_v61, %v1657_v8  ;;  %v1691_v44 = vsel %vm1627_vm7, %v1595_v60, %v1659_v16  ;;  %v1661_v47 = vmul.f32 0.2, %v1597_v21  ;;  %vm1629_vm9 = vcmp.ge.f32.partialorder %v1597_v21, 0.0 }
 0x696   :  { %1753 = vrot.lane.b32.xlu1 %v1689_v36, %s4601_s24  ;;  %v1694_v49 = vsel %vm1630_vm8, %v1598_v34, %v1662_v40  ;;  %v1664_v52 = vmul.f32 0.2, %v1600_v20  ;;  %v1602_v26 = vadd.f32 %v5124_v53, %v1524_v29  ;;  %vm1632_vm10 = vcmp.ge.f32.partialorder %v1600_v20, 0.0 }
 0x697   :  { %v1693_v22 = vsel %vm1629_vm9, %v1597_v21, %v1661_v47  ;;  %v1663_v56 = vmul.f32 0.2, %v1599_v48  ;;  %v1601_v46 = vadd.f32 %v5126_v1, %v1524_v29  ;;  %vm1631_vm11 = vcmp.ge.f32.partialorder %v1599_v48, 0.0 }
 0x698   :  { %v1696_v35 = vsel %vm1632_vm10, %v1600_v20, %v1664_v52  ;;  %v1666_v4 = vmul.f32 0.2, %v1602_v26  ;;  %v1604_v9 = vadd.f32 %v5124_v53, %v1528_v0  ;;  %vm1634_vm12 = vcmp.ge.f32.partialorder %v1602_v26, 0.0 }
 0x699   :  { %1759 = vrot.lane.b32.xlu0 %v1692_v37, %s4601_s24  ;;  %v1695_v13 = vsel %vm1631_vm11, %v1599_v48, %v1663_v56  ;;  %v1665_v14 = vmul.f32 0.2, %v1601_v46  ;;  %v1603_v57 = vadd.f32 %v5126_v1, %v1528_v0  ;;  %vm1633_vm13 = vcmp.ge.f32.partialorder %v1601_v46, 0.0 }
 0x69a   :  { %1757 = vrot.lane.b32.xlu1 %v1691_v44, %s4601_s24  ;;  %v1698_v55 = vsel %vm1634_vm12, %v1602_v26, %v1666_v4  ;;  %v1668_v51 = vmul.f32 0.2, %v1604_v9  ;;  %v1606_v6 = vadd.f32 %v5124_v53, %v1532_v15  ;;  %vm1636_vm14 = vcmp.ge.f32.partialorder %v1604_v9, 0.0 }
 0x69b   :  { %v1697_v17 = vsel %vm1633_vm13, %v1601_v46, %v1665_v14  ;;  %v1667_v23 = vmul.f32 0.2, %v1603_v57  ;;  %v1605_v25 = vadd.f32 %v5126_v1, %v1532_v15  ;;  %v1471_v7 = vcombine.high %v1463_v54, %v1463_v54 }
 0x69c   :  { %v1479_v50 = vrot.slane %v1463_v54, %v4703_v32  ;;  %vm1635_vm15 = vcmp.ge.f32.partialorder %v1603_v57, 0.0  ;;  %v1536_v61 = vrot.slane %v1455_v2, %v4667_v12  ;;  %v1700_v60 = vsel %vm1636_vm14, %v1604_v9, %v1668_v51 }
 0x69d   :  { %1763 = vrot.lane.b32.xlu0 %v1694_v49, %s4601_s24  ;;  %v1670_v27 = vmul.f32 0.2, %v1606_v6  ;;  %v1699_v18 = vsel %vm1635_vm15, %v1603_v57, %v1667_v23  ;;  %vm1638_vm1 = vcmp.ge.f32.partialorder %v1606_v6, 0.0  ;;  %v1669_v24 = vmul.f32 0.2, %v1605_v25 }
 0x69e   :  { %1761 = vrot.lane.b32.xlu1 %v1693_v22, %s4601_s24  ;;  %v1608_v28 = vadd.f32 %v5124_v53, %v1536_v61  ;;  %v1607_v8 = vadd.f32 %v5126_v1, %v1536_v61  ;;  %v1493_v11 = vrot.slane %v1471_v7, %v4703_v32  ;;  %v1540_v31 = vrot.slane %v1479_v50, %v4667_v12 }
 0x69f   :  { %vm1637_vm2 = vcmp.ge.f32.partialorder %v1605_v25, 0.0  ;;  %v1702_v34 = vsel %vm1638_vm1, %v1606_v6, %v1670_v27  ;;  %v1501_v37 = vcombine.high %v1479_v50, %v1479_v50  ;;  %v1470_v49 = vrot.slane %v1456_v63, %v4703_v32 }
 0x6a0   :  { %v1672_v36 = vmul.f32 0.2, %v1608_v28  ;;  %v1610_v16 = vadd.f32 %v5124_v53, %v1540_v31  ;;  %v1701_v21 = vsel %vm1637_vm2, %v1605_v25, %v1669_v24  ;;  %vm1640_vm4 = vcmp.ge.f32.partialorder %v1608_v28, 0.0 }
 0x6a1   :  { %1767 = vrot.lane.b32.xlu0 %v1696_v35, %s4601_s24  ;;  %v1671_v30 = vmul.f32 0.2, %v1607_v8  ;;  %v1609_v5 = vadd.f32 %v5126_v1, %v1540_v31  ;;  %vm1639_vm5 = vcmp.ge.f32.partialorder %v1607_v8, 0.0  ;;  %v1544_v40 = vrot.slane %v1493_v11, %v4667_v12 }
 0x6a2   :  { %1765 = vrot.lane.b32.xlu1 %v1695_v13, %s4601_s24  ;;  %v1704_v20 = vsel %vm1640_vm4, %v1608_v28, %v1672_v36  ;;  %v1674_v44 = vmul.f32 0.2, %v1610_v16  ;;  %vm1642_vm6 = vcmp.ge.f32.partialorder %v1610_v16, 0.0  ;;  %v1503_v52 = vcombine.high %v1493_v11, %v1493_v11 }
 0x6a3   :  { %v1612_v47 = vadd.f32 %v5124_v53, %v1544_v40  ;;  %v1703_v48 = vsel %vm1639_vm5, %v1607_v8, %v1671_v30  ;;  %v1673_v29 = vmul.f32 0.2, %v1609_v5  ;;  %v1611_v33 = vadd.f32 %v5126_v1, %v1544_v40 }
 0x6a4   :  { %vm1641_vm7 = vcmp.ge.f32.partialorder %v1609_v5, 0.0  ;;  %v1548_v26 = vrot.slane %v1501_v37, %v4667_v12  ;;  %v1706_v22 = vsel %vm1642_vm6, %v1610_v16, %v1674_v44  ;;  %v1472_v35 = vcombine.high %v1470_v49, %v1470_v49 }
 0x6a5   :  { %1771 = vrot.lane.b32.xlu0 %v1698_v55, %s4601_s24  ;;  %v1676_v56 = vmul.f32 0.2, %v1612_v47  ;;  %v1705_v62 = vsel %vm1641_vm7, %v1609_v5, %v1673_v29  ;;  %vm1644_vm8 = vcmp.ge.f32.partialorder %v1612_v47, 0.0  ;;  %v1675_v0 = vmul.f32 0.2, %v1611_v33 }
 0x6a6   :  { %1769 = vrot.lane.b32.xlu1 %v1697_v17, %s4601_s24  ;;  %v1614_v46 = vadd.f32 %v5124_v53, %v1548_v26  ;;  %v1613_v39 = vadd.f32 %v5126_v1, %v1548_v26  ;;  %v1486_v4 = vrot.slane %v1470_v49, %v4703_v32  ;;  %vm1643_vm9 = vcmp.ge.f32.partialorder %v1611_v33, 0.0 }
 0x6a7   :  { %v1552_v9 = vrot.slane %v1503_v52, %v4667_v12  ;;  %v1708_v13 = vsel %vm1644_vm8, %v1612_v47, %v1676_v56  ;;  %v1707_v54 = vsel %vm1643_vm9, %v1611_v33, %v1675_v0  ;;  %v1500_v55 = vrot.slane %v1472_v35, %v4703_v32 }
 0x6a8   :  { %v1678_v14 = vmul.f32 0.2, %v1614_v46  ;;  %vm1646_vm10 = vcmp.ge.f32.partialorder %v1614_v46, 0.0  ;;  %v1677_v15 = vmul.f32 0.2, %v1613_v39  ;;  %vm1645_vm11 = vcmp.ge.f32.partialorder %v1613_v39, 0.0 }
 0x6a9   :  { %1775 = vrot.lane.b32.xlu0 %v1700_v60, %s4601_s24  ;;  %v1616_v57 = vadd.f32 %v5124_v53, %v1552_v9  ;;  %v1615_v2 = vadd.f32 %v5126_v1, %v1552_v9  ;;  %v1556_v51 = vrot.slane %v1486_v4, %v4667_v12  ;;  %v1502_v61 = vcombine.high %v1486_v4, %v1486_v4 }
 0x6aa   :  { %1773 = vrot.lane.b32.xlu1 %v1699_v18, %s4601_s24  ;;  %v1710_v6 = vsel %vm1646_vm10, %v1614_v46, %v1678_v14  ;;  %v1709_v25 = vsel %vm1645_vm11, %v1613_v39, %v1677_v15  ;;  %v1560_v32 = vrot.slane %v1500_v55, %v4667_v12  ;;  %v1504_v31 = vcombine.high %v1500_v55, %v1500_v55 }
 0x6ab   :  { %v1680_v17 = vmul.f32 0.2, %v1616_v57  ;;  %v1618_v23 = vadd.f32 %v5124_v53, %v1556_v51  ;;  %vm1648_vm12 = vcmp.ge.f32.partialorder %v1616_v57, 0.0  ;;  %v1679_v7 = vmul.f32 0.2, %v1615_v2 }
 0x6ac   :  { %v1617_v50 = vadd.f32 %v5126_v1, %v1556_v51  ;;  %vm1647_vm13 = vcmp.ge.f32.partialorder %v1615_v2, 0.0  ;;  %v1620_v28 = vadd.f32 %v5124_v53, %v1560_v32  ;;  %v1619_v8 = vadd.f32 %v5126_v1, %v1560_v32 }
 0x6ad   :  { %1779 = vrot.lane.b32.xlu0 %v1702_v34, %s4601_s24  ;;  %v1712_v60 = vsel %vm1648_vm12, %v1616_v57, %v1680_v17  ;;  %v1682_v27 = vmul.f32 0.2, %v1618_v23  ;;  %v1711_v18 = vsel %vm1647_vm13, %v1615_v2, %v1679_v7  ;;  %vm1650_vm14 = vcmp.ge.f32.partialorder %v1618_v23, 0.0 }
 0x6ae   :  { %1777 = vrot.lane.b32.xlu1 %v1701_v21, %s4601_s24  ;;  %v1681_v24 = vmul.f32 0.2, %v1617_v50  ;;  %vm1649_vm15 = vcmp.ge.f32.partialorder %v1617_v50, 0.0  ;;  %v1564_v11 = vrot.slane %v1502_v61, %v4667_v12  ;;  %v1684_v36 = vmul.f32 0.2, %v1620_v28 }
 0x6af   :  { %v1714_v34 = vsel %vm1650_vm14, %v1618_v23, %v1682_v27  ;;  %vm1652_vm1 = vcmp.ge.f32.partialorder %v1620_v28, 0.0  ;;  %v1683_v30 = vmul.f32 0.2, %v1619_v8  ;;  %vm1651_vm2 = vcmp.ge.f32.partialorder %v1619_v8, 0.0 }
 0x6b0   :  { %v1622_v16 = vadd.f32 %v5124_v53, %v1564_v11  ;;  %v1713_v21 = vsel %vm1649_vm15, %v1617_v50, %v1681_v24  ;;  %v1621_v5 = vadd.f32 %v5126_v1, %v1564_v11  ;;  %v1568_v63 = vrot.slane %v1504_v31, %v4667_v12 }
 0x6b1   :  { %1783 = vrot.lane.b32.xlu0 %v1704_v20, %s4601_s24  ;;  %v1716_v37 = vsel %vm1652_vm1, %v1620_v28, %v1684_v36  ;;  %v1715_v44 = vsel %vm1651_vm2, %v1619_v8, %v1683_v30  ;;  %vm4604_vm8 = vmmov 0   ;;  %vm2546_vm10 = vcmask 130048  }
 0x6b2   :  { %1781 = vrot.lane.b32.xlu1 %v1703_v48, %s4601_s24  ;;  %v1686_v40 = vmul.f32 0.2, %v1622_v16  ;;  %v1624_v20 = vadd.f32 %v5124_v53, %v1568_v63  ;;  %vm1654_vm4 = vcmp.ge.f32.partialorder %v1622_v16, 0.0  ;;  %v1685_v47 = vmul.f32 0.2, %v1621_v5 }
 0x6b3   :  { %v1623_v48 = vadd.f32 %v5126_v1, %v1568_v63  ;;  %vm1653_vm5 = vcmp.ge.f32.partialorder %v1621_v5, 0.0  ;;  %vm2868_vm11 = vcmask 785408   ;;  %vm2942_vm12 = vcmask 257024  }
 0x6b4   :  { %v1718_v29 = vsel %vm1654_vm4, %v1622_v16, %v1686_v40  ;;  %v1688_v33 = vmul.f32 0.2, %v1624_v20  ;;  %v1717_v49 = vsel %vm1653_vm5, %v1621_v5, %v1685_v47  ;;  %vm1656_vm6 = vcmp.ge.f32.partialorder %v1624_v20, 0.0 }
 0x6b5   :  { %1787 = vrot.lane.b32.xlu0 %v1706_v22, %s4601_s24  ;;  %v1687_v52 = vmul.f32 0.2, %v1623_v48  ;;  %vm1655_vm7 = vcmp.ge.f32.partialorder %v1623_v48, 0.0 }
 0x6b6   :  { %1785 = vrot.lane.b32.xlu1 %v1705_v62, %s4601_s24  ;;  %v1720_v53 = vsel %vm1656_vm6, %v1624_v20, %v1688_v33 }
 0x6b7   :  { %v1719_v26 = vsel %vm1655_vm7, %v1623_v48, %v1687_v52 }
 0x6b9   :  { %1791 = vrot.lane.b32.xlu0 %v1708_v13, %s4601_s24 }
 0x6ba   :  { %1789 = vrot.lane.b32.xlu1 %v1707_v54, %s4601_s24 }
 0x6bd   :  { %1795 = vrot.lane.b32.xlu0 %v1710_v6, %s4601_s24 }
 0x6be   :  { %1793 = vrot.lane.b32.xlu1 %v1709_v25, %s4601_s24 }
 0x6c1   :  { %1799 = vrot.lane.b32.xlu0 %v1712_v60, %s4601_s24 }
 0x6c2   :  { %1797 = vrot.lane.b32.xlu1 %v1711_v18, %s4601_s24 }
 0x6c5   :  { %1803 = vrot.lane.b32.xlu0 %v1714_v34, %s4601_s24 }
 0x6c6   :  { %1801 = vrot.lane.b32.xlu1 %v1713_v21, %s4601_s24 }
 0x6c9   :  { %1807 = vrot.lane.b32.xlu0 %v1716_v37, %s4601_s24 }
 0x6ca   :  { %1805 = vrot.lane.b32.xlu1 %v1715_v44, %s4601_s24 }
 0x6cd   :  { %1811 = vrot.lane.b32.xlu0 %v1718_v29, %s4601_s24 }
 0x6ce   :  { %1809 = vrot.lane.b32.xlu1 %v1717_v49, %s4601_s24 }
 0x6d1   :  { %1815 = vrot.lane.b32.xlu0 %v1720_v53, %s4601_s24 }
 0x6d2   :  { %1813 = vrot.lane.b32.xlu1 %v1719_v26, %s4601_s24 }
 0x707   :  { %v1756_v1 = vpop.permute.xlu0 %1755 }
 0x708   :  { %v1754_v22 = vpop.permute.xlu1 %1753 }
 0x709   :  { %3895 = vmatprep.mubr.msk.f32.mxu0 %vm599_vm3, %v1754_v22 }
 0x70a   :  { %3896 = vmatmul.mubr.msk.f32.vlgmr.msra.gmra.mrb[8].mxu0 %vm599_vm3, %v1756_v1 }
 0x70b   :  { %v1760_v56 = vpop.permute.xlu0 %1759 }
 0x70c   :  { %v1758_v46 = vpop.permute.xlu1 %1757 }
 0x70d   :  { %3898 = vmatprep.mubr.msk.f32.mxu0 %vm599_vm3, %v1758_v46 }
 0x70e   :  { %3899 = vmatmul.mubr.msk.f32.gmra.mrb[10].mxu0 %vm599_vm3, %v1760_v56 }
 0x70f   :  { %v1764_v62 = vpop.permute.xlu0 %1763 }
 0x710   :  { %v1762_v0 = vpop.permute.xlu1 %1761 }
 0x711   :  { %3901 = vmatprep.mubr.msk.f32.mxu0 %vm599_vm3, %v1762_v0 }
 0x712   :  { %3902 = vmatmul.mubr.msk.f32.gmra.mrb[12].mxu0 %vm599_vm3, %v1764_v62 }
 0x713   :  { %v1768_v39 = vpop.permute.xlu0 %1767 }
 0x714   :  { %v1766_v35 = vpop.permute.xlu1 %1765 }
 0x715   :  { %3904 = vmatprep.mubr.msk.f32.mxu0 %vm599_vm3, %v1766_v35 }
 0x716   :  { %3905 = vmatmul.mubr.msk.f32.gmra.mrb[14].mxu0 %vm599_vm3, %v1768_v39 }
 0x717   :  { %v1772_v4 = vpop.permute.xlu0 %1771 }
 0x718   :  { %v1770_v9 = vpop.permute.xlu1 %1769 }
 0x719   :  { %3907 = vmatprep.mubr.msk.f32.mxu0 %vm599_vm3, %v1770_v9 }
 0x71a   :  { %3908 = vmatmul.mubr.msk.f32.gmra.mrb[16].mxu0 %vm599_vm3, %v1772_v4 }
 0x71b   :  { %v1776_v13 = vpop.permute.xlu0 %1775 }
 0x71c   :  { %v1774_v14 = vpop.permute.xlu1 %1773 }
 0x71d   :  { %3910 = vmatprep.mubr.msk.f32.mxu0 %vm599_vm3, %v1774_v14 }
 0x71e   :  { %3911 = vmatmul.mubr.msk.f32.gmra.mrb[18].mxu0 %vm599_vm3, %v1776_v13 }
 0x71f   :  { %v1780_v57 = vpop.permute.xlu0 %1779 }
 0x720   :  { %v1778_v54 = vpop.permute.xlu1 %1777 }
 0x721   :  { %3913 = vmatprep.mubr.msk.f32.mxu0 %vm599_vm3, %v1778_v54 }
 0x722   :  { %3914 = vmatmul.mubr.msk.f32.gmra.mrb[20].mxu0 %vm599_vm3, %v1780_v57 }
 0x723   :  { %v1784_v15 = vpop.permute.xlu0 %1783 }
 0x724   :  { %v1782_v2 = vpop.permute.xlu1 %1781 }
 0x725   :  { %3916 = vmatprep.mubr.msk.f32.mxu0 %vm599_vm3, %v1782_v2 }
 0x726   :  { %3917 = vmatmul.mubr.msk.f32.gmra.mrb[22].mxu0 %vm599_vm3, %v1784_v15 }
 0x727   :  { %v1788_v55 = vpop.permute.xlu0 %1787 }
 0x728   :  { %v1786_v51 = vpop.permute.xlu1 %1785 }
 0x729   :  { %3919 = vmatprep.mubr.msk.f32.mxu0 %vm599_vm3, %v1786_v51 }
 0x72a   :  { %3920 = vmatmul.mubr.msk.f32.gmra.mrb[24].mxu0 %vm599_vm3, %v1788_v55 }
 0x72b   :  { %v1792_v6 = vpop.permute.xlu0 %1791 }
 0x72c   :  { %v1790_v17 = vpop.permute.xlu1 %1789 }
 0x72d   :  { %3922 = vmatprep.mubr.msk.f32.mxu0 %vm599_vm3, %v1790_v17 }
 0x72e   :  { %3923 = vmatmul.mubr.msk.f32.gmra.mrb[26].mxu0 %vm599_vm3, %v1792_v6 }
 0x72f   :  { %v1796_v23 = vpop.permute.xlu0 %1795 }
 0x730   :  { %v1794_v25 = vpop.permute.xlu1 %1793 }
 0x731   :  { %3925 = vmatprep.mubr.msk.f32.mxu0 %vm599_vm3, %v1794_v25 }
 0x732   :  { %3926 = vmatmul.mubr.msk.f32.gmra.mrb[28].mxu0 %vm599_vm3, %v1796_v23 }
 0x733   :  { %v1800_v7 = vpop.permute.xlu0 %1799 }
 0x734   :  { %v1798_v50 = vpop.permute.xlu1 %1797 }
 0x735   :  { %3928 = vmatprep.mubr.msk.f32.mxu0 %vm599_vm3, %v1798_v50 }
 0x736   :  { %3929 = vmatmul.mubr.msk.f32.gmra.mrb[30].mxu0 %vm599_vm3, %v1800_v7 }
 0x737   :  { %v1804_v61 = vpop.permute.xlu0 %1803 }
 0x738   :  { %v1802_v32 = vpop.permute.xlu1 %1801 }
 0x739   :  { %3931 = vmatprep.mubr.msk.f32.mxu0 %vm599_vm3, %v1802_v32 }
 0x73a   :  { %3932 = vmatmul.mubr.msk.f32.gmra.mrb[32].mxu0 %vm599_vm3, %v1804_v61 }
 0x73b   :  { %v1808_v60 = vpop.permute.xlu0 %1807 }
 0x73c   :  { %v1806_v27 = vpop.permute.xlu1 %1805 }
 0x73d   :  { %3934 = vmatprep.mubr.msk.f32.mxu0 %vm599_vm3, %v1806_v27 }
 0x73e   :  { %3935 = vmatmul.mubr.msk.f32.gmra.mrb[34].mxu0 %vm599_vm3, %v1808_v60 }
 0x73f   :  { %v1812_v28 = vpop.permute.xlu0 %1811 }
 0x740   :  { %v1810_v18 = vpop.permute.xlu1 %1809 }
 0x741   :  { %3937 = vmatprep.mubr.msk.f32.mxu0 %vm599_vm3, %v1810_v18 }
 0x742   :  { %3938 = vmatmul.mubr.msk.f32.gmra.mrb[36].mxu0 %vm599_vm3, %v1812_v28 }
 0x743   :  { %v1816_v8 = vpop.permute.xlu0 %1815 }
 0x744   :  { %v1814_v24 = vpop.permute.xlu1 %1813 }
 0x745   :  { %3940 = vmatprep.mubr.msk.f32.mxu0 %vm599_vm3, %v1814_v24 }
 0x746   :  { %3941 = vmatmul.mubr.msk.f32.gmra.mrb[38].mxu0 %vm599_vm3, %v1816_v8 }
 0x7dd   :  { %v3897_v11 = vpop.f32.mrb[8].mxu0 }
 0x7de   :  { %v3535_v31 = vclamps-f32 %v3897_v11, 30.0  ;;  %v1947_v34 = vpop.f32.mrb[9].mxu0 }
 0x7df   :  { %v3534_v36 = vclamps-f32 %v1947_v34, 30.0 }
 0x7e0   :  { %v2172_v16 = vmul.f32 1.442695, %v3535_v31 }
 0x7e1   :  { %v2170_v21 = vmul.f32 1.442695, %v3534_v36  ;;  %v3900_v30 = vpop.f32.mrb[10].mxu0 }
 0x7e2   :  { %4488 = vpow2.f32 %v2172_v16  ;;  %v3537_v5 = vclamps-f32 %v3900_v30, 30.0  ;;  %v1957_v63 = vpop.f32.mrb[11].mxu0 }
 0x7e3   :  { %4490 = vpow2.f32 %v2170_v21  ;;  %v3536_v37 = vclamps-f32 %v1957_v63, 30.0 }
 0x7e4   :  { %v2176_v40 = vmul.f32 1.442695, %v3537_v5 }
 0x7e5   :  { %v2174_v20 = vmul.f32 1.442695, %v3536_v37  ;;  %v3903_v44 = vpop.f32.mrb[12].mxu0 }
 0x7e6   :  { %4492 = vpow2.f32 %v2176_v40  ;;  %v3539_v47 = vclamps-f32 %v3903_v44, 30.0  ;;  %v1967_v48 = vpop.f32.mrb[13].mxu0 }
 0x7e7   :  { %4494 = vpow2.f32 %v2174_v20  ;;  %v3538_v29 = vclamps-f32 %v1967_v48, 30.0 }
 0x7e8   :  { %v2180_v33 = vmul.f32 1.442695, %v3539_v47 }
 0x7e9   :  { %v2178_v49 = vmul.f32 1.442695, %v3538_v29  ;;  %v3906_v52 = vpop.f32.mrb[14].mxu0 }
 0x7ea   :  { %4496 = vpow2.f32 %v2180_v33  ;;  %v3541_v53 = vclamps-f32 %v3906_v52, 30.0  ;;  %v1977_v26 = vpop.f32.mrb[15].mxu0 }
 0x7eb   :  { %4498 = vpow2.f32 %v2178_v49  ;;  %v3540_v1 = vclamps-f32 %v1977_v26, 30.0 }
 0x7ec   :  { %v5253_v22 = vpop.eup %4488  ;;  %v2184_v56 = vmul.f32 1.442695, %v3541_v53 }
 0x7ed   :  { %v5255_v46 = vpop.eup %4490  ;;  %v2182_v62 = vmul.f32 1.442695, %v3540_v1  ;;  %v3909_v0 = vpop.f32.mrb[16].mxu0  ;;  %v2235_v39 = vmul.f32 %v5253_v22, %v5098_v38 }
 0x7ee   :  { %4500 = vpow2.f32 %v2184_v56  ;;  %v3543_v35 = vclamps-f32 %v3909_v0, 30.0  ;;  %v1987_v4 = vpop.f32.mrb[17].mxu0  ;;  %v2234_v9 = vmul.f32 %v5255_v46, %v5102_v45 }
 0x7ef   :  { %4502 = vpow2.f32 %v2182_v62  ;;  %v3542_v13 = vclamps-f32 %v1987_v4, 30.0 }
 0x7f0   :  { %v5261_v14 = vpop.eup %4492  ;;  %v2188_v57 = vmul.f32 1.442695, %v3543_v35  ;;  %v4334_v54 = vpack.i.bf16 %v2235_v39, %v2234_v9 }
 0x7f1   :  { %v5263_v15 = vpop.eup %4494  ;;  %v2186_v2 = vmul.f32 1.442695, %v3542_v13  ;;  %v3912_v55 = vpop.f32.mrb[18].mxu0  ;;  %v2237_v51 = vmul.f32 %v5261_v14, %v5098_v38 }
 0x7f2   :  { %4504 = vpow2.f32 %v2188_v57  ;;  %v3545_v6 = vclamps-f32 %v3912_v55, 30.0  ;;  %4335 = vrot.lane.b32.xlu0 %v4334_v54, %s4599_s13  ;;  %v1997_v17 = vpop.f32.mrb[19].mxu0  ;;  %v2236_v23 = vmul.f32 %v5263_v15, %v5102_v45 }
 0x7f3   :  { %4506 = vpow2.f32 %v2186_v2  ;;  %v3544_v25 = vclamps-f32 %v1997_v17, 30.0 }
 0x7f4   :  { %v5270_v7 = vpop.eup %4496  ;;  %v2192_v50 = vmul.f32 1.442695, %v3545_v6  ;;  %v4339_v61 = vpack.i.bf16 %v2237_v51, %v2236_v23 }
 0x7f5   :  { %v5272_v32 = vpop.eup %4498  ;;  %v2190_v60 = vmul.f32 1.442695, %v3544_v25  ;;  %v3915_v27 = vpop.f32.mrb[20].mxu0  ;;  %v2239_v28 = vmul.f32 %v5270_v7, %v5098_v38 }
 0x7f6   :  { %4508 = vpow2.f32 %v2192_v50  ;;  %v3547_v18 = vclamps-f32 %v3915_v27, 30.0  ;;  %4340 = vrot.lane.b32.xlu0 %v4339_v61, %s4599_s13  ;;  %v2007_v24 = vpop.f32.mrb[21].mxu0  ;;  %v2238_v8 = vmul.f32 %v5272_v32, %v5102_v45 }
 0x7f7   :  { %4510 = vpow2.f32 %v2190_v60  ;;  %v3546_v11 = vclamps-f32 %v2007_v24, 30.0 }
 0x7f8   :  { %v5279_v31 = vpop.eup %4500  ;;  %v2196_v34 = vmul.f32 1.442695, %v3547_v18  ;;  %v4344_v36 = vpack.i.bf16 %v2239_v28, %v2238_v8 }
 0x7f9   :  { %v5281_v16 = vpop.eup %4502  ;;  %v2194_v21 = vmul.f32 1.442695, %v3546_v11  ;;  %v3918_v30 = vpop.f32.mrb[22].mxu0  ;;  %v2241_v5 = vmul.f32 %v5279_v31, %v5098_v38 }
 0x7fa   :  { %4512 = vpow2.f32 %v2196_v34  ;;  %v3549_v63 = vclamps-f32 %v3918_v30, 30.0  ;;  %4345 = vrot.lane.b32.xlu0 %v4344_v36, %s4599_s13  ;;  %v2017_v37 = vpop.f32.mrb[23].mxu0  ;;  %v2240_v40 = vmul.f32 %v5281_v16, %v5102_v45 }
 0x7fb   :  { %4514 = vpow2.f32 %v2194_v21  ;;  %v3548_v20 = vclamps-f32 %v2017_v37, 30.0 }
 0x7fc   :  { %v5288_v44 = vpop.eup %4504  ;;  %v2200_v47 = vmul.f32 1.442695, %v3549_v63  ;;  %v4349_v48 = vpack.i.bf16 %v2241_v5, %v2240_v40 }
 0x7fd   :  { %v5290_v29 = vpop.eup %4506  ;;  %v2198_v33 = vmul.f32 1.442695, %v3548_v20  ;;  %v3921_v49 = vpop.f32.mrb[24].mxu0  ;;  %v2243_v52 = vmul.f32 %v5288_v44, %v5098_v38 }
 0x7fe   :  { %4516 = vpow2.f32 %v2200_v47  ;;  %v3551_v53 = vclamps-f32 %v3921_v49, 30.0  ;;  %4350 = vrot.lane.b32.xlu0 %v4349_v48, %s4599_s13  ;;  %v2027_v26 = vpop.f32.mrb[25].mxu0  ;;  %v2242_v1 = vmul.f32 %v5290_v29, %v5102_v45 }
 0x7ff   :  { %4518 = vpow2.f32 %v2198_v33  ;;  %v3550_v56 = vclamps-f32 %v2027_v26, 30.0 }
 0x800   :  { %v5297_v62 = vpop.eup %4508  ;;  %v2204_v0 = vmul.f32 1.442695, %v3551_v53  ;;  %v4354_v39 = vpack.i.bf16 %v2243_v52, %v2242_v1 }
 0x801   :  { %v5299_v35 = vpop.eup %4510  ;;  %v2202_v4 = vmul.f32 1.442695, %v3550_v56  ;;  %v3924_v9 = vpop.f32.mrb[26].mxu0  ;;  %v2245_v13 = vmul.f32 %v5297_v62, %v5098_v38 }
 0x802   :  { %4520 = vpow2.f32 %v2204_v0  ;;  %v3553_v57 = vclamps-f32 %v3924_v9, 30.0  ;;  %4355 = vrot.lane.b32.xlu0 %v4354_v39, %s4599_s13  ;;  %v2037_v54 = vpop.f32.mrb[27].mxu0  ;;  %v2244_v2 = vmul.f32 %v5299_v35, %v5102_v45 }
 0x803   :  { %4522 = vpow2.f32 %v2202_v4  ;;  %v3552_v55 = vclamps-f32 %v2037_v54, 30.0 }
 0x804   :  { %v5306_v51 = vpop.eup %4512  ;;  %v2208_v6 = vmul.f32 1.442695, %v3553_v57  ;;  %v4359_v17 = vpack.i.bf16 %v2245_v13, %v2244_v2 }
 0x805   :  { %v5308_v23 = vpop.eup %4514  ;;  %v2206_v25 = vmul.f32 1.442695, %v3552_v55  ;;  %v3927_v50 = vpop.f32.mrb[28].mxu0  ;;  %v2247_v61 = vmul.f32 %v5306_v51, %v5098_v38 }
 0x806   :  { %4524 = vpow2.f32 %v2208_v6  ;;  %v3555_v60 = vclamps-f32 %v3927_v50, 30.0  ;;  %4360 = vrot.lane.b32.xlu0 %v4359_v17, %s4599_s13  ;;  %v2047_v27 = vpop.f32.mrb[29].mxu0  ;;  %v2246_v28 = vmul.f32 %v5308_v23, %v5102_v45 }
 0x807   :  { %4526 = vpow2.f32 %v2206_v25  ;;  %v3554_v18 = vclamps-f32 %v2047_v27, 30.0 }
 0x808   :  { %v5315_v24 = vpop.eup %4516  ;;  %v2212_v8 = vmul.f32 1.442695, %v3555_v60  ;;  %v4364_v11 = vpack.i.bf16 %v2247_v61, %v2246_v28 }
 0x809   :  { %v5317_v34 = vpop.eup %4518  ;;  %v2210_v36 = vmul.f32 1.442695, %v3554_v18  ;;  %v3930_v21 = vpop.f32.mrb[30].mxu0  ;;  %v2249_v30 = vmul.f32 %v5315_v24, %v5098_v38 }
 0x80a   :  { %4528 = vpow2.f32 %v2212_v8  ;;  %v3557_v5 = vclamps-f32 %v3930_v21, 30.0  ;;  %4365 = vrot.lane.b32.xlu0 %v4364_v11, %s4599_s13  ;;  %v2057_v63 = vpop.f32.mrb[31].mxu0  ;;  %v2248_v37 = vmul.f32 %v5317_v34, %v5102_v45 }
 0x80b   :  { %4530 = vpow2.f32 %v2210_v36  ;;  %v3556_v40 = vclamps-f32 %v2057_v63, 30.0 }
 0x80c   :  { %v5324_v20 = vpop.eup %4520  ;;  %v2216_v47 = vmul.f32 1.442695, %v3557_v5  ;;  %v4409_v48 = vpack.i.bf16 %v2249_v30, %v2248_v37 }
 0x80d   :  { %v5326_v33 = vpop.eup %4522  ;;  %v2214_v49 = vmul.f32 1.442695, %v3556_v40  ;;  %v3933_v52 = vpop.f32.mrb[32].mxu0  ;;  %v2251_v53 = vmul.f32 %v5324_v20, %v5098_v38 }
 0x80e   :  { %4532 = vpow2.f32 %v2216_v47  ;;  %v3559_v26 = vclamps-f32 %v3933_v52, 30.0  ;;  %4410 = vrot.lane.b32.xlu0 %v4409_v48, %s4599_s13  ;;  %v2067_v1 = vpop.f32.mrb[33].mxu0  ;;  %v2250_v56 = vmul.f32 %v5326_v33, %v5102_v45 }
 0x80f   :  { %4534 = vpow2.f32 %v2214_v49  ;;  %v3558_v0 = vclamps-f32 %v2067_v1, 30.0 }
 0x810   :  { %v5333_v39 = vpop.eup %4524  ;;  %v2220_v4 = vmul.f32 1.442695, %v3559_v26  ;;  %v4369_v9 = vpack.i.bf16 %v2251_v53, %v2250_v56 }
 0x811   :  { %v5335_v13 = vpop.eup %4526  ;;  %v2218_v57 = vmul.f32 1.442695, %v3558_v0  ;;  %v3936_v54 = vpop.f32.mrb[34].mxu0  ;;  %v2253_v2 = vmul.f32 %v5333_v39, %v5098_v38 }
 0x812   :  { %4536 = vpow2.f32 %v2220_v4  ;;  %v3561_v55 = vclamps-f32 %v3936_v54, 30.0  ;;  %4370 = vrot.lane.b32.xlu1 %v4369_v9, %s4599_s13  ;;  %v2077_v6 = vpop.f32.mrb[35].mxu0  ;;  %v2252_v17 = vmul.f32 %v5335_v13, %v5102_v45 }
 0x813   :  { %4538 = vpow2.f32 %v2218_v57  ;;  %v3560_v25 = vclamps-f32 %v2077_v6, 30.0 }
 0x814   :  { %v5342_v50 = vpop.eup %4528  ;;  %v2224_v61 = vmul.f32 1.442695, %v3561_v55  ;;  %v4374_v60 = vpack.i.bf16 %v2253_v2, %v2252_v17 }
 0x815   :  { %v5344_v27 = vpop.eup %4530  ;;  %v2222_v28 = vmul.f32 1.442695, %v3560_v25  ;;  %v3939_v18 = vpop.f32.mrb[36].mxu0  ;;  %v2255_v8 = vmul.f32 %v5342_v50, %v5098_v38 }
 0x816   :  { %4540 = vpow2.f32 %v2224_v61  ;;  %v3563_v11 = vclamps-f32 %v3939_v18, 30.0  ;;  %4375 = vrot.lane.b32.xlu1 %v4374_v60, %s4599_s13  ;;  %v2087_v36 = vpop.f32.mrb[37].mxu0  ;;  %v2254_v21 = vmul.f32 %v5344_v27, %v5102_v45 }
 0x817   :  { %4542 = vpow2.f32 %v2222_v28  ;;  %v3562_v30 = vclamps-f32 %v2087_v36, 30.0 }
 0x818   :  { %v5351_v5 = vpop.eup %4532  ;;  %v2228_v63 = vmul.f32 1.442695, %v3563_v11  ;;  %v4379_v37 = vpack.i.bf16 %v2255_v8, %v2254_v21 }
 0x819   :  { %v5353_v40 = vpop.eup %4534  ;;  %v2226_v47 = vmul.f32 1.442695, %v3562_v30  ;;  %v3942_v48 = vpop.f32.mrb[38].mxu0  ;;  %v2257_v49 = vmul.f32 %v5351_v5, %v5098_v38 }
 0x81a   :  { %4544 = vpow2.f32 %v2228_v63  ;;  %v3565_v52 = vclamps-f32 %v3942_v48, 30.0  ;;  %4380 = vrot.lane.b32.xlu1 %v4379_v37, %s4599_s13  ;;  %v2097_v53 = vpop.f32.mrb[39].mxu0  ;;  %v2256_v26 = vmul.f32 %v5353_v40, %v5102_v45 }
 0x81b   :  { %4546 = vpow2.f32 %v2226_v47  ;;  %v3564_v1 = vclamps-f32 %v2097_v53, 30.0 }
 0x81c   :  { %v5360_v56 = vpop.eup %4536  ;;  %v2232_v0 = vmul.f32 1.442695, %v3565_v52  ;;  %v4384_v4 = vpack.i.bf16 %v2257_v49, %v2256_v26 }
 0x81d   :  { %v5362_v9 = vpop.eup %4538  ;;  %v2230_v57 = vmul.f32 1.442695, %v3564_v1  ;;  %v2259_v54 = vmul.f32 %v5360_v56, %v5098_v38 }
 0x81e   :  { %4548 = vpow2.f32 %v2232_v0  ;;  %4385 = vrot.lane.b32.xlu1 %v4384_v4, %s4599_s13  ;;  %v2258_v2 = vmul.f32 %v5362_v9, %v5102_v45 }
 0x81f   :  { %4550 = vpow2.f32 %v2230_v57 }
 0x820   :  { %v5369_v55 = vpop.eup %4540  ;;  %v4389_v6 = vpack.i.bf16 %v2259_v54, %v2258_v2 }
 0x821   :  { %v5371_v17 = vpop.eup %4542  ;;  %v2261_v25 = vmul.f32 %v5369_v55, %v5098_v38 }
 0x822   :  { %4390 = vrot.lane.b32.xlu1 %v4389_v6, %s4599_s13  ;;  %v2260_v61 = vmul.f32 %v5371_v17, %v5102_v45 }
 0x824   :  { %v5378_v60 = vpop.eup %4544  ;;  %v4394_v28 = vpack.i.bf16 %v2261_v25, %v2260_v61 }
 0x825   :  { %v5380_v18 = vpop.eup %4546  ;;  %v2263_v8 = vmul.f32 %v5378_v60, %v5098_v38 }
 0x826   :  { %4395 = vrot.lane.b32.xlu1 %v4394_v28, %s4599_s13  ;;  %v2262_v11 = vmul.f32 %v5380_v18, %v5102_v45 }
 0x828   :  { %v5387_v36 = vpop.eup %4548  ;;  %v4399_v21 = vpack.i.bf16 %v2263_v8, %v2262_v11 }
 0x829   :  { %v5389_v30 = vpop.eup %4550  ;;  %v2265_v63 = vmul.f32 %v5387_v36, %v5098_v38 }
 0x82a   :  { %4400 = vrot.lane.b32.xlu1 %v4399_v21, %s4599_s13  ;;  %v2264_v37 = vmul.f32 %v5389_v30, %v5102_v45 }
 0x82c   :  { %v4404_v47 = vpack.i.bf16 %v2265_v63, %v2264_v37 }
 0x82e   :  { %4405 = vrot.lane.b32.xlu1 %v4404_v47, %s4599_s13 }
 0x864   :  { %v4336_v48 = vpop.permute.xlu0 %4335 }
 0x865   :  { %v4338_v53 = vunpack.i.h.bf16 %v4336_v48  ;;  %v4337_v26 = vunpack.i.l.bf16 %v4336_v48 }
 0x867   :  { %v2395_v38 = vsel %vm599_vm3, %v5253_v22, %v4338_v53  ;;  %v2394_v54 = vsel %vm599_vm3, %v5255_v46, %v4337_v26 }
 0x868   :  { %v4341_v49 = vpop.permute.xlu0 %4340  ;;  %v4143_v8 = vpack.c.bf16 %v2395_v38, %v2394_v54 }
 0x869   :  { %v4343_v2 = vunpack.i.h.bf16 %v4341_v49  ;;  %v4342_v45 = vunpack.i.l.bf16 %v4341_v49 }
 0x86b   :  { %v2397_v22 = vsel %vm599_vm3, %v5261_v14, %v4343_v2  ;;  %v2396_v46 = vsel %vm599_vm3, %v5263_v15, %v4342_v45 }
 0x86c   :  { %v4346_v52 = vpop.permute.xlu0 %4345  ;;  %v4147_v53 = vpack.c.bf16 %v2397_v22, %v2396_v46 }
 0x86d   :  { %v4348_v37 = vunpack.i.h.bf16 %v4346_v52  ;;  %v4347_v47 = vunpack.i.l.bf16 %v4346_v52 }
 0x86f   :  { %v2399_v14 = vsel %vm599_vm3, %v5270_v7, %v4348_v37  ;;  %v2398_v15 = vsel %vm599_vm3, %v5272_v32, %v4347_v47 }
 0x870   :  { %v4351_v1 = vpop.permute.xlu0 %4350  ;;  %v4151_v2 = vpack.c.bf16 %v2399_v14, %v2398_v15 }
 0x871   :  { %v4353_v52 = vunpack.i.h.bf16 %v4351_v1 }
 0x873   :  { %v2401_v7 = vsel %vm599_vm3, %v5279_v31, %v4353_v52 }
 0x874   :  { %v4356_v11 = vpop.permute.xlu0 %4355 }
 0x884   :  { %v4371_v0 = vpop.permute.xlu1 %4370 }
 0x885   :  { %v4373_v4 = vunpack.i.h.bf16 %v4371_v0  ;;  %v4372_v57 = vunpack.i.l.bf16 %v4371_v0 }
 0x887   :  { %v2410_v6 = vsel %vm599_vm3, %v5326_v33, %v4372_v57  ;;  %v2411_v25 = vsel %vm599_vm3, %v5324_v20, %v4373_v4  ;;  %v4352_v4 = vunpack.i.l.bf16 %v4351_v1  ;;  %v4361_v57 = vpop.permute.xlu0 %4360  ;;  %v4358_v1 = vunpack.i.h.bf16 %v4356_v11 }
 0x888   :  { %v4376_v61 = vpop.permute.xlu1 %4375  ;;  %v4141_v28 = vpack.c.bf16 %v2411_v25, %v2410_v6  ;;  %v4357_v25 = vunpack.i.l.bf16 %v4356_v11  ;;  %v4363_v11 = vunpack.i.h.bf16 %v4361_v57  ;;  %v4362_v46 = vunpack.i.l.bf16 %v4361_v57 }
 0x889   :  { %v4378_v21 = vunpack.i.h.bf16 %v4376_v61  ;;  %v4377_v63 = vunpack.i.l.bf16 %v4376_v61  ;;  %v2400_v32 = vsel %vm599_vm3, %v5281_v16, %v4352_v4  ;;  %v2403_v31 = vsel %vm599_vm3, %v5288_v44, %v4358_v1 }
 0x88a   :  { %4142 = vmatprep.subr.bf16.mxu1 %v4141_v28  ;;  %v2402_v16 = vsel %vm599_vm3, %v5290_v29, %v4357_v25  ;;  %v2405_v44 = vsel %vm599_vm3, %v5297_v62, %v4363_v11  ;;  %v2404_v29 = vsel %vm599_vm3, %v5299_v35, %v4362_v46  ;;  %v2529_v11 = vld [vmem:[%s5757_s1] sm:$0xf] }
 0x88b   :  { %4144 = vmatpush3.bf16.msra.mxu1 %v4143_v8  ;;  %v2412_v33 = vsel %vm599_vm3, %v5335_v13, %v4377_v63  ;;  %v2413_v20 = vsel %vm599_vm3, %v5333_v39, %v4378_v21  ;;  %v4155_v8 = vpack.c.bf16 %v2401_v7, %v2400_v32  ;;  %v4366_v21 = vpop.permute.xlu0 %4365  ;;  %v4163_v15 = vpack.c.bf16 %v2405_v44, %v2404_v29  ;;  %v4571_v32 = vld [vmem:[%s5758_s2] sm:$0xff] }
 0x88c   :  { %v4381_v48 = vpop.permute.xlu1 %4380  ;;  %v4145_v49 = vpack.c.bf16 %v2413_v20, %v2412_v33  ;;  %v4159_v33 = vpack.c.bf16 %v2403_v31, %v2402_v16  ;;  %v4602_v31 = vmov 0   ;;  %v4605_v29 = vmov 0.0  }
 0x88d   :  { %v4383_v26 = vunpack.i.h.bf16 %v4381_v48  ;;  %v4382_v0 = vunpack.i.l.bf16 %v4381_v48  ;;  %4414 = vset.pattern.permute.xlu0 %v4602_v31  ;;  %4014 = vmatprep.mubr.msk.f32.mxu0 %vm4604_vm8, %v4605_v29 }
 0x88e   :  { %4146 = vmatprep.subr.bf16.mxu1 %v4145_v49  ;;  %v4368_v49 = vunpack.i.h.bf16 %v4366_v21 }
 0x88f   :  { %4148 = vmatpush3.bf16.msra.mxu1 %v4147_v53  ;;  %v2414_v13 = vsel %vm599_vm3, %v5344_v27, %v4382_v0  ;;  %v2415_v39 = vsel %vm599_vm3, %v5342_v50, %v4383_v26  ;;  %v4367_v53 = vunpack.i.l.bf16 %v4366_v21  ;;  %v4411_v26 = vpop.permute.xlu0 %4410 }
 0x890   :  { %v4386_v38 = vpop.permute.xlu1 %4385  ;;  %v4149_v54 = vpack.c.bf16 %v2415_v39, %v2414_v13  ;;  %v2407_v62 = vsel %vm599_vm3, %v5306_v51, %v4368_v49  ;;  %v4413_v57 = vunpack.i.h.bf16 %v4411_v26  ;;  %v4412_v13 = vunpack.i.l.bf16 %v4411_v26 }
 0x891   :  { %v4388_v45 = vunpack.i.h.bf16 %v4386_v38  ;;  %v4387_v6 = vunpack.i.l.bf16 %v4386_v38  ;;  %v2406_v35 = vsel %vm599_vm3, %v5308_v23, %v4367_v53 }
 0x892   :  { %4150 = vmatprep.subr.bf16.mxu1 %v4149_v54  ;;  %v4167_v54 = vpack.c.bf16 %v2407_v62, %v2406_v35  ;;  %v2409_v51 = vsel %vm599_vm3, %v5315_v24, %v4413_v57  ;;  %v2408_v23 = vsel %vm599_vm3, %v5317_v34, %v4412_v13  ;;  %v4572_v24 = vld [vmem:[%s5758_s2 + $0x18] sm:$0xff]  ;;  %v4573_v34 = vld [vmem:[%s5758_s2 + $0x10] sm:$0xff]  ;;  %v51_v13 = vld [vmem:[%s5760_s4 + $0x60] sm:$0xff] }
 0x893   :  { %4152 = vmatpush3.bf16.msra.mxu1 %v4151_v2  ;;  %v2416_v27 = vsel %vm599_vm3, %v5353_v40, %v4387_v6  ;;  %v2417_v50 = vsel %vm599_vm3, %v5351_v5, %v4388_v45  ;;  %v4171_v7 = vpack.c.bf16 %v2409_v51, %v2408_v23  ;;  %v49_v62 = vld [vmem:[%s5760_s4 + $0x50] sm:$0xff]  ;;  %v50_v35 = vld [vmem:[%s5760_s4 + $0x58] sm:$0xff] }
 0x894   :  { %v4391_v61 = vpop.permute.xlu1 %4390  ;;  %v4153_v28 = vpack.c.bf16 %v2417_v50, %v2416_v27  ;;  %v4180_v57 = vpack.c.bf16 %v50_v35, %v49_v62  ;;  %v54_v51 = vld [vmem:[%s5760_s4 + $0x78] sm:$0xff] }
 0x895   :  { %v4393_v63 = vunpack.i.h.bf16 %v4391_v61  ;;  %v4392_v22 = vunpack.i.l.bf16 %v4391_v61 }
 0x896   :  { %4154 = vmatprep.subr.bf16.mxu1 %v4153_v28 }
 0x897   :  { %4156 = vmatpush3.bf16.msra.mxu1 %v4155_v8  ;;  %v2418_v40 = vsel %vm599_vm3, %v5362_v9, %v4392_v22  ;;  %v2419_v5 = vsel %vm599_vm3, %v5360_v56, %v4393_v63  ;;  %v2517_v8 = vsub.s32 3, %v4660_v10  ;;  %v5475_v63 = vld [vmem:[%s5760_s4 + $0x1b0] sm:$0xff] }
 0x898   :  { %v4396_v37 = vpop.permute.xlu1 %4395  ;;  %v4157_v47 = vpack.c.bf16 %v2419_v5, %v2418_v40 }
 0x899   :  { %v4398_v20 = vunpack.i.h.bf16 %v4396_v37  ;;  %v4397_v48 = vunpack.i.l.bf16 %v4396_v37  ;;  %v2518_v22 = vrot.slane %v5475_v63, %v2517_v8 }
 0x89a   :  { %4158 = vmatprep.subr.bf16.mxu1 %v4157_v47 }
 0x89b   :  { %4160 = vmatpush3.bf16.msra.mxu1 %v4159_v33  ;;  %v2420_v9 = vsel %vm599_vm3, %v5371_v17, %v4397_v48  ;;  %v2421_v56 = vsel %vm599_vm3, %v5369_v55, %v4398_v20  ;;  %v4603_v20 = vmov 0.0|0.0  }
 0x89c   :  { %v4401_v0 = vpop.permute.xlu1 %4400  ;;  %v4161_v14 = vpack.c.bf16 %v2421_v56, %v2420_v9  ;;  %4209 = vmatprep.subr.bf16.mxu0 %v4603_v20  ;;  %v5497_v56 = vand.u32 127, %v177_v3 }
 0x89d   :  { %v4403_v52 = vunpack.i.h.bf16 %v4401_v0  ;;  %v4402_v4 = vunpack.i.l.bf16 %v4401_v0 }
 0x89e   :  { %4162 = vmatprep.subr.bf16.mxu1 %v4161_v14  ;;  %vm3051_vm13 = vcmp.lt.s32.totalorder %v5497_v56, 8 }
 0x89f   :  { %4164 = vmatpush3.bf16.msra.mxu1 %v4163_v15  ;;  %v2422_v17 = vsel %vm599_vm3, %v5380_v18, %v4402_v4  ;;  %v2423_v55 = vsel %vm599_vm3, %v5378_v60, %v4403_v52  ;;  %v47_v15 = vld [vmem:[%s5760_s4 + $0x40] sm:$0xff] }
 0x8a0   :  { %v4406_v39 = vpop.permute.xlu1 %4405  ;;  %v4165_v38 = vpack.c.bf16 %v2423_v55, %v2422_v17  ;;  %v4177_v3 = vpack.c.bf16 %v48_v58, %v47_v15  ;;  %v2620_v4 = vld [vmem:[%s5756_s0] sm:$0xf]  ;;  %v52_v17 = vld [vmem:[%s5760_s4 + $0x68] sm:$0xff] }
 0x8a1   :  { %v4408_v2 = vunpack.i.h.bf16 %v4406_v39  ;;  %v4407_v45 = vunpack.i.l.bf16 %v4406_v39  ;;  %v4183_v55 = vpack.c.bf16 %v52_v17, %v51_v13  ;;  %v2623_v39 = vsub.s32 4, %v4660_v10  ;;  %v69_v17 = vld [vmem:[%s5760_s4 + $0xf0] sm:$0xff] }
 0x8a2   :  { %4166 = vmatprep.subr.bf16.mxu1 %v4165_v38 }
 0x8a3   :  { %4168 = vmatpush3.bf16.msra.mxu1 %v4167_v54  ;;  %v2424_v6 = vsel %vm599_vm3, %v5389_v30, %v4407_v45  ;;  %v2425_v18 = vsel %vm599_vm3, %v5387_v36, %v4408_v2  ;;  %v2624_v2 = vrot.slane %v5475_v63, %v2623_v39  ;;  %v53_v45 = vld [vmem:[%s5760_s4 + $0x70] sm:$0xff] }
 0x8a4   :  { %v4169_v60 = vpack.c.bf16 %v2425_v18, %v2424_v6 }
 0x8a6   :  { %4170 = vmatprep.subr.bf16.mxu1 %v4169_v60  ;;  %v4186_v60 = vpack.c.bf16 %v54_v51, %v53_v45 }
 0x8a7   :  { %4172 = vmatpush3.bf16.msra.mxu1 %v4171_v7 }
 0x8a8   :  { %4173 = vmatprep.subr.bf16.mxu1 %v4603_v20 }
 0x8aa   :  { %2491 = vmatmul.mubr.f32.vlgmr.msra.gmra.mrb[32].mxu1 %v4571_v32  ;;  %v55_v32 = vld [vmem:[%s5760_s4 + $0x80] sm:$0xff] }
 0x8ab   :  { %2495 = vmatprep.mubr.f32.mxu1 %v4572_v24  ;;  %v56_v24 = vld [vmem:[%s5760_s4 + $0x88] sm:$0xff] }
 0x8ae   :  { %2496 = vmatmul.mubr.f32.gmra.mrb[34].mxu1 %v4573_v34  ;;  %v4189_v34 = vpack.c.bf16 %v56_v24, %v55_v32 }
 0x8af   :  { %3947 = vmatprep.mubr.msk.f32.mxu1 %vm4604_vm8, %v4605_v29 }
 0x97d   :  { %v3737_v36 = vpop.f32.mrb[32].mxu1 }
 0x97e   :  { %v3738_v30 = vpop.f32.mrb[33].mxu1 }
 0x97f   :  { %v3739_v1 = vadd.f32 %v3738_v30, %v3737_v36  ;;  %v2701_v36 = vsub.s32 5, %v4660_v10 }
 0x981   :  { %v2501_v25 = vmax.f32 %v3739_v1, 1e-30  ;;  %v3740_v27 = vpop.f32.mrb[34].mxu1  ;;  %v2702_v30 = vrot.slane %v5475_v63, %v2701_v36 }
 0x982   :  { %v3741_v50 = vpop.f32.mrb[35].mxu1 }
 0x983   :  { %4552 = vrcp.f32 %v2501_v25  ;;  %v3742_v61 = vadd.f32 %v3741_v50, %v3740_v27  ;;  %v57_v50 = vld [vmem:[%s5760_s4 + $0x90] sm:$0xff] }
 0x985   :  { %v2502_v28 = vmax.f32 %v3742_v61, 1e-30 }
 0x987   :  { %4554 = vrcp.f32 %v2502_v28  ;;  %v59_v28 = vld [vmem:[%s5760_s4 + $0xa0] sm:$0xff] }
 0x98d   :  { %v4553_v21 = vpop.eup %4552 }
 0x98e   :  { %2507 = vrot.lane.b32.xlu1 %v4553_v21, %s4599_s13 }
 0x991   :  { %v4555_v16 = vpop.eup %4554 }
 0x992   :  { %2509 = vrot.lane.b32.xlu0 %v4555_v16, %s4599_s13  ;;  %2520 = vrot.lane.b32.xlu1 %v2518_v22, %s4599_s13  ;;  %v60_v22 = vld [vmem:[%s5760_s4 + $0xa8] sm:$0xff]  ;;  %v61_v16 = vld [vmem:[%s5760_s4 + $0xb0] sm:$0xff] }
 0x993   :  { %v4195_v31 = vpack.c.bf16 %v60_v22, %v59_v28 }
 0x996   :  { %2533 = vperm.xlu0 %4414, %v2529_v11   ;;  %v62_v11 = vld [vmem:[%s5760_s4 + $0xb8] sm:$0xff] }
 0xa00   :  { %v2508_v46 = vpop.permute.xlu1 %2507 }
 0xa01   :  { %v2513_v40 = vmul.f32 %v3739_v1, %v2508_v46  ;;  %v4198_v46 = vpack.c.bf16 %v62_v11, %v61_v16 }
 0xa04   :  { %v2510_v5 = vpop.permute.xlu0 %2509  ;;  %v2521_v37 = vpop.permute.xlu1 %2520 }
 0xa05   :  { %v2514_v47 = vmul.f32 %v3742_v61, %v2510_v5  ;;  %v2523_v33 = vadd.f32 %v2521_v37, %v2513_v40  ;;  %v58_v61 = vld [vmem:[%s5760_s4 + $0x98] sm:$0xff]  ;;  %v63_v40 = vld [vmem:[%s5760_s4 + $0xc0] sm:$0xff]  ;;  %v64_v5 = vld [vmem:[%s5760_s4 + $0xc8] sm:$0xff] }
 0xa06   :  { %v4192_v21 = vpack.c.bf16 %v58_v61, %v57_v50 }
 0xa07   :  { %v2524_v48 = vadd.f32 %v2521_v37, %v2514_v47  ;;  %v2525_v44 = vadd.f32 %v2523_v33, %v1308_v41  ;;  %v4201_v37 = vpack.c.bf16 %v64_v5, %v63_v40  ;;  %v65_v47 = vld [vmem:[%s5760_s4 + $0xd0] sm:$0xff]  ;;  %v66_v33 = vld [vmem:[%s5760_s4 + $0xd8] sm:$0xff]  ;;  %v75_v40 = vld [vmem:[%s5760_s4 + $0x120] sm:$0xff] }
 0xa09   :  { %v2526_v49 = vadd.f32 %v2524_v48, %v1309_v43  ;;  %v2527_v53 = vmax.f32 %v2525_v44, 0.0  ;;  %v4204_v48 = vpack.c.bf16 %v66_v33, %v65_v47  ;;  %v67_v44 = vld [vmem:[%s5760_s4 + $0xe0] sm:$0xff]  ;;  %v77_v33 = vld [vmem:[%s5760_s4 + $0x130] sm:$0xff] }
 0xa0b   :  { %v2528_v26 = vmax.f32 %v2526_v49, 0.0  ;;  %v68_v49 = vld [vmem:[%s5760_s4 + $0xe8] sm:$0xff] }
 0xa0d   :  { %v4415_v9 = vpack.i.bf16 %v2528_v26, %v2527_v53  ;;  %v4207_v53 = vpack.c.bf16 %v68_v49, %v67_v44  ;;  %v2778_v26 = vsub.s32 6, %v4660_v10  ;;  %v79_v49 = vld [vmem:[%s5760_s4 + $0x140] sm:$0xff] }
 0xa0f   :  { %4416 = vrot.lane.b32.xlu1 %v4415_v9, %s4601_s24  ;;  %v2779_v9 = vrot.slane %v5475_v63, %v2778_v26 }
 0xa15   :  { %v2534_v59 = vpop.permute.xlu0 %2533 }
 0xa16   :  { %vm2535_vm9 = vcmp.eq.s32.totalorder %v5497_v56, %v2534_v59 }
 0xa17   :  { %v3566_v52 = vsel %vm2535_vm9, 1.0, %v4605_v29 }
 0xa81   :  { %v4417_v41 = vpop.permute.xlu1 %4416 }
 0xa82   :  { %v4419_v0 = vunpack.i.h.bf16 %v4417_v41  ;;  %v4418_v14 = vunpack.i.l.bf16 %v4417_v41 }
 0xa84   :  { %v4174_v43 = vpack.c.bf16 %v4419_v0, %v4418_v14 }
 0xa86   :  { %4175 = vmatpush3.bf16.msra.mxu1 %v4174_v43 }
 0xa87   :  { %4176 = vmatprep.subr.bf16.mxu1 %v4603_v20 }
 0xa89   :  { %3948 = vmatmul.mubr.msk.f32.vlgmr.msra.gmra.mrb[36].mxu1 %vm2546_vm10, %v3566_v52 }
 0xa8a   :  { %4178 = vmatpush3.bf16.msra.mxu1 %v4177_v3  ;;  %3954 = vmatprep.mubr.msk.f32.mxu1 %vm4604_vm8, %v4605_v29  ;;  %v2866_v3 = vsub.s32 7, %v4660_v10 }
 0xa8b   :  { %4179 = vmatprep.subr.bf16.mxu1 %v4603_v20 }
 0xa8d   :  { %3955 = vmatmul.mubr.msk.f32.vlgmr.msra.gmra.mrb[38].mxu1 %vm2546_vm10, %v2620_v4  ;;  %v2867_v4 = vrot.slane %v5475_v63, %v2866_v3 }
 0xa8e   :  { %3965 = vmatprep.mubr.msk.f32.mxu1 %vm4604_vm8, %v4605_v29  ;;  %4181 = vmatpush3.bf16.msra.mxu1 %v4180_v57 }
 0xa8f   :  { %4182 = vmatprep.subr.bf16.mxu1 %v4603_v20 }
 0xa92   :  { %4184 = vmatpush3.bf16.msra.mxu1 %v4183_v55  ;;  %v70_v55 = vld [vmem:[%s5760_s4 + $0xf8] sm:$0xff] }
 0xa93   :  { %4185 = vmatprep.subr.bf16.mxu1 %v4603_v20 }
 0xb5c   :  { %v5531_v38 = vpop.f32.mrb[36].mxu1 }
 0xb5d   :  { %v3949_v54 = vpop.f32.mrb[37].mxu1 }
 0xb60   :  { %v2694_v23 = vpop.f32.mrb[38].mxu1 }
 0xb61   :  { %v2695_v6 = vadd.f32 %v2694_v23, %v2624_v2  ;;  %v3956_v18 = vpop.f32.mrb[39].mxu1  ;;  %v71_v23 = vld [vmem:[%s5760_s4 + $0x100] sm:$0xff] }
 0xb63   :  { %v2698_v7 = vmax.f32 %v2695_v6, 0.0  ;;  %v72_v6 = vld [vmem:[%s5760_s4 + $0x108] sm:$0xff] }
 0xb64   :  { %v4213_v18 = vpack.c.bf16 %v72_v6, %v71_v23 }
 0xb65   :  { %3966 = vmatmul.mubr.msk.f32.vlgmr.msra.gmra.mrb[40].mxu1 %vm599_vm3, %v2698_v7 }
 0xb66   :  { %4187 = vmatpush3.bf16.msra.mxu1 %v4186_v60  ;;  %3976 = vmatprep.mubr.msk.f32.mxu1 %vm4604_vm8, %v4605_v29 }
 0xb67   :  { %4188 = vmatprep.subr.bf16.mxu1 %v4603_v20 }
 0xb6a   :  { %4190 = vmatpush3.bf16.msra.mxu1 %v4189_v34 }
 0xb6b   :  { %4191 = vmatprep.subr.bf16.mxu1 %v4603_v20 }
 0xc38   :  { %v2772_v1 = vpop.f32.mrb[40].mxu1 }
 0xc39   :  { %v5555_v25 = vadd.f32 %v2772_v1, %v2702_v30  ;;  %v3967_v27 = vpop.f32.mrb[41].mxu1  ;;  %v5636_v30 = vld [vmem:[%s5760_s4 + $0x1b8] sm:$0xff] }
 0xc3a   :  { %v2961_v1 = vrot.slane %v5636_v30, %v4667_v12  ;;  %v74_v12 = vld [vmem:[%s5760_s4 + $0x118] sm:$0xff] }
 0xc3b   :  { %3977 = vmatmul.mubr.msk.f32.vlgmr.msra.gmra.mrb[42].mxu1 %vm599_vm3, %v5555_v25 }
 0xc3c   :  { %4003 = vmatprep.mubr.msk.f32.mxu1 %vm4604_vm8, %v4605_v29  ;;  %4193 = vmatpush3.bf16.msra.mxu1 %v4192_v21 }
 0xc3d   :  { %4194 = vmatprep.subr.bf16.mxu1 %v4603_v20 }
 0xc40   :  { %4196 = vmatpush3.bf16.msra.mxu1 %v4195_v31 }
 0xc41   :  { %4197 = vmatprep.subr.bf16.mxu1 %v4603_v20 }
 0xc44   :  { %4199 = vmatpush3.bf16.msra.mxu1 %v4198_v46  ;;  %v73_v46 = vld [vmem:[%s5760_s4 + $0x110] sm:$0xff] }
 0xc45   :  { %4200 = vmatprep.subr.bf16.mxu1 %v4603_v20  ;;  %v4216_v5 = vpack.c.bf16 %v74_v12, %v73_v46  ;;  %v88_v12 = vld [vmem:[%s5760_s4 + $0x188] sm:$0xff] }
 0xc48   :  { %4202 = vmatpush3.bf16.msra.mxu1 %v4201_v37  ;;  %v76_v37 = vld [vmem:[%s5760_s4 + $0x128] sm:$0xff] }
 0xc49   :  { %4203 = vmatprep.subr.bf16.mxu1 %v4603_v20  ;;  %v4219_v47 = vpack.c.bf16 %v76_v37, %v75_v40 }
 0xc4c   :  { %4205 = vmatpush3.bf16.msra.mxu1 %v4204_v48  ;;  %v78_v48 = vld [vmem:[%s5760_s4 + $0x138] sm:$0xff] }
 0xc4d   :  { %4206 = vmatprep.subr.bf16.mxu1 %v4603_v20  ;;  %v4222_v44 = vpack.c.bf16 %v78_v48, %v77_v33 }
 0xc50   :  { %4208 = vmatpush3.bf16.msra.mxu1 %v4207_v53  ;;  %v80_v53 = vld [vmem:[%s5760_s4 + $0x148] sm:$0xff] }
 0xc51   :  { %4215 = vmatprep.subr.bf16.mxu1 %v4603_v20  ;;  %v4225_v26 = vpack.c.bf16 %v80_v53, %v79_v49  ;;  %v3246_v49 = vrot.slane %v5636_v30, %v2517_v8  ;;  %v3574_v53 = vsel %vm3051_vm13, 1.0, %v4605_v29  ;;  %v89_v8 = vld [vmem:[%s5760_s4 + $0x190] sm:$0xff] }
 0xd0e   :  { %v2849_v59 = vpop.f32.mrb[42].mxu1 }
 0xd0f   :  { %v2850_v41 = vadd.f32 %v2849_v59, %v2779_v9  ;;  %v3978_v0 = vpop.f32.mrb[43].mxu1 }
 0xd11   :  { %v2853_v14 = vmul.f32 %v2850_v41, %v5531_v38  ;;  %2855 = vrot.lane.b32.xlu1 %v2850_v41, %s4599_s13 }
 0xd13   :  { %2859 = vrot.lane.b32.xlu0 %v2853_v14, %s4606_s27 }
 0xd83   :  { %v2856_v15 = vpop.permute.xlu1 %2855 }
 0xd84   :  { %v2862_v58 = vsel %vm599_vm3, %v5531_v38, %v2856_v15  ;;  %v4210_v38 = vpack.c.bf16 %v70_v55, %v69_v17  ;;  %v81_v55 = vld [vmem:[%s5760_s4 + $0x150] sm:$0xff] }
 0xd85   :  { %v2860_v43 = vpop.permute.xlu0 %2859 }
 0xd86   :  { %v2863_v52 = vsel %vm95_vm0, %v2862_v58, %v2860_v43  ;;  %4211 = vmatpush3.bf16.msra.mxu0 %v4210_v38  ;;  %v3062_v43 = vrot.slane %v5636_v30, %v1300_v19  ;;  %v82_v19 = vld [vmem:[%s5760_s4 + $0x158] sm:$0xff]  ;;  %v83_v38 = vld [vmem:[%s5760_s4 + $0x160] sm:$0xff] }
 0xd87   :  { %4004 = vmatmul.mubr.msk.f32.vlgmr.msra.gmra.mrb[44].mxu1 %vm2868_vm11, %v2863_v52  ;;  %4212 = vmatprep.subr.bf16.mxu0 %v4603_v20 }
 0xd88   :  { %4033 = vmatprep.mubr.msk.f32.mxu1 %vm4604_vm8, %v4605_v29  ;;  %4217 = vmatpush3.bf16.msra.mxu1 %v4216_v5 }
 0xd89   :  { %4218 = vmatprep.subr.bf16.mxu1 %v4603_v20 }
 0xd8a   :  { %4214 = vmatpush3.bf16.msra.mxu0 %v4213_v18 }
 0xd8b   :  { %4227 = vmatprep.subr.bf16.mxu0 %v4603_v20 }
 0xd8c   :  { %4220 = vmatpush3.bf16.msra.mxu1 %v4219_v47 }
 0xd8d   :  { %4221 = vmatprep.subr.bf16.mxu1 %v4603_v20 }
 0xd90   :  { %4223 = vmatpush3.bf16.msra.mxu1 %v4222_v44 }
 0xd91   :  { %4224 = vmatprep.subr.bf16.mxu1 %v4603_v20 }
 0xd94   :  { %4226 = vmatpush3.bf16.msra.mxu1 %v4225_v26 }
 0xd95   :  { %4239 = vmatprep.subr.bf16.mxu1 %v4603_v20 }
 0xe5a   :  { %v2938_v62 = vpop.f32.mrb[44].mxu1 }
 0xe5b   :  { %v2939_v35 = vadd.f32 %v2938_v62, %v2867_v4  ;;  %v4005_v57 = vpop.f32.mrb[45].mxu1 }
 0xe5d   :  { %v2943_v13 = vsel %vm2942_vm12, %v2939_v35, 0.0 }
 0xe5e   :  { %2944 = vadd.xlane.f32.xlu1 %v2943_v13 }
 0xeeb   :  { %v2945_v63 = vpop.xlane.xlu1 %2944 }
 0xeec   :  { %v2947_v54 = vmul.f32 0.03125, %v2945_v63  ;;  %v4228_v63 = vpack.c.bf16 %v82_v19, %v81_v55 }
 0xeee   :  { %v2948_v2 = vsub.f32 %v2939_v35, %v2947_v54  ;;  %v84_v54 = vld [vmem:[%s5760_s4 + $0x168] sm:$0xff] }
 0xef0   :  { %v2949_v45 = vmul.f32 %v2948_v2, %v2948_v2 }
 0xef2   :  { %v2950_v51 = vsel %vm2942_vm12, %v2949_v45, 0.0 }
 0xef3   :  { %2951 = vadd.xlane.f32.xlu0 %v2950_v51 }
 0xf80   :  { %v2952_v60 = vpop.xlane.xlu0 %2951 }
 0xf81   :  { %v2953_v7 = vmul.f32 0.03125, %v2952_v60 }
 0xf83   :  { %v2954_v32 = vadd.f32 1e-05, %v2953_v7  ;;  %v3153_v7 = vrot.slane %v5636_v30, %v1397_v42  ;;  %v85_v42 = vld [vmem:[%s5760_s4 + $0x170] sm:$0xff] }
 0xf85   :  { %4556 = vrsqrt.f32 %v2954_v32 }
 0xf8f   :  { %v4557_v24 = vpop.eup %4556 }
 0xf90   :  { %v2956_v34 = vmul.f32 %v4557_v24, %v2948_v2  ;;  %v4231_v2 = vpack.c.bf16 %v84_v54, %v83_v38  ;;  %v3339_v38 = vrot.slane %v5636_v30, %v2623_v39 }
 0xf92   :  { %v2957_v36 = vmax.f32 %v2956_v34, 0.0 }
 0xf94   :  { %4015 = vmatmul.mubr.msk.f32.vlgmr.msra.gmra.mrb[40].mxu0 %vm599_vm3, %v2957_v36 }
 0xf95   :  { %4044 = vmatprep.mubr.msk.f32.mxu0 %vm4604_vm8, %v4605_v29  ;;  %4229 = vmatpush3.bf16.msra.mxu0 %v4228_v63 }
 0xf96   :  { %4230 = vmatprep.subr.bf16.mxu0 %v4603_v20 }
 0xf99   :  { %4232 = vmatpush3.bf16.msra.mxu0 %v4231_v2 }
 0xf9a   :  { %4233 = vmatprep.subr.bf16.mxu0 %v4603_v20 }
0x1067   :  { %v3031_v27 = vpop.f32.mrb[40].mxu0 }
0x1068   :  { %v3032_v50 = vadd.f32 %v3031_v27, %v2961_v1  ;;  %v4016_v61 = vpop.f32.mrb[41].mxu0 }
0x106a   :  { %v3035_v28 = vsel %vm2942_vm12, %v3032_v50, 0.0 }
0x106b   :  { %3036 = vadd.xlane.f32.xlu0 %v3035_v28 }
0x10f8   :  { %v3037_v21 = vpop.xlane.xlu0 %3036 }
0x10f9   :  { %v3038_v22 = vmul.f32 0.03125, %v3037_v21 }
0x10fb   :  { %v3039_v31 = vsub.f32 %v3032_v50, %v3038_v22 }
0x10fd   :  { %v3040_v16 = vmul.f32 %v3039_v31, %v3039_v31 }
0x10ff   :  { %v3041_v11 = vsel %vm2942_vm12, %v3040_v16, 0.0  ;;  %v86_v16 = vld [vmem:[%s5760_s4 + $0x178] sm:$0xff] }
0x1100   :  { %3042 = vadd.xlane.f32.xlu1 %v3041_v11  ;;  %v87_v11 = vld [vmem:[%s5760_s4 + $0x180] sm:$0xff]  ;;  %v4234_v46 = vpack.c.bf16 %v86_v16, %v85_v42 }
0x1101   :  { %v4237_v40 = vpack.c.bf16 %v88_v12, %v87_v11 }
0x118d   :  { %v3043_v9 = vpop.xlane.xlu1 %3042 }
0x118e   :  { %v3044_v59 = vmul.f32 0.03125, %v3043_v9 }
0x1190   :  { %v3045_v41 = vadd.f32 1e-05, %v3044_v59 }
0x1192   :  { %4558 = vrsqrt.f32 %v3045_v41 }
0x119c   :  { %v4559_v0 = vpop.eup %4558 }
0x119d   :  { %v3047_v14 = vmul.f32 %v4559_v0, %v3039_v31 }
0x119f   :  { %3055 = vrot.lane.b32.xlu0 %v3047_v14, %s4599_s13 }
0x1211   :  { %v3056_v15 = vpop.permute.xlu0 %3055 }
0x1212   :  { %v3058_v58 = vsel %vm599_vm3, %v5555_v25, %v3056_v15 }
0x1213   :  { %4034 = vmatmul.mubr.msk.f32.vlgmr.msra.gmra.mrb[46].mxu1 %vm95_vm0, %v3058_v58  ;;  %vm3048_vm0 = vcmp.lt.s32.totalorder %v5497_v56, 16 }
0x1214   :  { %4066 = vmatprep.mubr.msk.f32.mxu1 %vm4604_vm8, %v4605_v29  ;;  %v3573_v32 = vsel %vm3048_vm0, 1.0, %v4605_v29 }
0x12e6   :  { %v3132_v52 = vpop.f32.mrb[46].mxu1 }
0x12e7   :  { %v3133_v3 = vadd.f32 %v3132_v52, %v3062_v43  ;;  %v4035_v4 = vpop.f32.mrb[47].mxu1 }
0x12e9   :  { %v3136_v62 = vsel %vm2942_vm12, %v3133_v3, 0.0 }
0x12ea   :  { %3137 = vadd.xlane.f32.xlu1 %v3136_v62  ;;  %v92_v62 = vld [vmem:[%s5760_s4 + $0x1a8] sm:$0xff] }
0x1377   :  { %v3138_v35 = vpop.xlane.xlu1 %3137 }
0x1378   :  { %v3139_v57 = vmul.f32 0.03125, %v3138_v35 }
0x137a   :  { %v3140_v13 = vsub.f32 %v3133_v3, %v3139_v57  ;;  %v91_v3 = vld [vmem:[%s5760_s4 + $0x1a0] sm:$0xff] }
0x137b   :  { %v4243_v35 = vpack.c.bf16 %v92_v62, %v91_v3 }
0x137c   :  { %v3141_v17 = vmul.f32 %v3140_v13, %v3140_v13 }
0x137e   :  { %v3142_v25 = vsel %vm2942_vm12, %v3141_v17, 0.0 }
0x137f   :  { %3143 = vadd.xlane.f32.xlu1 %v3142_v25 }
0x140c   :  { %v3144_v45 = vpop.xlane.xlu1 %3143 }
0x140d   :  { %v3145_v51 = vmul.f32 0.03125, %v3144_v45 }
0x140f   :  { %v3146_v23 = vadd.f32 1e-05, %v3145_v51 }
0x1411   :  { %4560 = vrsqrt.f32 %v3146_v23 }
0x141b   :  { %v4561_v6 = vpop.eup %4560 }
0x141c   :  { %v3148_v18 = vmul.f32 %v4561_v6, %v3140_v13 }
0x141e   :  { %v3149_v60 = vmax.f32 %v3148_v18, 0.0 }
0x1420   :  { %4045 = vmatmul.mubr.msk.f32.vlgmr.msra.gmra.mrb[42].mxu0 %vm599_vm3, %v3149_v60 }
0x1421   :  { %4055 = vmatprep.mubr.msk.f32.mxu0 %vm4604_vm8, %v4605_v29  ;;  %4235 = vmatpush3.bf16.msra.mxu0 %v4234_v46  ;;  %v90_v29 = vld [vmem:[%s5760_s4 + $0x198] sm:$0xff]  ;;  %s4607_s4 = smov [#allocation2]  }
0x1422   :  { %4236 = vmatprep.subr.bf16.mxu0 %v4603_v20  ;;  %v4240_v4 = vpack.c.bf16 %v90_v29, %v89_v8  ;;  %s3426_s20 = sshll.u32 %s4607_s4, 4  ;;  %s3427_s20 = int_to_ptr.vmem [resolvable:$true] %s3426_s20 }
0x1423   :  { %s4575_s21 = scalar_lea.vmem %s3427_s20, 64  ;;  %p4580_p1 = scmp.lt.s32.totalorder %s3427_s20, %s3427_s20 }
0x1424   :  { %4241 = vmatpush3.bf16.msra.mxu1 %v4240_v4  ;;  %p4576_p0 = scmp.ne.s32.totalorder %s3427_s20, %s4575_s21  ;;  %p4581_p2 = scmp.lt.s32.totalorder %s4575_s21, %s4575_s21 }
0x1425   :  { %4238 = vmatpush3.bf16.msra.mxu0 %v4237_v40  ;;  %4242 = vmatprep.subr.bf16.mxu1 %v4603_v20 }
0x1426   :  { %p4582_p3 = por %p4581_p2, %p4580_p1 }
0x1428   :  { %4244 = vmatpush3.bf16.msra.mxu1 %v4243_v35  ;;  %p4583_p4 = pnand %p4582_p3, %p4576_p0 }
0x14f3   :  { %v3223_v24 = vpop.f32.mrb[42].mxu0 }
0x14f4   :  { %v3224_v34 = vadd.f32 %v3223_v24, %v3153_v7  ;;  %v4046_v36 = vpop.f32.mrb[43].mxu0 }
0x14f6   :  { %v3227_v1 = vmul.f32 %v3573_v32, %v3224_v34 }
0x14f8   :  { %v3228_v27 = vsel %vm2942_vm12, %v3227_v1, 0.0 }
0x14f9   :  { %3229 = vadd.xlane.f32.xlu1 %v3228_v27 }
0x1586   :  { %v3230_v50 = vpop.xlane.xlu1 %3229 }
0x1587   :  { %v3231_v61 = vmul.f32 0.0625, %v3230_v50 }
0x1589   :  { %v3232_v28 = vsub.f32 %v3224_v34, %v3231_v61 }
0x158b   :  { %v3233_v21 = vmul.f32 %v3573_v32, %v3232_v28 }
0x158d   :  { %v3234_v22 = vmul.f32 %v3233_v21, %v3233_v21 }
0x158f   :  { %v3235_v31 = vsel %vm2942_vm12, %v3234_v22, 0.0 }
0x1590   :  { %3236 = vadd.xlane.f32.xlu1 %v3235_v31 }
0x161d   :  { %v3237_v5 = vpop.xlane.xlu1 %3236 }
0x161e   :  { %v3238_v37 = vmul.f32 0.0625, %v3237_v5 }
0x1620   :  { %v3239_v47 = vadd.f32 1e-05, %v3238_v37 }
0x1622   :  { %4562 = vrsqrt.f32 %v3239_v47 }
0x162c   :  { %v4563_v33 = vpop.eup %4562 }
0x162d   :  { %v3241_v48 = vmul.f32 %v4563_v33, %v3233_v21 }
0x162f   :  { %v3242_v44 = vmax.f32 %v3241_v48, 0.0 }
0x1631   :  { %4056 = vmatmul.mubr.msk.f32.vlgmr.msra.gmra.mrb[44].mxu0 %vm599_vm3, %v3242_v44 }
0x1704   :  { %v3316_v26 = vpop.f32.mrb[44].mxu0 }
0x1705   :  { %v3317_v9 = vadd.f32 %v3316_v26, %v3246_v49  ;;  %v4057_v59 = vpop.f32.mrb[45].mxu0 }
0x1707   :  { %v3320_v41 = vmul.f32 %v3574_v53, %v3317_v9 }
0x1709   :  { %v3321_v0 = vsel %vm2942_vm12, %v3320_v41, 0.0 }
0x170a   :  { %3322 = vadd.xlane.f32.xlu1 %v3321_v0 }
0x1797   :  { %v3323_v14 = vpop.xlane.xlu1 %3322 }
0x1798   :  { %v3324_v15 = vmul.f32 0.125, %v3323_v14 }
0x179a   :  { %v3325_v58 = vsub.f32 %v3317_v9, %v3324_v15 }
0x179c   :  { %v3326_v43 = vmul.f32 %v3574_v53, %v3325_v58 }
0x179e   :  { %v3327_v52 = vmul.f32 %v3326_v43, %v3326_v43 }
0x17a0   :  { %v3328_v56 = vsel %vm2942_vm12, %v3327_v52, 0.0 }
0x17a1   :  { %3329 = vadd.xlane.f32.xlu1 %v3328_v56 }
0x182e   :  { %v3330_v57 = vpop.xlane.xlu1 %3329 }
0x182f   :  { %v3331_v13 = vmul.f32 0.125, %v3330_v57 }
0x1831   :  { %v3332_v17 = vadd.f32 1e-05, %v3331_v13 }
0x1833   :  { %4564 = vrsqrt.f32 %v3332_v17 }
0x183d   :  { %v4565_v25 = vpop.eup %4564 }
0x183e   :  { %v3334_v55 = vmul.f32 %v4565_v25, %v3326_v43 }
0x1840   :  { %v3335_v19 = vmax.f32 %v3334_v55, 0.0 }
0x1842   :  { %4067 = vmatmul.mubr.msk.f32.vlgmr.msra.gmra.mrb[48].mxu1 %vm599_vm3, %v3335_v19 }
0x1915   :  { %v3409_v63 = vpop.f32.mrb[48].mxu1 }
0x1916   :  { %v3410_v54 = vadd.f32 %v3409_v63, %v3339_v38  ;;  %v4068_v2 = vpop.f32.mrb[49].mxu1 }
0x1918   :  { %v3413_v45 = vsub.f32 0.0, %v3410_v54 }
0x191a   :  { %v3414_v51 = vmul.f32 1.442695, %v3413_v45 }
0x191c   :  { %4566 = vpow2.f32 %v3414_v51 }
0x1926   :  { %v4567_v20 = vpop.eup %4566 }
0x1927   :  { %v3416_v23 = vadd.f32 1.0, %v4567_v20 }
0x1929   :  { %4568 = vrcp.f32 %v3416_v23 }
0x1933   :  { %v4569_v6 = vpop.eup %4568 }
0x1934   :  { %3419 = vst.msk [vmem:[#allocation2] sm:$0xf] %vm2942_vm12, %v4569_v6 }
0x1935   :  { %4586 = shalt.err (!%p4583_p4)
}
0x1936   :  { %s4587_s25 = scalar_lea.hbm %s5761_s5, 64 }
0x1937   :  { %p4588_p5 = scmp.ne.s32.totalorder %s5761_s5, %s4587_s25  ;;  %p4591_p6 = scmp.lt.u32.totalorder %s4587_s25, %s5761_s5 }
0x1939   :  { %p4593_p7 = pnand %p4591_p6, %p4588_p5 }
0x193b   :  { %4596 = shalt.err (!%p4593_p7)
}
0x193c   :  { %3429 = dma.vmem_to_hbm [thread:$0]  %s3427_s20, 64, %s5761_s5, [#allocation3]  }
0x193d   :  { %4597 = dma.done.wait [#allocation3], 64  }
0x193e   :  { %4598 = vsyncadd [#allocation3], 4294967232 }
0x193f   :  { %3433 = vsyncpa [#allocation3], 1 }

</bundles_post_ra>
